<compile_context>
chip_gen: v5e
topology: v5e:2x2
jax: 0.10.0
libtpu: 0.0.40
codegen_flags: <defaults>
</compile_context>

<pallas_src>
import functools

import jax
import jax.numpy as jnp
from jax.experimental import pallas as pl
from jax.experimental.pallas import tpu as pltpu


# ----------------------------- fused Pallas kernel ---------------------------

def _make_fused_kernel(times):
    """Fused lin0 + edge-NN + times*(NNConv + GRU) kernel (times is static)."""

    def kernel(x_ref, w0_ref, b0_ref,                      # lin0
               ea_ref, w1_ref, b1_ref, w2t_ref, b2t_ref,   # edge network (w2 k-major/T)
               gt_ref, s_ref,                              # gather^T (N,E) / scatter-mean (N,E)
               root_ref, cb_ref,                           # NNConv root weight + bias
               wrz_ref, brz_ref,                           # fused r/z GRU gates (2H,2H)/(1,2H)
               wni_ref, wnh_ref, bni_ref, bnh_ref,         # n-gate GRU weights/biases
               o_ref,                                      # output (N, H) f32
               we_sc,                                      # scratch (H, H, E): We[e,k,j] -> [k,j,e]
               x_sc):                                      # scratch (H, E): gathered src feats^T
        H = root_ref.shape[0]
        E = gt_ref.shape[1]
        f32 = jnp.float32

        def mxu(a, b):
            # MXU matmul: cast the activation to the (possibly bf16) weight dtype,
            # always accumulate in f32.
            return jnp.dot(a.astype(b.dtype), b, preferred_element_type=f32)

        # ---- lin0: out = ReLU(x @ W0 + b0); state stays in vregs ----
        out = jnp.maximum(mxu(x_ref[...], w0_ref[...]) + b0_ref[...], 0.0)      # (N, H) f32

        # ---- edge network (loop invariant, computed once) ----
        eh = jnp.maximum(mxu(ea_ref[...], w1_ref[...]) + b1_ref[...], 0.0)      # (E, H) f32
        eh_t = eh.T.astype(w2t_ref.dtype)                                       # (H_in, E)

        # Fill we_sc k-major & transposed: we_sc[k] = We[:, k, :].T  (H_j, E).
        # One-time cost; all hot-loop reads become leading-axis views.
        def fill(k, carry):
            we_sc[k] = (jnp.dot(w2t_ref[k], eh_t, preferred_element_type=f32)
                        + b2t_ref[k]).astype(we_sc.dtype)
            return carry
        jax.lax.fori_loop(0, H, fill, 0)

        # ---- times x (NNConv + GRU); fully unrolled, carry in vregs ----
        for _ in range(times):
            # gather of source-node features (transposed): x_sc[k, e] = out[src_e, k]
            x_sc[...] = jnp.dot(out.T.astype(gt_ref.dtype), gt_ref[...],
                                preferred_element_type=f32)                     # (H, E)

            # per-edge messages, transposed layout: msgs_t[j, e] = sum_k x[k,e]*We[e,k,j]
            # leading-axis views of we_sc, (1,E) sublane rows of x_sc, 4 acc chains.
            accs = [jnp.zeros((H, E), f32) for _ in range(4)]
            for k in range(H):
                accs[k % 4] = accs[k % 4] + we_sc[k] * x_sc[pl.ds(k, 1), :]
            msgs_t = (accs[0] + accs[1]) + (accs[2] + accs[3])                  # (H, E)

            # scatter-mean (kept f32: carries 1/deg) + root transform + bias + ReLU
            agg = jax.lax.dot_general(s_ref[...], msgs_t,
                                      (((1,), (1,)), ((), ())),
                                      preferred_element_type=f32)               # (N, H)
            m = jnp.maximum(agg + mxu(out, root_ref[...]) + cb_ref[...], 0.0)   # (N, H)

            # GRU cell (PyTorch gate order r, z, n); r/z fused into one matmul.
            mo = jnp.concatenate([m, out], axis=1)                              # (N, 2H)
            rz = jax.nn.sigmoid(mxu(mo, wrz_ref[...]) + brz_ref[...])           # (N, 2H)
            r, z = rz[:, :H], rz[:, H:]
            gi_n = mxu(m, wni_ref[...]) + bni_ref[...]
            gh_n = mxu(out, wnh_ref[...]) + bnh_ref[...]
            n = jnp.tanh(gi_n + r * gh_n)
            out = (1.0 - z) * n + z * out

        o_ref[...] = out                                                         # single write-back

    return kernel


# ----------------------------- wrapper ---------------------------------------

@functools.partial(jax.jit, static_argnames=("times", "compute_dtype"))
def causal_feature_net(x, edge_src, edge_dst, edge_attr, params, times,
                       compute_dtype=jnp.float32):
    N = x.shape[0]
    H = params["root"].shape[0]
    E = edge_attr.shape[0]
    cdt = compute_dtype
    f32 = jnp.float32

    # Dense gather/scatter operators (fine at toy N/E; see TODO(synk) above for scale).
    gt = (edge_src[None, :] == jnp.arange(N)[:, None]).astype(cdt)              # (N, E) = G^T
    onehot = (edge_dst[None, :] == jnp.arange(N)[:, None]).astype(f32)          # (N, E)
    s = onehot / jnp.maximum(onehot.sum(axis=1, keepdims=True), 1.0)            # scatter-mean, f32

    # Edge-NN layer-2 weights, k-major & per-k transposed: w2t[k, j, i] = w2[i, k*H + j]
    w2t = jnp.transpose(params["w2"].reshape(H, H, H), (1, 2, 0)).astype(cdt)   # (H, H, H)
    b2t = params["b2"].reshape(H, H, 1)                                         # (H, H, 1) f32

    # Fused r/z GRU gates: [m | h] (N, 2H) @ w_rz (2H, 2H); r/z biases pre-summed.
    wih, whh, bih, bhh = params["wih"], params["whh"], params["bih"], params["bhh"]
    w_rz = jnp.concatenate(
        [jnp.concatenate([wih[0], wih[1]], axis=1),
         jnp.concatenate([whh[0], whh[1]], axis=1)], axis=0).astype(cdt)        # (2H, 2H)
    b_rz = jnp.concatenate([bih[0] + bhh[0], bih[1] + bhh[1]], axis=1)          # (1, 2H) f32

    kernel = _make_fused_kernel(times)
    vmem = lambda: pl.BlockSpec(memory_space=pltpu.MemorySpace.VMEM)

    return pl.pallas_call(
        kernel,
        out_shape=jax.ShapeDtypeStruct((N, H), f32),
        in_specs=[vmem() for _ in range(18)],
        out_specs=vmem(),
        scratch_shapes=[pltpu.VMEM((H, H, E), cdt),     # we_sc: k-major transposed edge weights
                        pltpu.VMEM((H, E), f32)],       # x_sc : gathered source features^T
    )(x.astype(cdt), params["w0"].astype(cdt), params["b0"].reshape(1, -1),
      edge_attr.astype(cdt), params["w1"].astype(cdt), params["b1"].reshape(1, -1),
      w2t, b2t,
      gt, s,
      params["root"].astype(cdt), params["conv_bias"].reshape(1, -1),
      w_rz, b_rz,
      wih[2].astype(cdt), whh[2].astype(cdt), bih[2], bhh[2])


# ----------------------------- pure-JAX reference ----------------------------

def reference(x, edge_src, edge_dst, edge_attr, p, times):
    N = x.shape[0]
    H = p["root"].shape[0]
    E = edge_attr.shape[0]

    def lin(a, w, b, relu):
        y = a @ w + b
        return jnp.maximum(y, 0.0) if relu else y

    out = lin(x, p["w0"], p["b0"], True)
    eh = lin(edge_attr, p["w1"], p["b1"], True)
    We = lin(eh, p["w2"], p["b2"], False).reshape(E, H, H)
    onehot = (edge_dst[None, :] == jnp.arange(N)[:, None]).astype(jnp.float32)
    S = onehot / jnp.maximum(onehot.sum(axis=1, keepdims=True), 1.0)
    h = out
    for _ in range(times):
        xs = out[edge_src]
        msgs = jnp.einsum("eh,ehk->ek", xs, We)
        m = jnp.maximum(S @ msgs + out @ p["root"] + p["conv_bias"], 0.0)
        r = jax.nn.sigmoid(m @ p["wih"][0] + p["bih"][0] + h @ p["whh"][0] + p["bhh"][0])
        z = jax.nn.sigmoid(m @ p["wih"][1] + p["bih"][1] + h @ p["whh"][1] + p["bhh"][1])
        n = jnp.tanh(m @ p["wih"][2] + p["bih"][2] + r * (h @ p["whh"][2] + p["bhh"][2]))
        h = (1.0 - z) * n + z * h
        out = h
    return out


# ----------------------------- main -------------------------------------------

if __name__ == "__main__":
    N, I_DIM, H_DIM, E_DIM, TIMES = 8, 16, 32, 8, 3

    key = jax.random.PRNGKey(0)
    ks = jax.random.split(key, 16)

    # deterministic synthetic parameters (shapes from the module __init__)
    params = {
        "w0": 0.1 * jax.random.normal(ks[0], (I_DIM, H_DIM), jnp.float32),
        "b0": 0.1 * jax.random.normal(ks[1], (H_DIM,), jnp.float32),
        "w1": 0.1 * jax.random.normal(ks[2], (E_DIM, H_DIM), jnp.float32),
        "b1": 0.1 * jax.random.normal(ks[3], (H_DIM,), jnp.float32),
        "w2": 0.1 * jax.random.normal(ks[4], (H_DIM, H_DIM * H_DIM), jnp.float32),
        "b2": 0.1 * jax.random.normal(ks[5], (H_DIM * H_DIM,), jnp.float32),
        "root": 0.1 * jax.random.normal(ks[6], (H_DIM, H_DIM), jnp.float32),
        "conv_bias": 0.1 * jax.random.normal(ks[7], (H_DIM,), jnp.float32),
        "wih": 0.1 * jax.random.normal(ks[8], (3, H_DIM, H_DIM), jnp.float32),
        "whh": 0.1 * jax.random.normal(ks[9], (3, H_DIM, H_DIM), jnp.float32),
        "bih": 0.1 * jax.random.normal(ks[10], (3, 1, H_DIM), jnp.float32),
        "bhh": 0.1 * jax.random.normal(ks[11], (3, 1, H_DIM), jnp.float32),
    }

    # deterministic graph: bidirectional ring over N nodes (E = 2N edges)
    fwd = jnp.arange(N, dtype=jnp.int32)
    edge_src = jnp.concatenate([fwd, (fwd + 1) % N])           # (16,)
    edge_dst = jnp.concatenate([(fwd + 1) % N, fwd])           # (16,)
    E = edge_src.shape[0]

    x = jax.random.normal(ks[12], (N, I_DIM), jnp.float32)          # batch.x
    edge_attr = jax.random.normal(ks[13], (E, E_DIM), jnp.float32)  # batch.edge_attr

    ref = reference(x, edge_src, edge_dst, edge_attr, params, TIMES)

    # exact f32 path (matches the f32 PyTorch module semantics)
    out = causal_feature_net(x, edge_src, edge_dst, edge_attr, params,
                             times=TIMES, compute_dtype=jnp.float32)
    out = jax.block_until_ready(out)
    assert out.shape == (N, H_DIM)
    assert jnp.allclose(out, ref, atol=1e-3, rtol=1e-3), "f32 kernel mismatch vs reference"

    # bf16-MXU path (f32 accumulation / f32 elementwise), looser tolerance
    out_bf16 = causal_feature_net(x, edge_src, edge_dst, edge_attr, params,
                                  times=TIMES, compute_dtype=jnp.bfloat16)
    out_bf16 = jax.block_until_ready(out_bf16)
    assert jnp.allclose(out_bf16, ref, atol=5e-2, rtol=5e-2), "bf16 kernel mismatch vs reference"

    print("KERNEL_OK")
</pallas_src>

<mosaic_0001>
module attributes {stable_mosaic.version = 11 : i64} {
  func.func @kernel(%arg0: memref<8x16xf32, #tpu.memory_space<vmem>>, %arg1: memref<16x32xf32, #tpu.memory_space<vmem>>, %arg2: memref<1x32xf32, #tpu.memory_space<vmem>>, %arg3: memref<16x8xf32, #tpu.memory_space<vmem>>, %arg4: memref<8x32xf32, #tpu.memory_space<vmem>>, %arg5: memref<1x32xf32, #tpu.memory_space<vmem>>, %arg6: memref<32x32x32xf32, #tpu.memory_space<vmem>>, %arg7: memref<32x32x1xf32, #tpu.memory_space<vmem>>, %arg8: memref<8x16xf32, #tpu.memory_space<vmem>>, %arg9: memref<8x16xf32, #tpu.memory_space<vmem>>, %arg10: memref<32x32xf32, #tpu.memory_space<vmem>>, %arg11: memref<1x32xf32, #tpu.memory_space<vmem>>, %arg12: memref<64x64xf32, #tpu.memory_space<vmem>>, %arg13: memref<1x64xf32, #tpu.memory_space<vmem>>, %arg14: memref<32x32xf32, #tpu.memory_space<vmem>>, %arg15: memref<32x32xf32, #tpu.memory_space<vmem>>, %arg16: memref<1x32xf32, #tpu.memory_space<vmem>>, %arg17: memref<1x32xf32, #tpu.memory_space<vmem>>, %arg18: memref<8x32xf32, #tpu.memory_space<vmem>>, %arg19: memref<32x32x16xf32, #tpu.memory_space<vmem>>, %arg20: memref<32x16xf32, #tpu.memory_space<vmem>>) attributes {dimension_semantics = [], scalar_prefetch = 0 : i64, scratch_operands = 2 : i64, tpu.core_type = #tpu.core_type<tc>} {
    %c0 = arith.constant 0 : index
    %c0_0 = arith.constant 0 : index
    %0 = vector.load %arg0[%c0, %c0_0] : memref<8x16xf32, #tpu.memory_space<vmem>>, vector<8x16xf32>
    %c0_1 = arith.constant 0 : index
    %c0_2 = arith.constant 0 : index
    %1 = vector.load %arg1[%c0_1, %c0_2] : memref<16x32xf32, #tpu.memory_space<vmem>>, vector<16x32xf32>
    %cst = arith.constant dense<0.000000e+00> : vector<8x32xf32>
    %2 = tpu.matmul %0, %1, %cst {dimension_numbers = #tpu.dot_dimension_numbers<[1], [0], [0], [1], [0, 0, 1, 1], [], []>} : vector<8x16xf32>, vector<16x32xf32>, vector<8x32xf32> -> vector<8x32xf32>
    %c0_3 = arith.constant 0 : index
    %c0_4 = arith.constant 0 : index
    %3 = vector.load %arg2[%c0_3, %c0_4] : memref<1x32xf32, #tpu.memory_space<vmem>>, vector<1x32xf32>
    %4 = vector.broadcast %3 : vector<1x32xf32> to vector<8x32xf32>
    %5 = arith.addf %2, %4 : vector<8x32xf32>
    %cst_5 = arith.constant 0.000000e+00 : f32
    %6 = vector.broadcast %cst_5 : f32 to vector<8x32xf32>
    %7 = arith.maximumf %5, %6 : vector<8x32xf32>
    %c0_6 = arith.constant 0 : index
    %c0_7 = arith.constant 0 : index
    %8 = vector.load %arg3[%c0_6, %c0_7] : memref<16x8xf32, #tpu.memory_space<vmem>>, vector<16x8xf32>
    %c0_8 = arith.constant 0 : index
    %c0_9 = arith.constant 0 : index
    %9 = vector.load %arg4[%c0_8, %c0_9] : memref<8x32xf32, #tpu.memory_space<vmem>>, vector<8x32xf32>
    %cst_10 = arith.constant dense<0.000000e+00> : vector<16x32xf32>
    %10 = tpu.matmul %8, %9, %cst_10 {dimension_numbers = #tpu.dot_dimension_numbers<[1], [0], [0], [1], [0, 0, 1, 1], [], []>} : vector<16x8xf32>, vector<8x32xf32>, vector<16x32xf32> -> vector<16x32xf32>
    %c0_11 = arith.constant 0 : index
    %c0_12 = arith.constant 0 : index
    %11 = vector.load %arg5[%c0_11, %c0_12] : memref<1x32xf32, #tpu.memory_space<vmem>>, vector<1x32xf32>
    %12 = vector.broadcast %11 : vector<1x32xf32> to vector<16x32xf32>
    %13 = arith.addf %10, %12 : vector<16x32xf32>
    %cst_13 = arith.constant 0.000000e+00 : f32
    %14 = vector.broadcast %cst_13 : f32 to vector<16x32xf32>
    %15 = arith.maximumf %13, %14 : vector<16x32xf32>
    %16 = tpu.transpose %15, [1, 0] : vector<16x32xf32> -> vector<32x16xf32>
    %c0_i32 = arith.constant 0 : i32
    %c32_i32 = arith.constant 32 : i32
    %17 = arith.addi %c0_i32, %c32_i32 : i32
    %c1_i32 = arith.constant 1 : i32
    scf.for %arg21 = %c0_i32 to %17 step %c1_i32  : i32 {
      %751 = arith.index_cast %arg21 : i32 to index
      %c0_571 = arith.constant 0 : index
      %c0_572 = arith.constant 0 : index
      %752 = vector.load %arg6[%751, %c0_571, %c0_572] : memref<32x32x32xf32, #tpu.memory_space<vmem>>, vector<1x32x32xf32>
      %753 = vector.shape_cast %752 : vector<1x32x32xf32> to vector<32x32xf32>
      %cst_573 = arith.constant dense<0.000000e+00> : vector<32x16xf32>
      %754 = tpu.matmul %753, %16, %cst_573 {dimension_numbers = #tpu.dot_dimension_numbers<[1], [0], [0], [1], [0, 0, 1, 1], [], []>} : vector<32x32xf32>, vector<32x16xf32>, vector<32x16xf32> -> vector<32x16xf32>
      %755 = arith.index_cast %arg21 : i32 to index
      %c0_574 = arith.constant 0 : index
      %c0_575 = arith.constant 0 : index
      %756 = vector.load %arg7[%755, %c0_574, %c0_575] : memref<32x32x1xf32, #tpu.memory_space<vmem>>, vector<1x32x1xf32>
      %757 = vector.shape_cast %756 : vector<1x32x1xf32> to vector<32x1xf32>
      %758 = vector.broadcast %757 : vector<32x1xf32> to vector<32x16xf32>
      %759 = arith.addf %754, %758 : vector<32x16xf32>
      %760 = arith.index_cast %arg21 : i32 to index
      %c0_576 = arith.constant 0 : index
      %c0_577 = arith.constant 0 : index
      %761 = vector.load %arg19[%760, %c0_576, %c0_577] : memref<32x32x16xf32, #tpu.memory_space<vmem>>, vector<1x32x16xf32>
      %762 = vector.shape_cast %761 : vector<1x32x16xf32> to vector<32x16xf32>
      %763 = vector.shape_cast %759 : vector<32x16xf32> to vector<1x32x16xf32>
      tpu.vector_store %arg19[%760, %c0_576, %c0_577], %763 {strides = array<i32>} : memref<32x32x16xf32, #tpu.memory_space<vmem>>, vector<1x32x16xf32>,
    }
    %c32_i32_14 = arith.constant 32 : i32
    %18 = tpu.transpose %7, [1, 0] : vector<8x32xf32> -> vector<32x8xf32>
    %c0_15 = arith.constant 0 : index
    %c0_16 = arith.constant 0 : index
    %19 = vector.load %arg8[%c0_15, %c0_16] : memref<8x16xf32, #tpu.memory_space<vmem>>, vector<8x16xf32>
    %cst_17 = arith.constant dense<0.000000e+00> : vector<32x16xf32>
    %20 = tpu.matmul %18, %19, %cst_17 {dimension_numbers = #tpu.dot_dimension_numbers<[1], [0], [0], [1], [0, 0, 1, 1], [], []>} : vector<32x8xf32>, vector<8x16xf32>, vector<32x16xf32> -> vector<32x16xf32>
    %c0_18 = arith.constant 0 : index
    %c0_19 = arith.constant 0 : index
    %21 = vector.load %arg20[%c0_18, %c0_19] : memref<32x16xf32, #tpu.memory_space<vmem>>, vector<32x16xf32>
    tpu.vector_store %arg20[%c0_18, %c0_19], %20 {strides = array<i32>} : memref<32x16xf32, #tpu.memory_space<vmem>>, vector<32x16xf32>,
    %cst_20 = arith.constant 0.000000e+00 : f32
    %22 = vector.broadcast %cst_20 : f32 to vector<32x16xf32>
    %cst_21 = arith.constant 0.000000e+00 : f32
    %23 = vector.broadcast %cst_21 : f32 to vector<32x16xf32>
    %cst_22 = arith.constant 0.000000e+00 : f32
    %24 = vector.broadcast %cst_22 : f32 to vector<32x16xf32>
    %cst_23 = arith.constant 0.000000e+00 : f32
    %25 = vector.broadcast %cst_23 : f32 to vector<32x16xf32>
    %c0_24 = arith.constant 0 : index
    %c0_25 = arith.constant 0 : index
    %c0_26 = arith.constant 0 : index
    %26 = vector.load %arg19[%c0_24, %c0_25, %c0_26] : memref<32x32x16xf32, #tpu.memory_space<vmem>>, vector<1x32x16xf32>
    %27 = vector.shape_cast %26 : vector<1x32x16xf32> to vector<32x16xf32>
    %c0_27 = arith.constant 0 : index
    %c0_28 = arith.constant 0 : index
    %28 = vector.load %arg20[%c0_27, %c0_28] : memref<32x16xf32, #tpu.memory_space<vmem>>, vector<1x16xf32>
    %29 = vector.broadcast %28 : vector<1x16xf32> to vector<32x16xf32>
    %30 = arith.mulf %27, %29 : vector<32x16xf32>
    %31 = arith.addf %22, %30 : vector<32x16xf32>
    %c1 = arith.constant 1 : index
    %c0_29 = arith.constant 0 : index
    %c0_30 = arith.constant 0 : index
    %32 = vector.load %arg19[%c1, %c0_29, %c0_30] : memref<32x32x16xf32, #tpu.memory_space<vmem>>, vector<1x32x16xf32>
    %33 = vector.shape_cast %32 : vector<1x32x16xf32> to vector<32x16xf32>
    %c1_31 = arith.constant 1 : index
    %c0_32 = arith.constant 0 : index
    %34 = vector.load %arg20[%c1_31, %c0_32] : memref<32x16xf32, #tpu.memory_space<vmem>>, vector<1x16xf32>
    %35 = vector.broadcast %34 : vector<1x16xf32> to vector<32x16xf32>
    %36 = arith.mulf %33, %35 : vector<32x16xf32>
    %37 = arith.addf %23, %36 : vector<32x16xf32>
    %c2 = arith.constant 2 : index
    %c0_33 = arith.constant 0 : index
    %c0_34 = arith.constant 0 : index
    %38 = vector.load %arg19[%c2, %c0_33, %c0_34] : memref<32x32x16xf32, #tpu.memory_space<vmem>>, vector<1x32x16xf32>
    %39 = vector.shape_cast %38 : vector<1x32x16xf32> to vector<32x16xf32>
    %c2_35 = arith.constant 2 : index
    %c0_36 = arith.constant 0 : index
    %40 = vector.load %arg20[%c2_35, %c0_36] : memref<32x16xf32, #tpu.memory_space<vmem>>, vector<1x16xf32>
    %41 = vector.broadcast %40 : vector<1x16xf32> to vector<32x16xf32>
    %42 = arith.mulf %39, %41 : vector<32x16xf32>
    %43 = arith.addf %24, %42 : vector<32x16xf32>
    %c3 = arith.constant 3 : index
    %c0_37 = arith.constant 0 : index
    %c0_38 = arith.constant 0 : index
    %44 = vector.load %arg19[%c3, %c0_37, %c0_38] : memref<32x32x16xf32, #tpu.memory_space<vmem>>, vector<1x32x16xf32>
    %45 = vector.shape_cast %44 : vector<1x32x16xf32> to vector<32x16xf32>
    %c3_39 = arith.constant 3 : index
    %c0_40 = arith.constant 0 : index
    %46 = vector.load %arg20[%c3_39, %c0_40] : memref<32x16xf32, #tpu.memory_space<vmem>>, vector<1x16xf32>
    %47 = vector.broadcast %46 : vector<1x16xf32> to vector<32x16xf32>
    %48 = arith.mulf %45, %47 : vector<32x16xf32>
    %49 = arith.addf %25, %48 : vector<32x16xf32>
    %c4 = arith.constant 4 : index
    %c0_41 = arith.constant 0 : index
    %c0_42 = arith.constant 0 : index
    %50 = vector.load %arg19[%c4, %c0_41, %c0_42] : memref<32x32x16xf32, #tpu.memory_space<vmem>>, vector<1x32x16xf32>
    %51 = vector.shape_cast %50 : vector<1x32x16xf32> to vector<32x16xf32>
    %c4_43 = arith.constant 4 : index
    %c0_44 = arith.constant 0 : index
    %52 = vector.load %arg20[%c4_43, %c0_44] : memref<32x16xf32, #tpu.memory_space<vmem>>, vector<1x16xf32>
    %53 = vector.broadcast %52 : vector<1x16xf32> to vector<32x16xf32>
    %54 = arith.mulf %51, %53 : vector<32x16xf32>
    %55 = arith.addf %31, %54 : vector<32x16xf32>
    %c5 = arith.constant 5 : index
    %c0_45 = arith.constant 0 : index
    %c0_46 = arith.constant 0 : index
    %56 = vector.load %arg19[%c5, %c0_45, %c0_46] : memref<32x32x16xf32, #tpu.memory_space<vmem>>, vector<1x32x16xf32>
    %57 = vector.shape_cast %56 : vector<1x32x16xf32> to vector<32x16xf32>
    %c5_47 = arith.constant 5 : index
    %c0_48 = arith.constant 0 : index
    %58 = vector.load %arg20[%c5_47, %c0_48] : memref<32x16xf32, #tpu.memory_space<vmem>>, vector<1x16xf32>
    %59 = vector.broadcast %58 : vector<1x16xf32> to vector<32x16xf32>
    %60 = arith.mulf %57, %59 : vector<32x16xf32>
    %61 = arith.addf %37, %60 : vector<32x16xf32>
    %c6 = arith.constant 6 : index
    %c0_49 = arith.constant 0 : index
    %c0_50 = arith.constant 0 : index
    %62 = vector.load %arg19[%c6, %c0_49, %c0_50] : memref<32x32x16xf32, #tpu.memory_space<vmem>>, vector<1x32x16xf32>
    %63 = vector.shape_cast %62 : vector<1x32x16xf32> to vector<32x16xf32>
    %c6_51 = arith.constant 6 : index
    %c0_52 = arith.constant 0 : index
    %64 = vector.load %arg20[%c6_51, %c0_52] : memref<32x16xf32, #tpu.memory_space<vmem>>, vector<1x16xf32>
    %65 = vector.broadcast %64 : vector<1x16xf32> to vector<32x16xf32>
    %66 = arith.mulf %63, %65 : vector<32x16xf32>
    %67 = arith.addf %43, %66 : vector<32x16xf32>
    %c7 = arith.constant 7 : index
    %c0_53 = arith.constant 0 : index
    %c0_54 = arith.constant 0 : index
    %68 = vector.load %arg19[%c7, %c0_53, %c0_54] : memref<32x32x16xf32, #tpu.memory_space<vmem>>, vector<1x32x16xf32>
    %69 = vector.shape_cast %68 : vector<1x32x16xf32> to vector<32x16xf32>
    %c7_55 = arith.constant 7 : index
    %c0_56 = arith.constant 0 : index
    %70 = vector.load %arg20[%c7_55, %c0_56] : memref<32x16xf32, #tpu.memory_space<vmem>>, vector<1x16xf32>
    %71 = vector.broadcast %70 : vector<1x16xf32> to vector<32x16xf32>
    %72 = arith.mulf %69, %71 : vector<32x16xf32>
    %73 = arith.addf %49, %72 : vector<32x16xf32>
    %c8 = arith.constant 8 : index
    %c0_57 = arith.constant 0 : index
    %c0_58 = arith.constant 0 : index
    %74 = vector.load %arg19[%c8, %c0_57, %c0_58] : memref<32x32x16xf32, #tpu.memory_space<vmem>>, vector<1x32x16xf32>
    %75 = vector.shape_cast %74 : vector<1x32x16xf32> to vector<32x16xf32>
    %c8_59 = arith.constant 8 : index
    %c0_60 = arith.constant 0 : index
    %76 = vector.load %arg20[%c8_59, %c0_60] : memref<32x16xf32, #tpu.memory_space<vmem>>, vector<1x16xf32>
    %77 = vector.broadcast %76 : vector<1x16xf32> to vector<32x16xf32>
    %78 = arith.mulf %75, %77 : vector<32x16xf32>
    %79 = arith.addf %55, %78 : vector<32x16xf32>
    %c9 = arith.constant 9 : index
    %c0_61 = arith.constant 0 : index
    %c0_62 = arith.constant 0 : index
    %80 = vector.load %arg19[%c9, %c0_61, %c0_62] : memref<32x32x16xf32, #tpu.memory_space<vmem>>, vector<1x32x16xf32>
    %81 = vector.shape_cast %80 : vector<1x32x16xf32> to vector<32x16xf32>
    %c9_63 = arith.constant 9 : index
    %c0_64 = arith.constant 0 : index
    %82 = vector.load %arg20[%c9_63, %c0_64] : memref<32x16xf32, #tpu.memory_space<vmem>>, vector<1x16xf32>
    %83 = vector.broadcast %82 : vector<1x16xf32> to vector<32x16xf32>
    %84 = arith.mulf %81, %83 : vector<32x16xf32>
    %85 = arith.addf %61, %84 : vector<32x16xf32>
    %c10 = arith.constant 10 : index
    %c0_65 = arith.constant 0 : index
    %c0_66 = arith.constant 0 : index
    %86 = vector.load %arg19[%c10, %c0_65, %c0_66] : memref<32x32x16xf32, #tpu.memory_space<vmem>>, vector<1x32x16xf32>
    %87 = vector.shape_cast %86 : vector<1x32x16xf32> to vector<32x16xf32>
    %c10_67 = arith.constant 10 : index
    %c0_68 = arith.constant 0 : index
    %88 = vector.load %arg20[%c10_67, %c0_68] : memref<32x16xf32, #tpu.memory_space<vmem>>, vector<1x16xf32>
    %89 = vector.broadcast %88 : vector<1x16xf32> to vector<32x16xf32>
    %90 = arith.mulf %87, %89 : vector<32x16xf32>
    %91 = arith.addf %67, %90 : vector<32x16xf32>
    %c11 = arith.constant 11 : index
    %c0_69 = arith.constant 0 : index
    %c0_70 = arith.constant 0 : index
    %92 = vector.load %arg19[%c11, %c0_69, %c0_70] : memref<32x32x16xf32, #tpu.memory_space<vmem>>, vector<1x32x16xf32>
    %93 = vector.shape_cast %92 : vector<1x32x16xf32> to vector<32x16xf32>
    %c11_71 = arith.constant 11 : index
    %c0_72 = arith.constant 0 : index
    %94 = vector.load %arg20[%c11_71, %c0_72] : memref<32x16xf32, #tpu.memory_space<vmem>>, vector<1x16xf32>
    %95 = vector.broadcast %94 : vector<1x16xf32> to vector<32x16xf32>
    %96 = arith.mulf %93, %95 : vector<32x16xf32>
    %97 = arith.addf %73, %96 : vector<32x16xf32>
    %c12 = arith.constant 12 : index
    %c0_73 = arith.constant 0 : index
    %c0_74 = arith.constant 0 : index
    %98 = vector.load %arg19[%c12, %c0_73, %c0_74] : memref<32x32x16xf32, #tpu.memory_space<vmem>>, vector<1x32x16xf32>
    %99 = vector.shape_cast %98 : vector<1x32x16xf32> to vector<32x16xf32>
    %c12_75 = arith.constant 12 : index
    %c0_76 = arith.constant 0 : index
    %100 = vector.load %arg20[%c12_75, %c0_76] : memref<32x16xf32, #tpu.memory_space<vmem>>, vector<1x16xf32>
    %101 = vector.broadcast %100 : vector<1x16xf32> to vector<32x16xf32>
    %102 = arith.mulf %99, %101 : vector<32x16xf32>
    %103 = arith.addf %79, %102 : vector<32x16xf32>
    %c13 = arith.constant 13 : index
    %c0_77 = arith.constant 0 : index
    %c0_78 = arith.constant 0 : index
    %104 = vector.load %arg19[%c13, %c0_77, %c0_78] : memref<32x32x16xf32, #tpu.memory_space<vmem>>, vector<1x32x16xf32>
    %105 = vector.shape_cast %104 : vector<1x32x16xf32> to vector<32x16xf32>
    %c13_79 = arith.constant 13 : index
    %c0_80 = arith.constant 0 : index
    %106 = vector.load %arg20[%c13_79, %c0_80] : memref<32x16xf32, #tpu.memory_space<vmem>>, vector<1x16xf32>
    %107 = vector.broadcast %106 : vector<1x16xf32> to vector<32x16xf32>
    %108 = arith.mulf %105, %107 : vector<32x16xf32>
    %109 = arith.addf %85, %108 : vector<32x16xf32>
    %c14 = arith.constant 14 : index
    %c0_81 = arith.constant 0 : index
    %c0_82 = arith.constant 0 : index
    %110 = vector.load %arg19[%c14, %c0_81, %c0_82] : memref<32x32x16xf32, #tpu.memory_space<vmem>>, vector<1x32x16xf32>
    %111 = vector.shape_cast %110 : vector<1x32x16xf32> to vector<32x16xf32>
    %c14_83 = arith.constant 14 : index
    %c0_84 = arith.constant 0 : index
    %112 = vector.load %arg20[%c14_83, %c0_84] : memref<32x16xf32, #tpu.memory_space<vmem>>, vector<1x16xf32>
    %113 = vector.broadcast %112 : vector<1x16xf32> to vector<32x16xf32>
    %114 = arith.mulf %111, %113 : vector<32x16xf32>
    %115 = arith.addf %91, %114 : vector<32x16xf32>
    %c15 = arith.constant 15 : index
    %c0_85 = arith.constant 0 : index
    %c0_86 = arith.constant 0 : index
    %116 = vector.load %arg19[%c15, %c0_85, %c0_86] : memref<32x32x16xf32, #tpu.memory_space<vmem>>, vector<1x32x16xf32>
    %117 = vector.shape_cast %116 : vector<1x32x16xf32> to vector<32x16xf32>
    %c15_87 = arith.constant 15 : index
    %c0_88 = arith.constant 0 : index
    %118 = vector.load %arg20[%c15_87, %c0_88] : memref<32x16xf32, #tpu.memory_space<vmem>>, vector<1x16xf32>
    %119 = vector.broadcast %118 : vector<1x16xf32> to vector<32x16xf32>
    %120 = arith.mulf %117, %119 : vector<32x16xf32>
    %121 = arith.addf %97, %120 : vector<32x16xf32>
    %c16 = arith.constant 16 : index
    %c0_89 = arith.constant 0 : index
    %c0_90 = arith.constant 0 : index
    %122 = vector.load %arg19[%c16, %c0_89, %c0_90] : memref<32x32x16xf32, #tpu.memory_space<vmem>>, vector<1x32x16xf32>
    %123 = vector.shape_cast %122 : vector<1x32x16xf32> to vector<32x16xf32>
    %c16_91 = arith.constant 16 : index
    %c0_92 = arith.constant 0 : index
    %124 = vector.load %arg20[%c16_91, %c0_92] : memref<32x16xf32, #tpu.memory_space<vmem>>, vector<1x16xf32>
    %125 = vector.broadcast %124 : vector<1x16xf32> to vector<32x16xf32>
    %126 = arith.mulf %123, %125 : vector<32x16xf32>
    %127 = arith.addf %103, %126 : vector<32x16xf32>
    %c17 = arith.constant 17 : index
    %c0_93 = arith.constant 0 : index
    %c0_94 = arith.constant 0 : index
    %128 = vector.load %arg19[%c17, %c0_93, %c0_94] : memref<32x32x16xf32, #tpu.memory_space<vmem>>, vector<1x32x16xf32>
    %129 = vector.shape_cast %128 : vector<1x32x16xf32> to vector<32x16xf32>
    %c17_95 = arith.constant 17 : index
    %c0_96 = arith.constant 0 : index
    %130 = vector.load %arg20[%c17_95, %c0_96] : memref<32x16xf32, #tpu.memory_space<vmem>>, vector<1x16xf32>
    %131 = vector.broadcast %130 : vector<1x16xf32> to vector<32x16xf32>
    %132 = arith.mulf %129, %131 : vector<32x16xf32>
    %133 = arith.addf %109, %132 : vector<32x16xf32>
    %c18 = arith.constant 18 : index
    %c0_97 = arith.constant 0 : index
    %c0_98 = arith.constant 0 : index
    %134 = vector.load %arg19[%c18, %c0_97, %c0_98] : memref<32x32x16xf32, #tpu.memory_space<vmem>>, vector<1x32x16xf32>
    %135 = vector.shape_cast %134 : vector<1x32x16xf32> to vector<32x16xf32>
    %c18_99 = arith.constant 18 : index
    %c0_100 = arith.constant 0 : index
    %136 = vector.load %arg20[%c18_99, %c0_100] : memref<32x16xf32, #tpu.memory_space<vmem>>, vector<1x16xf32>
    %137 = vector.broadcast %136 : vector<1x16xf32> to vector<32x16xf32>
    %138 = arith.mulf %135, %137 : vector<32x16xf32>
    %139 = arith.addf %115, %138 : vector<32x16xf32>
    %c19 = arith.constant 19 : index
    %c0_101 = arith.constant 0 : index
    %c0_102 = arith.constant 0 : index
    %140 = vector.load %arg19[%c19, %c0_101, %c0_102] : memref<32x32x16xf32, #tpu.memory_space<vmem>>, vector<1x32x16xf32>
    %141 = vector.shape_cast %140 : vector<1x32x16xf32> to vector<32x16xf32>
    %c19_103 = arith.constant 19 : index
    %c0_104 = arith.constant 0 : index
    %142 = vector.load %arg20[%c19_103, %c0_104] : memref<32x16xf32, #tpu.memory_space<vmem>>, vector<1x16xf32>
    %143 = vector.broadcast %142 : vector<1x16xf32> to vector<32x16xf32>
    %144 = arith.mulf %141, %143 : vector<32x16xf32>
    %145 = arith.addf %121, %144 : vector<32x16xf32>
    %c20 = arith.constant 20 : index
    %c0_105 = arith.constant 0 : index
    %c0_106 = arith.constant 0 : index
    %146 = vector.load %arg19[%c20, %c0_105, %c0_106] : memref<32x32x16xf32, #tpu.memory_space<vmem>>, vector<1x32x16xf32>
    %147 = vector.shape_cast %146 : vector<1x32x16xf32> to vector<32x16xf32>
    %c20_107 = arith.constant 20 : index
    %c0_108 = arith.constant 0 : index
    %148 = vector.load %arg20[%c20_107, %c0_108] : memref<32x16xf32, #tpu.memory_space<vmem>>, vector<1x16xf32>
    %149 = vector.broadcast %148 : vector<1x16xf32> to vector<32x16xf32>
    %150 = arith.mulf %147, %149 : vector<32x16xf32>
    %151 = arith.addf %127, %150 : vector<32x16xf32>
    %c21 = arith.constant 21 : index
    %c0_109 = arith.constant 0 : index
    %c0_110 = arith.constant 0 : index
    %152 = vector.load %arg19[%c21, %c0_109, %c0_110] : memref<32x32x16xf32, #tpu.memory_space<vmem>>, vector<1x32x16xf32>
    %153 = vector.shape_cast %152 : vector<1x32x16xf32> to vector<32x16xf32>
    %c21_111 = arith.constant 21 : index
    %c0_112 = arith.constant 0 : index
    %154 = vector.load %arg20[%c21_111, %c0_112] : memref<32x16xf32, #tpu.memory_space<vmem>>, vector<1x16xf32>
    %155 = vector.broadcast %154 : vector<1x16xf32> to vector<32x16xf32>
    %156 = arith.mulf %153, %155 : vector<32x16xf32>
    %157 = arith.addf %133, %156 : vector<32x16xf32>
    %c22 = arith.constant 22 : index
    %c0_113 = arith.constant 0 : index
    %c0_114 = arith.constant 0 : index
    %158 = vector.load %arg19[%c22, %c0_113, %c0_114] : memref<32x32x16xf32, #tpu.memory_space<vmem>>, vector<1x32x16xf32>
    %159 = vector.shape_cast %158 : vector<1x32x16xf32> to vector<32x16xf32>
    %c22_115 = arith.constant 22 : index
    %c0_116 = arith.constant 0 : index
    %160 = vector.load %arg20[%c22_115, %c0_116] : memref<32x16xf32, #tpu.memory_space<vmem>>, vector<1x16xf32>
    %161 = vector.broadcast %160 : vector<1x16xf32> to vector<32x16xf32>
    %162 = arith.mulf %159, %161 : vector<32x16xf32>
    %163 = arith.addf %139, %162 : vector<32x16xf32>
    %c23 = arith.constant 23 : index
    %c0_117 = arith.constant 0 : index
    %c0_118 = arith.constant 0 : index
    %164 = vector.load %arg19[%c23, %c0_117, %c0_118] : memref<32x32x16xf32, #tpu.memory_space<vmem>>, vector<1x32x16xf32>
    %165 = vector.shape_cast %164 : vector<1x32x16xf32> to vector<32x16xf32>
    %c23_119 = arith.constant 23 : index
    %c0_120 = arith.constant 0 : index
    %166 = vector.load %arg20[%c23_119, %c0_120] : memref<32x16xf32, #tpu.memory_space<vmem>>, vector<1x16xf32>
    %167 = vector.broadcast %166 : vector<1x16xf32> to vector<32x16xf32>
    %168 = arith.mulf %165, %167 : vector<32x16xf32>
    %169 = arith.addf %145, %168 : vector<32x16xf32>
    %c24 = arith.constant 24 : index
    %c0_121 = arith.constant 0 : index
    %c0_122 = arith.constant 0 : index
    %170 = vector.load %arg19[%c24, %c0_121, %c0_122] : memref<32x32x16xf32, #tpu.memory_space<vmem>>, vector<1x32x16xf32>
    %171 = vector.shape_cast %170 : vector<1x32x16xf32> to vector<32x16xf32>
    %c24_123 = arith.constant 24 : index
    %c0_124 = arith.constant 0 : index
    %172 = vector.load %arg20[%c24_123, %c0_124] : memref<32x16xf32, #tpu.memory_space<vmem>>, vector<1x16xf32>
    %173 = vector.broadcast %172 : vector<1x16xf32> to vector<32x16xf32>
    %174 = arith.mulf %171, %173 : vector<32x16xf32>
    %175 = arith.addf %151, %174 : vector<32x16xf32>
    %c25 = arith.constant 25 : index
    %c0_125 = arith.constant 0 : index
    %c0_126 = arith.constant 0 : index
    %176 = vector.load %arg19[%c25, %c0_125, %c0_126] : memref<32x32x16xf32, #tpu.memory_space<vmem>>, vector<1x32x16xf32>
    %177 = vector.shape_cast %176 : vector<1x32x16xf32> to vector<32x16xf32>
    %c25_127 = arith.constant 25 : index
    %c0_128 = arith.constant 0 : index
    %178 = vector.load %arg20[%c25_127, %c0_128] : memref<32x16xf32, #tpu.memory_space<vmem>>, vector<1x16xf32>
    %179 = vector.broadcast %178 : vector<1x16xf32> to vector<32x16xf32>
    %180 = arith.mulf %177, %179 : vector<32x16xf32>
    %181 = arith.addf %157, %180 : vector<32x16xf32>
    %c26 = arith.constant 26 : index
    %c0_129 = arith.constant 0 : index
    %c0_130 = arith.constant 0 : index
    %182 = vector.load %arg19[%c26, %c0_129, %c0_130] : memref<32x32x16xf32, #tpu.memory_space<vmem>>, vector<1x32x16xf32>
    %183 = vector.shape_cast %182 : vector<1x32x16xf32> to vector<32x16xf32>
    %c26_131 = arith.constant 26 : index
    %c0_132 = arith.constant 0 : index
    %184 = vector.load %arg20[%c26_131, %c0_132] : memref<32x16xf32, #tpu.memory_space<vmem>>, vector<1x16xf32>
    %185 = vector.broadcast %184 : vector<1x16xf32> to vector<32x16xf32>
    %186 = arith.mulf %183, %185 : vector<32x16xf32>
    %187 = arith.addf %163, %186 : vector<32x16xf32>
    %c27 = arith.constant 27 : index
    %c0_133 = arith.constant 0 : index
    %c0_134 = arith.constant 0 : index
    %188 = vector.load %arg19[%c27, %c0_133, %c0_134] : memref<32x32x16xf32, #tpu.memory_space<vmem>>, vector<1x32x16xf32>
    %189 = vector.shape_cast %188 : vector<1x32x16xf32> to vector<32x16xf32>
    %c27_135 = arith.constant 27 : index
    %c0_136 = arith.constant 0 : index
    %190 = vector.load %arg20[%c27_135, %c0_136] : memref<32x16xf32, #tpu.memory_space<vmem>>, vector<1x16xf32>
    %191 = vector.broadcast %190 : vector<1x16xf32> to vector<32x16xf32>
    %192 = arith.mulf %189, %191 : vector<32x16xf32>
    %193 = arith.addf %169, %192 : vector<32x16xf32>
    %c28 = arith.constant 28 : index
    %c0_137 = arith.constant 0 : index
    %c0_138 = arith.constant 0 : index
    %194 = vector.load %arg19[%c28, %c0_137, %c0_138] : memref<32x32x16xf32, #tpu.memory_space<vmem>>, vector<1x32x16xf32>
    %195 = vector.shape_cast %194 : vector<1x32x16xf32> to vector<32x16xf32>
    %c28_139 = arith.constant 28 : index
    %c0_140 = arith.constant 0 : index
    %196 = vector.load %arg20[%c28_139, %c0_140] : memref<32x16xf32, #tpu.memory_space<vmem>>, vector<1x16xf32>
    %197 = vector.broadcast %196 : vector<1x16xf32> to vector<32x16xf32>
    %198 = arith.mulf %195, %197 : vector<32x16xf32>
    %199 = arith.addf %175, %198 : vector<32x16xf32>
    %c29 = arith.constant 29 : index
    %c0_141 = arith.constant 0 : index
    %c0_142 = arith.constant 0 : index
    %200 = vector.load %arg19[%c29, %c0_141, %c0_142] : memref<32x32x16xf32, #tpu.memory_space<vmem>>, vector<1x32x16xf32>
    %201 = vector.shape_cast %200 : vector<1x32x16xf32> to vector<32x16xf32>
    %c29_143 = arith.constant 29 : index
    %c0_144 = arith.constant 0 : index
    %202 = vector.load %arg20[%c29_143, %c0_144] : memref<32x16xf32, #tpu.memory_space<vmem>>, vector<1x16xf32>
    %203 = vector.broadcast %202 : vector<1x16xf32> to vector<32x16xf32>
    %204 = arith.mulf %201, %203 : vector<32x16xf32>
    %205 = arith.addf %181, %204 : vector<32x16xf32>
    %c30 = arith.constant 30 : index
    %c0_145 = arith.constant 0 : index
    %c0_146 = arith.constant 0 : index
    %206 = vector.load %arg19[%c30, %c0_145, %c0_146] : memref<32x32x16xf32, #tpu.memory_space<vmem>>, vector<1x32x16xf32>
    %207 = vector.shape_cast %206 : vector<1x32x16xf32> to vector<32x16xf32>
    %c30_147 = arith.constant 30 : index
    %c0_148 = arith.constant 0 : index
    %208 = vector.load %arg20[%c30_147, %c0_148] : memref<32x16xf32, #tpu.memory_space<vmem>>, vector<1x16xf32>
    %209 = vector.broadcast %208 : vector<1x16xf32> to vector<32x16xf32>
    %210 = arith.mulf %207, %209 : vector<32x16xf32>
    %211 = arith.addf %187, %210 : vector<32x16xf32>
    %c31 = arith.constant 31 : index
    %c0_149 = arith.constant 0 : index
    %c0_150 = arith.constant 0 : index
    %212 = vector.load %arg19[%c31, %c0_149, %c0_150] : memref<32x32x16xf32, #tpu.memory_space<vmem>>, vector<1x32x16xf32>
    %213 = vector.shape_cast %212 : vector<1x32x16xf32> to vector<32x16xf32>
    %c31_151 = arith.constant 31 : index
    %c0_152 = arith.constant 0 : index
    %214 = vector.load %arg20[%c31_151, %c0_152] : memref<32x16xf32, #tpu.memory_space<vmem>>, vector<1x16xf32>
    %215 = vector.broadcast %214 : vector<1x16xf32> to vector<32x16xf32>
    %216 = arith.mulf %213, %215 : vector<32x16xf32>
    %217 = arith.addf %193, %216 : vector<32x16xf32>
    %218 = arith.addf %199, %205 : vector<32x16xf32>
    %219 = arith.addf %211, %217 : vector<32x16xf32>
    %220 = arith.addf %218, %219 : vector<32x16xf32>
    %c0_153 = arith.constant 0 : index
    %c0_154 = arith.constant 0 : index
    %221 = vector.load %arg9[%c0_153, %c0_154] : memref<8x16xf32, #tpu.memory_space<vmem>>, vector<8x16xf32>
    %cst_155 = arith.constant dense<0.000000e+00> : vector<8x32xf32>
    %222 = tpu.matmul %221, %220, %cst_155 {dimension_numbers = #tpu.dot_dimension_numbers<[1], [1], [0], [0], [0, 0, 1, 0], [], []>} : vector<8x16xf32>, vector<32x16xf32>, vector<8x32xf32> -> vector<8x32xf32>
    %c0_156 = arith.constant 0 : index
    %c0_157 = arith.constant 0 : index
    %223 = vector.load %arg10[%c0_156, %c0_157] : memref<32x32xf32, #tpu.memory_space<vmem>>, vector<32x32xf32>
    %cst_158 = arith.constant dense<0.000000e+00> : vector<8x32xf32>
    %224 = tpu.matmul %7, %223, %cst_158 {dimension_numbers = #tpu.dot_dimension_numbers<[1], [0], [0], [1], [0, 0, 1, 1], [], []>} : vector<8x32xf32>, vector<32x32xf32>, vector<8x32xf32> -> vector<8x32xf32>
    %225 = arith.addf %222, %224 : vector<8x32xf32>
    %c0_159 = arith.constant 0 : index
    %c0_160 = arith.constant 0 : index
    %226 = vector.load %arg11[%c0_159, %c0_160] : memref<1x32xf32, #tpu.memory_space<vmem>>, vector<1x32xf32>
    %227 = vector.broadcast %226 : vector<1x32xf32> to vector<8x32xf32>
    %228 = arith.addf %225, %227 : vector<8x32xf32>
    %cst_161 = arith.constant 0.000000e+00 : f32
    %229 = vector.broadcast %cst_161 : f32 to vector<8x32xf32>
    %230 = arith.maximumf %228, %229 : vector<8x32xf32>
    %231 = tpu.concatenate %230, %7 in 1 : vector<8x32xf32>, vector<8x32xf32> -> vector<8x64xf32>
    %c0_162 = arith.constant 0 : index
    %c0_163 = arith.constant 0 : index
    %232 = vector.load %arg12[%c0_162, %c0_163] : memref<64x64xf32, #tpu.memory_space<vmem>>, vector<64x64xf32>
    %cst_164 = arith.constant dense<0.000000e+00> : vector<8x64xf32>
    %233 = tpu.matmul %231, %232, %cst_164 {dimension_numbers = #tpu.dot_dimension_numbers<[1], [0], [0], [1], [0, 0, 1, 1], [], []>} : vector<8x64xf32>, vector<64x64xf32>, vector<8x64xf32> -> vector<8x64xf32>
    %c0_165 = arith.constant 0 : index
    %c0_166 = arith.constant 0 : index
    %234 = vector.load %arg13[%c0_165, %c0_166] : memref<1x64xf32, #tpu.memory_space<vmem>>, vector<1x64xf32>
    %235 = vector.broadcast %234 : vector<1x64xf32> to vector<8x64xf32>
    %236 = arith.addf %233, %235 : vector<8x64xf32>
    %237 = arith.negf %236 : vector<8x64xf32>
    %238 = math.exp %237 : vector<8x64xf32>
    %cst_167 = arith.constant 1.000000e+00 : f32
    %239 = vector.broadcast %cst_167 : f32 to vector<8x64xf32>
    %240 = arith.addf %239, %238 : vector<8x64xf32>
    %241 = arith.divf %239, %240 : vector<8x64xf32>
    %242 = vector.extract_strided_slice %241 {offsets = [0, 0], sizes = [8, 32], strides = [1, 1]} : vector<8x64xf32> to vector<8x32xf32>
    %243 = vector.extract_strided_slice %241 {offsets = [0, 32], sizes = [8, 32], strides = [1, 1]} : vector<8x64xf32> to vector<8x32xf32>
    %c0_168 = arith.constant 0 : index
    %c0_169 = arith.constant 0 : index
    %244 = vector.load %arg14[%c0_168, %c0_169] : memref<32x32xf32, #tpu.memory_space<vmem>>, vector<32x32xf32>
    %cst_170 = arith.constant dense<0.000000e+00> : vector<8x32xf32>
    %245 = tpu.matmul %230, %244, %cst_170 {dimension_numbers = #tpu.dot_dimension_numbers<[1], [0], [0], [1], [0, 0, 1, 1], [], []>} : vector<8x32xf32>, vector<32x32xf32>, vector<8x32xf32> -> vector<8x32xf32>
    %c0_171 = arith.constant 0 : index
    %c0_172 = arith.constant 0 : index
    %246 = vector.load %arg16[%c0_171, %c0_172] : memref<1x32xf32, #tpu.memory_space<vmem>>, vector<1x32xf32>
    %247 = vector.broadcast %246 : vector<1x32xf32> to vector<8x32xf32>
    %248 = arith.addf %245, %247 : vector<8x32xf32>
    %c0_173 = arith.constant 0 : index
    %c0_174 = arith.constant 0 : index
    %249 = vector.load %arg15[%c0_173, %c0_174] : memref<32x32xf32, #tpu.memory_space<vmem>>, vector<32x32xf32>
    %cst_175 = arith.constant dense<0.000000e+00> : vector<8x32xf32>
    %250 = tpu.matmul %7, %249, %cst_175 {dimension_numbers = #tpu.dot_dimension_numbers<[1], [0], [0], [1], [0, 0, 1, 1], [], []>} : vector<8x32xf32>, vector<32x32xf32>, vector<8x32xf32> -> vector<8x32xf32>
    %c0_176 = arith.constant 0 : index
    %c0_177 = arith.constant 0 : index
    %251 = vector.load %arg17[%c0_176, %c0_177] : memref<1x32xf32, #tpu.memory_space<vmem>>, vector<1x32xf32>
    %252 = vector.broadcast %251 : vector<1x32xf32> to vector<8x32xf32>
    %253 = arith.addf %250, %252 : vector<8x32xf32>
    %254 = arith.mulf %242, %253 : vector<8x32xf32>
    %255 = arith.addf %248, %254 : vector<8x32xf32>
    %256 = math.tanh %255 : vector<8x32xf32>
    %cst_178 = arith.constant 1.000000e+00 : f32
    %257 = vector.broadcast %cst_178 : f32 to vector<8x32xf32>
    %258 = arith.subf %257, %243 : vector<8x32xf32>
    %259 = arith.mulf %258, %256 : vector<8x32xf32>
    %260 = arith.mulf %243, %7 : vector<8x32xf32>
    %261 = arith.addf %259, %260 : vector<8x32xf32>
    %262 = tpu.transpose %261, [1, 0] : vector<8x32xf32> -> vector<32x8xf32>
    %c0_179 = arith.constant 0 : index
    %c0_180 = arith.constant 0 : index
    %263 = vector.load %arg8[%c0_179, %c0_180] : memref<8x16xf32, #tpu.memory_space<vmem>>, vector<8x16xf32>
    %cst_181 = arith.constant dense<0.000000e+00> : vector<32x16xf32>
    %264 = tpu.matmul %262, %263, %cst_181 {dimension_numbers = #tpu.dot_dimension_numbers<[1], [0], [0], [1], [0, 0, 1, 1], [], []>} : vector<32x8xf32>, vector<8x16xf32>, vector<32x16xf32> -> vector<32x16xf32>
    %c0_182 = arith.constant 0 : index
    %c0_183 = arith.constant 0 : index
    %265 = vector.load %arg20[%c0_182, %c0_183] : memref<32x16xf32, #tpu.memory_space<vmem>>, vector<32x16xf32>
    tpu.vector_store %arg20[%c0_182, %c0_183], %264 {strides = array<i32>} : memref<32x16xf32, #tpu.memory_space<vmem>>, vector<32x16xf32>,
    %cst_184 = arith.constant 0.000000e+00 : f32
    %266 = vector.broadcast %cst_184 : f32 to vector<32x16xf32>
    %cst_185 = arith.constant 0.000000e+00 : f32
    %267 = vector.broadcast %cst_185 : f32 to vector<32x16xf32>
    %cst_186 = arith.constant 0.000000e+00 : f32
    %268 = vector.broadcast %cst_186 : f32 to vector<32x16xf32>
    %cst_187 = arith.constant 0.000000e+00 : f32
    %269 = vector.broadcast %cst_187 : f32 to vector<32x16xf32>
    %c0_188 = arith.constant 0 : index
    %c0_189 = arith.constant 0 : index
    %c0_190 = arith.constant 0 : index
    %270 = vector.load %arg19[%c0_188, %c0_189, %c0_190] : memref<32x32x16xf32, #tpu.memory_space<vmem>>, vector<1x32x16xf32>
    %271 = vector.shape_cast %270 : vector<1x32x16xf32> to vector<32x16xf32>
    %c0_191 = arith.constant 0 : index
    %c0_192 = arith.constant 0 : index
    %272 = vector.load %arg20[%c0_191, %c0_192] : memref<32x16xf32, #tpu.memory_space<vmem>>, vector<1x16xf32>
    %273 = vector.broadcast %272 : vector<1x16xf32> to vector<32x16xf32>
    %274 = arith.mulf %271, %273 : vector<32x16xf32>
    %275 = arith.addf %266, %274 : vector<32x16xf32>
    %c1_193 = arith.constant 1 : index
    %c0_194 = arith.constant 0 : index
    %c0_195 = arith.constant 0 : index
    %276 = vector.load %arg19[%c1_193, %c0_194, %c0_195] : memref<32x32x16xf32, #tpu.memory_space<vmem>>, vector<1x32x16xf32>
    %277 = vector.shape_cast %276 : vector<1x32x16xf32> to vector<32x16xf32>
    %c1_196 = arith.constant 1 : index
    %c0_197 = arith.constant 0 : index
    %278 = vector.load %arg20[%c1_196, %c0_197] : memref<32x16xf32, #tpu.memory_space<vmem>>, vector<1x16xf32>
    %279 = vector.broadcast %278 : vector<1x16xf32> to vector<32x16xf32>
    %280 = arith.mulf %277, %279 : vector<32x16xf32>
    %281 = arith.addf %267, %280 : vector<32x16xf32>
    %c2_198 = arith.constant 2 : index
    %c0_199 = arith.constant 0 : index
    %c0_200 = arith.constant 0 : index
    %282 = vector.load %arg19[%c2_198, %c0_199, %c0_200] : memref<32x32x16xf32, #tpu.memory_space<vmem>>, vector<1x32x16xf32>
    %283 = vector.shape_cast %282 : vector<1x32x16xf32> to vector<32x16xf32>
    %c2_201 = arith.constant 2 : index
    %c0_202 = arith.constant 0 : index
    %284 = vector.load %arg20[%c2_201, %c0_202] : memref<32x16xf32, #tpu.memory_space<vmem>>, vector<1x16xf32>
    %285 = vector.broadcast %284 : vector<1x16xf32> to vector<32x16xf32>
    %286 = arith.mulf %283, %285 : vector<32x16xf32>
    %287 = arith.addf %268, %286 : vector<32x16xf32>
    %c3_203 = arith.constant 3 : index
    %c0_204 = arith.constant 0 : index
    %c0_205 = arith.constant 0 : index
    %288 = vector.load %arg19[%c3_203, %c0_204, %c0_205] : memref<32x32x16xf32, #tpu.memory_space<vmem>>, vector<1x32x16xf32>
    %289 = vector.shape_cast %288 : vector<1x32x16xf32> to vector<32x16xf32>
    %c3_206 = arith.constant 3 : index
    %c0_207 = arith.constant 0 : index
    %290 = vector.load %arg20[%c3_206, %c0_207] : memref<32x16xf32, #tpu.memory_space<vmem>>, vector<1x16xf32>
    %291 = vector.broadcast %290 : vector<1x16xf32> to vector<32x16xf32>
    %292 = arith.mulf %289, %291 : vector<32x16xf32>
    %293 = arith.addf %269, %292 : vector<32x16xf32>
    %c4_208 = arith.constant 4 : index
    %c0_209 = arith.constant 0 : index
    %c0_210 = arith.constant 0 : index
    %294 = vector.load %arg19[%c4_208, %c0_209, %c0_210] : memref<32x32x16xf32, #tpu.memory_space<vmem>>, vector<1x32x16xf32>
    %295 = vector.shape_cast %294 : vector<1x32x16xf32> to vector<32x16xf32>
    %c4_211 = arith.constant 4 : index
    %c0_212 = arith.constant 0 : index
    %296 = vector.load %arg20[%c4_211, %c0_212] : memref<32x16xf32, #tpu.memory_space<vmem>>, vector<1x16xf32>
    %297 = vector.broadcast %296 : vector<1x16xf32> to vector<32x16xf32>
    %298 = arith.mulf %295, %297 : vector<32x16xf32>
    %299 = arith.addf %275, %298 : vector<32x16xf32>
    %c5_213 = arith.constant 5 : index
    %c0_214 = arith.constant 0 : index
    %c0_215 = arith.constant 0 : index
    %300 = vector.load %arg19[%c5_213, %c0_214, %c0_215] : memref<32x32x16xf32, #tpu.memory_space<vmem>>, vector<1x32x16xf32>
    %301 = vector.shape_cast %300 : vector<1x32x16xf32> to vector<32x16xf32>
    %c5_216 = arith.constant 5 : index
    %c0_217 = arith.constant 0 : index
    %302 = vector.load %arg20[%c5_216, %c0_217] : memref<32x16xf32, #tpu.memory_space<vmem>>, vector<1x16xf32>
    %303 = vector.broadcast %302 : vector<1x16xf32> to vector<32x16xf32>
    %304 = arith.mulf %301, %303 : vector<32x16xf32>
    %305 = arith.addf %281, %304 : vector<32x16xf32>
    %c6_218 = arith.constant 6 : index
    %c0_219 = arith.constant 0 : index
    %c0_220 = arith.constant 0 : index
    %306 = vector.load %arg19[%c6_218, %c0_219, %c0_220] : memref<32x32x16xf32, #tpu.memory_space<vmem>>, vector<1x32x16xf32>
    %307 = vector.shape_cast %306 : vector<1x32x16xf32> to vector<32x16xf32>
    %c6_221 = arith.constant 6 : index
    %c0_222 = arith.constant 0 : index
    %308 = vector.load %arg20[%c6_221, %c0_222] : memref<32x16xf32, #tpu.memory_space<vmem>>, vector<1x16xf32>
    %309 = vector.broadcast %308 : vector<1x16xf32> to vector<32x16xf32>
    %310 = arith.mulf %307, %309 : vector<32x16xf32>
    %311 = arith.addf %287, %310 : vector<32x16xf32>
    %c7_223 = arith.constant 7 : index
    %c0_224 = arith.constant 0 : index
    %c0_225 = arith.constant 0 : index
    %312 = vector.load %arg19[%c7_223, %c0_224, %c0_225] : memref<32x32x16xf32, #tpu.memory_space<vmem>>, vector<1x32x16xf32>
    %313 = vector.shape_cast %312 : vector<1x32x16xf32> to vector<32x16xf32>
    %c7_226 = arith.constant 7 : index
    %c0_227 = arith.constant 0 : index
    %314 = vector.load %arg20[%c7_226, %c0_227] : memref<32x16xf32, #tpu.memory_space<vmem>>, vector<1x16xf32>
    %315 = vector.broadcast %314 : vector<1x16xf32> to vector<32x16xf32>
    %316 = arith.mulf %313, %315 : vector<32x16xf32>
    %317 = arith.addf %293, %316 : vector<32x16xf32>
    %c8_228 = arith.constant 8 : index
    %c0_229 = arith.constant 0 : index
    %c0_230 = arith.constant 0 : index
    %318 = vector.load %arg19[%c8_228, %c0_229, %c0_230] : memref<32x32x16xf32, #tpu.memory_space<vmem>>, vector<1x32x16xf32>
    %319 = vector.shape_cast %318 : vector<1x32x16xf32> to vector<32x16xf32>
    %c8_231 = arith.constant 8 : index
    %c0_232 = arith.constant 0 : index
    %320 = vector.load %arg20[%c8_231, %c0_232] : memref<32x16xf32, #tpu.memory_space<vmem>>, vector<1x16xf32>
    %321 = vector.broadcast %320 : vector<1x16xf32> to vector<32x16xf32>
    %322 = arith.mulf %319, %321 : vector<32x16xf32>
    %323 = arith.addf %299, %322 : vector<32x16xf32>
    %c9_233 = arith.constant 9 : index
    %c0_234 = arith.constant 0 : index
    %c0_235 = arith.constant 0 : index
    %324 = vector.load %arg19[%c9_233, %c0_234, %c0_235] : memref<32x32x16xf32, #tpu.memory_space<vmem>>, vector<1x32x16xf32>
    %325 = vector.shape_cast %324 : vector<1x32x16xf32> to vector<32x16xf32>
    %c9_236 = arith.constant 9 : index
    %c0_237 = arith.constant 0 : index
    %326 = vector.load %arg20[%c9_236, %c0_237] : memref<32x16xf32, #tpu.memory_space<vmem>>, vector<1x16xf32>
    %327 = vector.broadcast %326 : vector<1x16xf32> to vector<32x16xf32>
    %328 = arith.mulf %325, %327 : vector<32x16xf32>
    %329 = arith.addf %305, %328 : vector<32x16xf32>
    %c10_238 = arith.constant 10 : index
    %c0_239 = arith.constant 0 : index
    %c0_240 = arith.constant 0 : index
    %330 = vector.load %arg19[%c10_238, %c0_239, %c0_240] : memref<32x32x16xf32, #tpu.memory_space<vmem>>, vector<1x32x16xf32>
    %331 = vector.shape_cast %330 : vector<1x32x16xf32> to vector<32x16xf32>
    %c10_241 = arith.constant 10 : index
    %c0_242 = arith.constant 0 : index
    %332 = vector.load %arg20[%c10_241, %c0_242] : memref<32x16xf32, #tpu.memory_space<vmem>>, vector<1x16xf32>
    %333 = vector.broadcast %332 : vector<1x16xf32> to vector<32x16xf32>
    %334 = arith.mulf %331, %333 : vector<32x16xf32>
    %335 = arith.addf %311, %334 : vector<32x16xf32>
    %c11_243 = arith.constant 11 : index
    %c0_244 = arith.constant 0 : index
    %c0_245 = arith.constant 0 : index
    %336 = vector.load %arg19[%c11_243, %c0_244, %c0_245] : memref<32x32x16xf32, #tpu.memory_space<vmem>>, vector<1x32x16xf32>
    %337 = vector.shape_cast %336 : vector<1x32x16xf32> to vector<32x16xf32>
    %c11_246 = arith.constant 11 : index
    %c0_247 = arith.constant 0 : index
    %338 = vector.load %arg20[%c11_246, %c0_247] : memref<32x16xf32, #tpu.memory_space<vmem>>, vector<1x16xf32>
    %339 = vector.broadcast %338 : vector<1x16xf32> to vector<32x16xf32>
    %340 = arith.mulf %337, %339 : vector<32x16xf32>
    %341 = arith.addf %317, %340 : vector<32x16xf32>
    %c12_248 = arith.constant 12 : index
    %c0_249 = arith.constant 0 : index
    %c0_250 = arith.constant 0 : index
    %342 = vector.load %arg19[%c12_248, %c0_249, %c0_250] : memref<32x32x16xf32, #tpu.memory_space<vmem>>, vector<1x32x16xf32>
    %343 = vector.shape_cast %342 : vector<1x32x16xf32> to vector<32x16xf32>
    %c12_251 = arith.constant 12 : index
    %c0_252 = arith.constant 0 : index
    %344 = vector.load %arg20[%c12_251, %c0_252] : memref<32x16xf32, #tpu.memory_space<vmem>>, vector<1x16xf32>
    %345 = vector.broadcast %344 : vector<1x16xf32> to vector<32x16xf32>
    %346 = arith.mulf %343, %345 : vector<32x16xf32>
    %347 = arith.addf %323, %346 : vector<32x16xf32>
    %c13_253 = arith.constant 13 : index
    %c0_254 = arith.constant 0 : index
    %c0_255 = arith.constant 0 : index
    %348 = vector.load %arg19[%c13_253, %c0_254, %c0_255] : memref<32x32x16xf32, #tpu.memory_space<vmem>>, vector<1x32x16xf32>
    %349 = vector.shape_cast %348 : vector<1x32x16xf32> to vector<32x16xf32>
    %c13_256 = arith.constant 13 : index
    %c0_257 = arith.constant 0 : index
    %350 = vector.load %arg20[%c13_256, %c0_257] : memref<32x16xf32, #tpu.memory_space<vmem>>, vector<1x16xf32>
    %351 = vector.broadcast %350 : vector<1x16xf32> to vector<32x16xf32>
    %352 = arith.mulf %349, %351 : vector<32x16xf32>
    %353 = arith.addf %329, %352 : vector<32x16xf32>
    %c14_258 = arith.constant 14 : index
    %c0_259 = arith.constant 0 : index
    %c0_260 = arith.constant 0 : index
    %354 = vector.load %arg19[%c14_258, %c0_259, %c0_260] : memref<32x32x16xf32, #tpu.memory_space<vmem>>, vector<1x32x16xf32>
    %355 = vector.shape_cast %354 : vector<1x32x16xf32> to vector<32x16xf32>
    %c14_261 = arith.constant 14 : index
    %c0_262 = arith.constant 0 : index
    %356 = vector.load %arg20[%c14_261, %c0_262] : memref<32x16xf32, #tpu.memory_space<vmem>>, vector<1x16xf32>
    %357 = vector.broadcast %356 : vector<1x16xf32> to vector<32x16xf32>
    %358 = arith.mulf %355, %357 : vector<32x16xf32>
    %359 = arith.addf %335, %358 : vector<32x16xf32>
    %c15_263 = arith.constant 15 : index
    %c0_264 = arith.constant 0 : index
    %c0_265 = arith.constant 0 : index
    %360 = vector.load %arg19[%c15_263, %c0_264, %c0_265] : memref<32x32x16xf32, #tpu.memory_space<vmem>>, vector<1x32x16xf32>
    %361 = vector.shape_cast %360 : vector<1x32x16xf32> to vector<32x16xf32>
    %c15_266 = arith.constant 15 : index
    %c0_267 = arith.constant 0 : index
    %362 = vector.load %arg20[%c15_266, %c0_267] : memref<32x16xf32, #tpu.memory_space<vmem>>, vector<1x16xf32>
    %363 = vector.broadcast %362 : vector<1x16xf32> to vector<32x16xf32>
    %364 = arith.mulf %361, %363 : vector<32x16xf32>
    %365 = arith.addf %341, %364 : vector<32x16xf32>
    %c16_268 = arith.constant 16 : index
    %c0_269 = arith.constant 0 : index
    %c0_270 = arith.constant 0 : index
    %366 = vector.load %arg19[%c16_268, %c0_269, %c0_270] : memref<32x32x16xf32, #tpu.memory_space<vmem>>, vector<1x32x16xf32>
    %367 = vector.shape_cast %366 : vector<1x32x16xf32> to vector<32x16xf32>
    %c16_271 = arith.constant 16 : index
    %c0_272 = arith.constant 0 : index
    %368 = vector.load %arg20[%c16_271, %c0_272] : memref<32x16xf32, #tpu.memory_space<vmem>>, vector<1x16xf32>
    %369 = vector.broadcast %368 : vector<1x16xf32> to vector<32x16xf32>
    %370 = arith.mulf %367, %369 : vector<32x16xf32>
    %371 = arith.addf %347, %370 : vector<32x16xf32>
    %c17_273 = arith.constant 17 : index
    %c0_274 = arith.constant 0 : index
    %c0_275 = arith.constant 0 : index
    %372 = vector.load %arg19[%c17_273, %c0_274, %c0_275] : memref<32x32x16xf32, #tpu.memory_space<vmem>>, vector<1x32x16xf32>
    %373 = vector.shape_cast %372 : vector<1x32x16xf32> to vector<32x16xf32>
    %c17_276 = arith.constant 17 : index
    %c0_277 = arith.constant 0 : index
    %374 = vector.load %arg20[%c17_276, %c0_277] : memref<32x16xf32, #tpu.memory_space<vmem>>, vector<1x16xf32>
    %375 = vector.broadcast %374 : vector<1x16xf32> to vector<32x16xf32>
    %376 = arith.mulf %373, %375 : vector<32x16xf32>
    %377 = arith.addf %353, %376 : vector<32x16xf32>
    %c18_278 = arith.constant 18 : index
    %c0_279 = arith.constant 0 : index
    %c0_280 = arith.constant 0 : index
    %378 = vector.load %arg19[%c18_278, %c0_279, %c0_280] : memref<32x32x16xf32, #tpu.memory_space<vmem>>, vector<1x32x16xf32>
    %379 = vector.shape_cast %378 : vector<1x32x16xf32> to vector<32x16xf32>
    %c18_281 = arith.constant 18 : index
    %c0_282 = arith.constant 0 : index
    %380 = vector.load %arg20[%c18_281, %c0_282] : memref<32x16xf32, #tpu.memory_space<vmem>>, vector<1x16xf32>
    %381 = vector.broadcast %380 : vector<1x16xf32> to vector<32x16xf32>
    %382 = arith.mulf %379, %381 : vector<32x16xf32>
    %383 = arith.addf %359, %382 : vector<32x16xf32>
    %c19_283 = arith.constant 19 : index
    %c0_284 = arith.constant 0 : index
    %c0_285 = arith.constant 0 : index
    %384 = vector.load %arg19[%c19_283, %c0_284, %c0_285] : memref<32x32x16xf32, #tpu.memory_space<vmem>>, vector<1x32x16xf32>
    %385 = vector.shape_cast %384 : vector<1x32x16xf32> to vector<32x16xf32>
    %c19_286 = arith.constant 19 : index
    %c0_287 = arith.constant 0 : index
    %386 = vector.load %arg20[%c19_286, %c0_287] : memref<32x16xf32, #tpu.memory_space<vmem>>, vector<1x16xf32>
    %387 = vector.broadcast %386 : vector<1x16xf32> to vector<32x16xf32>
    %388 = arith.mulf %385, %387 : vector<32x16xf32>
    %389 = arith.addf %365, %388 : vector<32x16xf32>
    %c20_288 = arith.constant 20 : index
    %c0_289 = arith.constant 0 : index
    %c0_290 = arith.constant 0 : index
    %390 = vector.load %arg19[%c20_288, %c0_289, %c0_290] : memref<32x32x16xf32, #tpu.memory_space<vmem>>, vector<1x32x16xf32>
    %391 = vector.shape_cast %390 : vector<1x32x16xf32> to vector<32x16xf32>
    %c20_291 = arith.constant 20 : index
    %c0_292 = arith.constant 0 : index
    %392 = vector.load %arg20[%c20_291, %c0_292] : memref<32x16xf32, #tpu.memory_space<vmem>>, vector<1x16xf32>
    %393 = vector.broadcast %392 : vector<1x16xf32> to vector<32x16xf32>
    %394 = arith.mulf %391, %393 : vector<32x16xf32>
    %395 = arith.addf %371, %394 : vector<32x16xf32>
    %c21_293 = arith.constant 21 : index
    %c0_294 = arith.constant 0 : index
    %c0_295 = arith.constant 0 : index
    %396 = vector.load %arg19[%c21_293, %c0_294, %c0_295] : memref<32x32x16xf32, #tpu.memory_space<vmem>>, vector<1x32x16xf32>
    %397 = vector.shape_cast %396 : vector<1x32x16xf32> to vector<32x16xf32>
    %c21_296 = arith.constant 21 : index
    %c0_297 = arith.constant 0 : index
    %398 = vector.load %arg20[%c21_296, %c0_297] : memref<32x16xf32, #tpu.memory_space<vmem>>, vector<1x16xf32>
    %399 = vector.broadcast %398 : vector<1x16xf32> to vector<32x16xf32>
    %400 = arith.mulf %397, %399 : vector<32x16xf32>
    %401 = arith.addf %377, %400 : vector<32x16xf32>
    %c22_298 = arith.constant 22 : index
    %c0_299 = arith.constant 0 : index
    %c0_300 = arith.constant 0 : index
    %402 = vector.load %arg19[%c22_298, %c0_299, %c0_300] : memref<32x32x16xf32, #tpu.memory_space<vmem>>, vector<1x32x16xf32>
    %403 = vector.shape_cast %402 : vector<1x32x16xf32> to vector<32x16xf32>
    %c22_301 = arith.constant 22 : index
    %c0_302 = arith.constant 0 : index
    %404 = vector.load %arg20[%c22_301, %c0_302] : memref<32x16xf32, #tpu.memory_space<vmem>>, vector<1x16xf32>
    %405 = vector.broadcast %404 : vector<1x16xf32> to vector<32x16xf32>
    %406 = arith.mulf %403, %405 : vector<32x16xf32>
    %407 = arith.addf %383, %406 : vector<32x16xf32>
    %c23_303 = arith.constant 23 : index
    %c0_304 = arith.constant 0 : index
    %c0_305 = arith.constant 0 : index
    %408 = vector.load %arg19[%c23_303, %c0_304, %c0_305] : memref<32x32x16xf32, #tpu.memory_space<vmem>>, vector<1x32x16xf32>
    %409 = vector.shape_cast %408 : vector<1x32x16xf32> to vector<32x16xf32>
    %c23_306 = arith.constant 23 : index
    %c0_307 = arith.constant 0 : index
    %410 = vector.load %arg20[%c23_306, %c0_307] : memref<32x16xf32, #tpu.memory_space<vmem>>, vector<1x16xf32>
    %411 = vector.broadcast %410 : vector<1x16xf32> to vector<32x16xf32>
    %412 = arith.mulf %409, %411 : vector<32x16xf32>
    %413 = arith.addf %389, %412 : vector<32x16xf32>
    %c24_308 = arith.constant 24 : index
    %c0_309 = arith.constant 0 : index
    %c0_310 = arith.constant 0 : index
    %414 = vector.load %arg19[%c24_308, %c0_309, %c0_310] : memref<32x32x16xf32, #tpu.memory_space<vmem>>, vector<1x32x16xf32>
    %415 = vector.shape_cast %414 : vector<1x32x16xf32> to vector<32x16xf32>
    %c24_311 = arith.constant 24 : index
    %c0_312 = arith.constant 0 : index
    %416 = vector.load %arg20[%c24_311, %c0_312] : memref<32x16xf32, #tpu.memory_space<vmem>>, vector<1x16xf32>
    %417 = vector.broadcast %416 : vector<1x16xf32> to vector<32x16xf32>
    %418 = arith.mulf %415, %417 : vector<32x16xf32>
    %419 = arith.addf %395, %418 : vector<32x16xf32>
    %c25_313 = arith.constant 25 : index
    %c0_314 = arith.constant 0 : index
    %c0_315 = arith.constant 0 : index
    %420 = vector.load %arg19[%c25_313, %c0_314, %c0_315] : memref<32x32x16xf32, #tpu.memory_space<vmem>>, vector<1x32x16xf32>
    %421 = vector.shape_cast %420 : vector<1x32x16xf32> to vector<32x16xf32>
    %c25_316 = arith.constant 25 : index
    %c0_317 = arith.constant 0 : index
    %422 = vector.load %arg20[%c25_316, %c0_317] : memref<32x16xf32, #tpu.memory_space<vmem>>, vector<1x16xf32>
    %423 = vector.broadcast %422 : vector<1x16xf32> to vector<32x16xf32>
    %424 = arith.mulf %421, %423 : vector<32x16xf32>
    %425 = arith.addf %401, %424 : vector<32x16xf32>
    %c26_318 = arith.constant 26 : index
    %c0_319 = arith.constant 0 : index
    %c0_320 = arith.constant 0 : index
    %426 = vector.load %arg19[%c26_318, %c0_319, %c0_320] : memref<32x32x16xf32, #tpu.memory_space<vmem>>, vector<1x32x16xf32>
    %427 = vector.shape_cast %426 : vector<1x32x16xf32> to vector<32x16xf32>
    %c26_321 = arith.constant 26 : index
    %c0_322 = arith.constant 0 : index
    %428 = vector.load %arg20[%c26_321, %c0_322] : memref<32x16xf32, #tpu.memory_space<vmem>>, vector<1x16xf32>
    %429 = vector.broadcast %428 : vector<1x16xf32> to vector<32x16xf32>
    %430 = arith.mulf %427, %429 : vector<32x16xf32>
    %431 = arith.addf %407, %430 : vector<32x16xf32>
    %c27_323 = arith.constant 27 : index
    %c0_324 = arith.constant 0 : index
    %c0_325 = arith.constant 0 : index
    %432 = vector.load %arg19[%c27_323, %c0_324, %c0_325] : memref<32x32x16xf32, #tpu.memory_space<vmem>>, vector<1x32x16xf32>
    %433 = vector.shape_cast %432 : vector<1x32x16xf32> to vector<32x16xf32>
    %c27_326 = arith.constant 27 : index
    %c0_327 = arith.constant 0 : index
    %434 = vector.load %arg20[%c27_326, %c0_327] : memref<32x16xf32, #tpu.memory_space<vmem>>, vector<1x16xf32>
    %435 = vector.broadcast %434 : vector<1x16xf32> to vector<32x16xf32>
    %436 = arith.mulf %433, %435 : vector<32x16xf32>
    %437 = arith.addf %413, %436 : vector<32x16xf32>
    %c28_328 = arith.constant 28 : index
    %c0_329 = arith.constant 0 : index
    %c0_330 = arith.constant 0 : index
    %438 = vector.load %arg19[%c28_328, %c0_329, %c0_330] : memref<32x32x16xf32, #tpu.memory_space<vmem>>, vector<1x32x16xf32>
    %439 = vector.shape_cast %438 : vector<1x32x16xf32> to vector<32x16xf32>
    %c28_331 = arith.constant 28 : index
    %c0_332 = arith.constant 0 : index
    %440 = vector.load %arg20[%c28_331, %c0_332] : memref<32x16xf32, #tpu.memory_space<vmem>>, vector<1x16xf32>
    %441 = vector.broadcast %440 : vector<1x16xf32> to vector<32x16xf32>
    %442 = arith.mulf %439, %441 : vector<32x16xf32>
    %443 = arith.addf %419, %442 : vector<32x16xf32>
    %c29_333 = arith.constant 29 : index
    %c0_334 = arith.constant 0 : index
    %c0_335 = arith.constant 0 : index
    %444 = vector.load %arg19[%c29_333, %c0_334, %c0_335] : memref<32x32x16xf32, #tpu.memory_space<vmem>>, vector<1x32x16xf32>
    %445 = vector.shape_cast %444 : vector<1x32x16xf32> to vector<32x16xf32>
    %c29_336 = arith.constant 29 : index
    %c0_337 = arith.constant 0 : index
    %446 = vector.load %arg20[%c29_336, %c0_337] : memref<32x16xf32, #tpu.memory_space<vmem>>, vector<1x16xf32>
    %447 = vector.broadcast %446 : vector<1x16xf32> to vector<32x16xf32>
    %448 = arith.mulf %445, %447 : vector<32x16xf32>
    %449 = arith.addf %425, %448 : vector<32x16xf32>
    %c30_338 = arith.constant 30 : index
    %c0_339 = arith.constant 0 : index
    %c0_340 = arith.constant 0 : index
    %450 = vector.load %arg19[%c30_338, %c0_339, %c0_340] : memref<32x32x16xf32, #tpu.memory_space<vmem>>, vector<1x32x16xf32>
    %451 = vector.shape_cast %450 : vector<1x32x16xf32> to vector<32x16xf32>
    %c30_341 = arith.constant 30 : index
    %c0_342 = arith.constant 0 : index
    %452 = vector.load %arg20[%c30_341, %c0_342] : memref<32x16xf32, #tpu.memory_space<vmem>>, vector<1x16xf32>
    %453 = vector.broadcast %452 : vector<1x16xf32> to vector<32x16xf32>
    %454 = arith.mulf %451, %453 : vector<32x16xf32>
    %455 = arith.addf %431, %454 : vector<32x16xf32>
    %c31_343 = arith.constant 31 : index
    %c0_344 = arith.constant 0 : index
    %c0_345 = arith.constant 0 : index
    %456 = vector.load %arg19[%c31_343, %c0_344, %c0_345] : memref<32x32x16xf32, #tpu.memory_space<vmem>>, vector<1x32x16xf32>
    %457 = vector.shape_cast %456 : vector<1x32x16xf32> to vector<32x16xf32>
    %c31_346 = arith.constant 31 : index
    %c0_347 = arith.constant 0 : index
    %458 = vector.load %arg20[%c31_346, %c0_347] : memref<32x16xf32, #tpu.memory_space<vmem>>, vector<1x16xf32>
    %459 = vector.broadcast %458 : vector<1x16xf32> to vector<32x16xf32>
    %460 = arith.mulf %457, %459 : vector<32x16xf32>
    %461 = arith.addf %437, %460 : vector<32x16xf32>
    %462 = arith.addf %443, %449 : vector<32x16xf32>
    %463 = arith.addf %455, %461 : vector<32x16xf32>
    %464 = arith.addf %462, %463 : vector<32x16xf32>
    %c0_348 = arith.constant 0 : index
    %c0_349 = arith.constant 0 : index
    %465 = vector.load %arg9[%c0_348, %c0_349] : memref<8x16xf32, #tpu.memory_space<vmem>>, vector<8x16xf32>
    %cst_350 = arith.constant dense<0.000000e+00> : vector<8x32xf32>
    %466 = tpu.matmul %465, %464, %cst_350 {dimension_numbers = #tpu.dot_dimension_numbers<[1], [1], [0], [0], [0, 0, 1, 0], [], []>} : vector<8x16xf32>, vector<32x16xf32>, vector<8x32xf32> -> vector<8x32xf32>
    %c0_351 = arith.constant 0 : index
    %c0_352 = arith.constant 0 : index
    %467 = vector.load %arg10[%c0_351, %c0_352] : memref<32x32xf32, #tpu.memory_space<vmem>>, vector<32x32xf32>
    %cst_353 = arith.constant dense<0.000000e+00> : vector<8x32xf32>
    %468 = tpu.matmul %261, %467, %cst_353 {dimension_numbers = #tpu.dot_dimension_numbers<[1], [0], [0], [1], [0, 0, 1, 1], [], []>} : vector<8x32xf32>, vector<32x32xf32>, vector<8x32xf32> -> vector<8x32xf32>
    %469 = arith.addf %466, %468 : vector<8x32xf32>
    %c0_354 = arith.constant 0 : index
    %c0_355 = arith.constant 0 : index
    %470 = vector.load %arg11[%c0_354, %c0_355] : memref<1x32xf32, #tpu.memory_space<vmem>>, vector<1x32xf32>
    %471 = vector.broadcast %470 : vector<1x32xf32> to vector<8x32xf32>
    %472 = arith.addf %469, %471 : vector<8x32xf32>
    %cst_356 = arith.constant 0.000000e+00 : f32
    %473 = vector.broadcast %cst_356 : f32 to vector<8x32xf32>
    %474 = arith.maximumf %472, %473 : vector<8x32xf32>
    %475 = tpu.concatenate %474, %261 in 1 : vector<8x32xf32>, vector<8x32xf32> -> vector<8x64xf32>
    %c0_357 = arith.constant 0 : index
    %c0_358 = arith.constant 0 : index
    %476 = vector.load %arg12[%c0_357, %c0_358] : memref<64x64xf32, #tpu.memory_space<vmem>>, vector<64x64xf32>
    %cst_359 = arith.constant dense<0.000000e+00> : vector<8x64xf32>
    %477 = tpu.matmul %475, %476, %cst_359 {dimension_numbers = #tpu.dot_dimension_numbers<[1], [0], [0], [1], [0, 0, 1, 1], [], []>} : vector<8x64xf32>, vector<64x64xf32>, vector<8x64xf32> -> vector<8x64xf32>
    %c0_360 = arith.constant 0 : index
    %c0_361 = arith.constant 0 : index
    %478 = vector.load %arg13[%c0_360, %c0_361] : memref<1x64xf32, #tpu.memory_space<vmem>>, vector<1x64xf32>
    %479 = vector.broadcast %478 : vector<1x64xf32> to vector<8x64xf32>
    %480 = arith.addf %477, %479 : vector<8x64xf32>
    %481 = arith.negf %480 : vector<8x64xf32>
    %482 = math.exp %481 : vector<8x64xf32>
    %cst_362 = arith.constant 1.000000e+00 : f32
    %483 = vector.broadcast %cst_362 : f32 to vector<8x64xf32>
    %484 = arith.addf %483, %482 : vector<8x64xf32>
    %485 = arith.divf %483, %484 : vector<8x64xf32>
    %486 = vector.extract_strided_slice %485 {offsets = [0, 0], sizes = [8, 32], strides = [1, 1]} : vector<8x64xf32> to vector<8x32xf32>
    %487 = vector.extract_strided_slice %485 {offsets = [0, 32], sizes = [8, 32], strides = [1, 1]} : vector<8x64xf32> to vector<8x32xf32>
    %c0_363 = arith.constant 0 : index
    %c0_364 = arith.constant 0 : index
    %488 = vector.load %arg14[%c0_363, %c0_364] : memref<32x32xf32, #tpu.memory_space<vmem>>, vector<32x32xf32>
    %cst_365 = arith.constant dense<0.000000e+00> : vector<8x32xf32>
    %489 = tpu.matmul %474, %488, %cst_365 {dimension_numbers = #tpu.dot_dimension_numbers<[1], [0], [0], [1], [0, 0, 1, 1], [], []>} : vector<8x32xf32>, vector<32x32xf32>, vector<8x32xf32> -> vector<8x32xf32>
    %c0_366 = arith.constant 0 : index
    %c0_367 = arith.constant 0 : index
    %490 = vector.load %arg16[%c0_366, %c0_367] : memref<1x32xf32, #tpu.memory_space<vmem>>, vector<1x32xf32>
    %491 = vector.broadcast %490 : vector<1x32xf32> to vector<8x32xf32>
    %492 = arith.addf %489, %491 : vector<8x32xf32>
    %c0_368 = arith.constant 0 : index
    %c0_369 = arith.constant 0 : index
    %493 = vector.load %arg15[%c0_368, %c0_369] : memref<32x32xf32, #tpu.memory_space<vmem>>, vector<32x32xf32>
    %cst_370 = arith.constant dense<0.000000e+00> : vector<8x32xf32>
    %494 = tpu.matmul %261, %493, %cst_370 {dimension_numbers = #tpu.dot_dimension_numbers<[1], [0], [0], [1], [0, 0, 1, 1], [], []>} : vector<8x32xf32>, vector<32x32xf32>, vector<8x32xf32> -> vector<8x32xf32>
    %c0_371 = arith.constant 0 : index
    %c0_372 = arith.constant 0 : index
    %495 = vector.load %arg17[%c0_371, %c0_372] : memref<1x32xf32, #tpu.memory_space<vmem>>, vector<1x32xf32>
    %496 = vector.broadcast %495 : vector<1x32xf32> to vector<8x32xf32>
    %497 = arith.addf %494, %496 : vector<8x32xf32>
    %498 = arith.mulf %486, %497 : vector<8x32xf32>
    %499 = arith.addf %492, %498 : vector<8x32xf32>
    %500 = math.tanh %499 : vector<8x32xf32>
    %cst_373 = arith.constant 1.000000e+00 : f32
    %501 = vector.broadcast %cst_373 : f32 to vector<8x32xf32>
    %502 = arith.subf %501, %487 : vector<8x32xf32>
    %503 = arith.mulf %502, %500 : vector<8x32xf32>
    %504 = arith.mulf %487, %261 : vector<8x32xf32>
    %505 = arith.addf %503, %504 : vector<8x32xf32>
    %506 = tpu.transpose %505, [1, 0] : vector<8x32xf32> -> vector<32x8xf32>
    %c0_374 = arith.constant 0 : index
    %c0_375 = arith.constant 0 : index
    %507 = vector.load %arg8[%c0_374, %c0_375] : memref<8x16xf32, #tpu.memory_space<vmem>>, vector<8x16xf32>
    %cst_376 = arith.constant dense<0.000000e+00> : vector<32x16xf32>
    %508 = tpu.matmul %506, %507, %cst_376 {dimension_numbers = #tpu.dot_dimension_numbers<[1], [0], [0], [1], [0, 0, 1, 1], [], []>} : vector<32x8xf32>, vector<8x16xf32>, vector<32x16xf32> -> vector<32x16xf32>
    %c0_377 = arith.constant 0 : index
    %c0_378 = arith.constant 0 : index
    %509 = vector.load %arg20[%c0_377, %c0_378] : memref<32x16xf32, #tpu.memory_space<vmem>>, vector<32x16xf32>
    tpu.vector_store %arg20[%c0_377, %c0_378], %508 {strides = array<i32>} : memref<32x16xf32, #tpu.memory_space<vmem>>, vector<32x16xf32>,
    %cst_379 = arith.constant 0.000000e+00 : f32
    %510 = vector.broadcast %cst_379 : f32 to vector<32x16xf32>
    %cst_380 = arith.constant 0.000000e+00 : f32
    %511 = vector.broadcast %cst_380 : f32 to vector<32x16xf32>
    %cst_381 = arith.constant 0.000000e+00 : f32
    %512 = vector.broadcast %cst_381 : f32 to vector<32x16xf32>
    %cst_382 = arith.constant 0.000000e+00 : f32
    %513 = vector.broadcast %cst_382 : f32 to vector<32x16xf32>
    %c0_383 = arith.constant 0 : index
    %c0_384 = arith.constant 0 : index
    %c0_385 = arith.constant 0 : index
    %514 = vector.load %arg19[%c0_383, %c0_384, %c0_385] : memref<32x32x16xf32, #tpu.memory_space<vmem>>, vector<1x32x16xf32>
    %515 = vector.shape_cast %514 : vector<1x32x16xf32> to vector<32x16xf32>
    %c0_386 = arith.constant 0 : index
    %c0_387 = arith.constant 0 : index
    %516 = vector.load %arg20[%c0_386, %c0_387] : memref<32x16xf32, #tpu.memory_space<vmem>>, vector<1x16xf32>
    %517 = vector.broadcast %516 : vector<1x16xf32> to vector<32x16xf32>
    %518 = arith.mulf %515, %517 : vector<32x16xf32>
    %519 = arith.addf %510, %518 : vector<32x16xf32>
    %c1_388 = arith.constant 1 : index
    %c0_389 = arith.constant 0 : index
    %c0_390 = arith.constant 0 : index
    %520 = vector.load %arg19[%c1_388, %c0_389, %c0_390] : memref<32x32x16xf32, #tpu.memory_space<vmem>>, vector<1x32x16xf32>
    %521 = vector.shape_cast %520 : vector<1x32x16xf32> to vector<32x16xf32>
    %c1_391 = arith.constant 1 : index
    %c0_392 = arith.constant 0 : index
    %522 = vector.load %arg20[%c1_391, %c0_392] : memref<32x16xf32, #tpu.memory_space<vmem>>, vector<1x16xf32>
    %523 = vector.broadcast %522 : vector<1x16xf32> to vector<32x16xf32>
    %524 = arith.mulf %521, %523 : vector<32x16xf32>
    %525 = arith.addf %511, %524 : vector<32x16xf32>
    %c2_393 = arith.constant 2 : index
    %c0_394 = arith.constant 0 : index
    %c0_395 = arith.constant 0 : index
    %526 = vector.load %arg19[%c2_393, %c0_394, %c0_395] : memref<32x32x16xf32, #tpu.memory_space<vmem>>, vector<1x32x16xf32>
    %527 = vector.shape_cast %526 : vector<1x32x16xf32> to vector<32x16xf32>
    %c2_396 = arith.constant 2 : index
    %c0_397 = arith.constant 0 : index
    %528 = vector.load %arg20[%c2_396, %c0_397] : memref<32x16xf32, #tpu.memory_space<vmem>>, vector<1x16xf32>
    %529 = vector.broadcast %528 : vector<1x16xf32> to vector<32x16xf32>
    %530 = arith.mulf %527, %529 : vector<32x16xf32>
    %531 = arith.addf %512, %530 : vector<32x16xf32>
    %c3_398 = arith.constant 3 : index
    %c0_399 = arith.constant 0 : index
    %c0_400 = arith.constant 0 : index
    %532 = vector.load %arg19[%c3_398, %c0_399, %c0_400] : memref<32x32x16xf32, #tpu.memory_space<vmem>>, vector<1x32x16xf32>
    %533 = vector.shape_cast %532 : vector<1x32x16xf32> to vector<32x16xf32>
    %c3_401 = arith.constant 3 : index
    %c0_402 = arith.constant 0 : index
    %534 = vector.load %arg20[%c3_401, %c0_402] : memref<32x16xf32, #tpu.memory_space<vmem>>, vector<1x16xf32>
    %535 = vector.broadcast %534 : vector<1x16xf32> to vector<32x16xf32>
    %536 = arith.mulf %533, %535 : vector<32x16xf32>
    %537 = arith.addf %513, %536 : vector<32x16xf32>
    %c4_403 = arith.constant 4 : index
    %c0_404 = arith.constant 0 : index
    %c0_405 = arith.constant 0 : index
    %538 = vector.load %arg19[%c4_403, %c0_404, %c0_405] : memref<32x32x16xf32, #tpu.memory_space<vmem>>, vector<1x32x16xf32>
    %539 = vector.shape_cast %538 : vector<1x32x16xf32> to vector<32x16xf32>
    %c4_406 = arith.constant 4 : index
    %c0_407 = arith.constant 0 : index
    %540 = vector.load %arg20[%c4_406, %c0_407] : memref<32x16xf32, #tpu.memory_space<vmem>>, vector<1x16xf32>
    %541 = vector.broadcast %540 : vector<1x16xf32> to vector<32x16xf32>
    %542 = arith.mulf %539, %541 : vector<32x16xf32>
    %543 = arith.addf %519, %542 : vector<32x16xf32>
    %c5_408 = arith.constant 5 : index
    %c0_409 = arith.constant 0 : index
    %c0_410 = arith.constant 0 : index
    %544 = vector.load %arg19[%c5_408, %c0_409, %c0_410] : memref<32x32x16xf32, #tpu.memory_space<vmem>>, vector<1x32x16xf32>
    %545 = vector.shape_cast %544 : vector<1x32x16xf32> to vector<32x16xf32>
    %c5_411 = arith.constant 5 : index
    %c0_412 = arith.constant 0 : index
    %546 = vector.load %arg20[%c5_411, %c0_412] : memref<32x16xf32, #tpu.memory_space<vmem>>, vector<1x16xf32>
    %547 = vector.broadcast %546 : vector<1x16xf32> to vector<32x16xf32>
    %548 = arith.mulf %545, %547 : vector<32x16xf32>
    %549 = arith.addf %525, %548 : vector<32x16xf32>
    %c6_413 = arith.constant 6 : index
    %c0_414 = arith.constant 0 : index
    %c0_415 = arith.constant 0 : index
    %550 = vector.load %arg19[%c6_413, %c0_414, %c0_415] : memref<32x32x16xf32, #tpu.memory_space<vmem>>, vector<1x32x16xf32>
    %551 = vector.shape_cast %550 : vector<1x32x16xf32> to vector<32x16xf32>
    %c6_416 = arith.constant 6 : index
    %c0_417 = arith.constant 0 : index
    %552 = vector.load %arg20[%c6_416, %c0_417] : memref<32x16xf32, #tpu.memory_space<vmem>>, vector<1x16xf32>
    %553 = vector.broadcast %552 : vector<1x16xf32> to vector<32x16xf32>
    %554 = arith.mulf %551, %553 : vector<32x16xf32>
    %555 = arith.addf %531, %554 : vector<32x16xf32>
    %c7_418 = arith.constant 7 : index
    %c0_419 = arith.constant 0 : index
    %c0_420 = arith.constant 0 : index
    %556 = vector.load %arg19[%c7_418, %c0_419, %c0_420] : memref<32x32x16xf32, #tpu.memory_space<vmem>>, vector<1x32x16xf32>
    %557 = vector.shape_cast %556 : vector<1x32x16xf32> to vector<32x16xf32>
    %c7_421 = arith.constant 7 : index
    %c0_422 = arith.constant 0 : index
    %558 = vector.load %arg20[%c7_421, %c0_422] : memref<32x16xf32, #tpu.memory_space<vmem>>, vector<1x16xf32>
    %559 = vector.broadcast %558 : vector<1x16xf32> to vector<32x16xf32>
    %560 = arith.mulf %557, %559 : vector<32x16xf32>
    %561 = arith.addf %537, %560 : vector<32x16xf32>
    %c8_423 = arith.constant 8 : index
    %c0_424 = arith.constant 0 : index
    %c0_425 = arith.constant 0 : index
    %562 = vector.load %arg19[%c8_423, %c0_424, %c0_425] : memref<32x32x16xf32, #tpu.memory_space<vmem>>, vector<1x32x16xf32>
    %563 = vector.shape_cast %562 : vector<1x32x16xf32> to vector<32x16xf32>
    %c8_426 = arith.constant 8 : index
    %c0_427 = arith.constant 0 : index
    %564 = vector.load %arg20[%c8_426, %c0_427] : memref<32x16xf32, #tpu.memory_space<vmem>>, vector<1x16xf32>
    %565 = vector.broadcast %564 : vector<1x16xf32> to vector<32x16xf32>
    %566 = arith.mulf %563, %565 : vector<32x16xf32>
    %567 = arith.addf %543, %566 : vector<32x16xf32>
    %c9_428 = arith.constant 9 : index
    %c0_429 = arith.constant 0 : index
    %c0_430 = arith.constant 0 : index
    %568 = vector.load %arg19[%c9_428, %c0_429, %c0_430] : memref<32x32x16xf32, #tpu.memory_space<vmem>>, vector<1x32x16xf32>
    %569 = vector.shape_cast %568 : vector<1x32x16xf32> to vector<32x16xf32>
    %c9_431 = arith.constant 9 : index
    %c0_432 = arith.constant 0 : index
    %570 = vector.load %arg20[%c9_431, %c0_432] : memref<32x16xf32, #tpu.memory_space<vmem>>, vector<1x16xf32>
    %571 = vector.broadcast %570 : vector<1x16xf32> to vector<32x16xf32>
    %572 = arith.mulf %569, %571 : vector<32x16xf32>
    %573 = arith.addf %549, %572 : vector<32x16xf32>
    %c10_433 = arith.constant 10 : index
    %c0_434 = arith.constant 0 : index
    %c0_435 = arith.constant 0 : index
    %574 = vector.load %arg19[%c10_433, %c0_434, %c0_435] : memref<32x32x16xf32, #tpu.memory_space<vmem>>, vector<1x32x16xf32>
    %575 = vector.shape_cast %574 : vector<1x32x16xf32> to vector<32x16xf32>
    %c10_436 = arith.constant 10 : index
    %c0_437 = arith.constant 0 : index
    %576 = vector.load %arg20[%c10_436, %c0_437] : memref<32x16xf32, #tpu.memory_space<vmem>>, vector<1x16xf32>
    %577 = vector.broadcast %576 : vector<1x16xf32> to vector<32x16xf32>
    %578 = arith.mulf %575, %577 : vector<32x16xf32>
    %579 = arith.addf %555, %578 : vector<32x16xf32>
    %c11_438 = arith.constant 11 : index
    %c0_439 = arith.constant 0 : index
    %c0_440 = arith.constant 0 : index
    %580 = vector.load %arg19[%c11_438, %c0_439, %c0_440] : memref<32x32x16xf32, #tpu.memory_space<vmem>>, vector<1x32x16xf32>
    %581 = vector.shape_cast %580 : vector<1x32x16xf32> to vector<32x16xf32>
    %c11_441 = arith.constant 11 : index
    %c0_442 = arith.constant 0 : index
    %582 = vector.load %arg20[%c11_441, %c0_442] : memref<32x16xf32, #tpu.memory_space<vmem>>, vector<1x16xf32>
    %583 = vector.broadcast %582 : vector<1x16xf32> to vector<32x16xf32>
    %584 = arith.mulf %581, %583 : vector<32x16xf32>
    %585 = arith.addf %561, %584 : vector<32x16xf32>
    %c12_443 = arith.constant 12 : index
    %c0_444 = arith.constant 0 : index
    %c0_445 = arith.constant 0 : index
    %586 = vector.load %arg19[%c12_443, %c0_444, %c0_445] : memref<32x32x16xf32, #tpu.memory_space<vmem>>, vector<1x32x16xf32>
    %587 = vector.shape_cast %586 : vector<1x32x16xf32> to vector<32x16xf32>
    %c12_446 = arith.constant 12 : index
    %c0_447 = arith.constant 0 : index
    %588 = vector.load %arg20[%c12_446, %c0_447] : memref<32x16xf32, #tpu.memory_space<vmem>>, vector<1x16xf32>
    %589 = vector.broadcast %588 : vector<1x16xf32> to vector<32x16xf32>
    %590 = arith.mulf %587, %589 : vector<32x16xf32>
    %591 = arith.addf %567, %590 : vector<32x16xf32>
    %c13_448 = arith.constant 13 : index
    %c0_449 = arith.constant 0 : index
    %c0_450 = arith.constant 0 : index
    %592 = vector.load %arg19[%c13_448, %c0_449, %c0_450] : memref<32x32x16xf32, #tpu.memory_space<vmem>>, vector<1x32x16xf32>
    %593 = vector.shape_cast %592 : vector<1x32x16xf32> to vector<32x16xf32>
    %c13_451 = arith.constant 13 : index
    %c0_452 = arith.constant 0 : index
    %594 = vector.load %arg20[%c13_451, %c0_452] : memref<32x16xf32, #tpu.memory_space<vmem>>, vector<1x16xf32>
    %595 = vector.broadcast %594 : vector<1x16xf32> to vector<32x16xf32>
    %596 = arith.mulf %593, %595 : vector<32x16xf32>
    %597 = arith.addf %573, %596 : vector<32x16xf32>
    %c14_453 = arith.constant 14 : index
    %c0_454 = arith.constant 0 : index
    %c0_455 = arith.constant 0 : index
    %598 = vector.load %arg19[%c14_453, %c0_454, %c0_455] : memref<32x32x16xf32, #tpu.memory_space<vmem>>, vector<1x32x16xf32>
    %599 = vector.shape_cast %598 : vector<1x32x16xf32> to vector<32x16xf32>
    %c14_456 = arith.constant 14 : index
    %c0_457 = arith.constant 0 : index
    %600 = vector.load %arg20[%c14_456, %c0_457] : memref<32x16xf32, #tpu.memory_space<vmem>>, vector<1x16xf32>
    %601 = vector.broadcast %600 : vector<1x16xf32> to vector<32x16xf32>
    %602 = arith.mulf %599, %601 : vector<32x16xf32>
    %603 = arith.addf %579, %602 : vector<32x16xf32>
    %c15_458 = arith.constant 15 : index
    %c0_459 = arith.constant 0 : index
    %c0_460 = arith.constant 0 : index
    %604 = vector.load %arg19[%c15_458, %c0_459, %c0_460] : memref<32x32x16xf32, #tpu.memory_space<vmem>>, vector<1x32x16xf32>
    %605 = vector.shape_cast %604 : vector<1x32x16xf32> to vector<32x16xf32>
    %c15_461 = arith.constant 15 : index
    %c0_462 = arith.constant 0 : index
    %606 = vector.load %arg20[%c15_461, %c0_462] : memref<32x16xf32, #tpu.memory_space<vmem>>, vector<1x16xf32>
    %607 = vector.broadcast %606 : vector<1x16xf32> to vector<32x16xf32>
    %608 = arith.mulf %605, %607 : vector<32x16xf32>
    %609 = arith.addf %585, %608 : vector<32x16xf32>
    %c16_463 = arith.constant 16 : index
    %c0_464 = arith.constant 0 : index
    %c0_465 = arith.constant 0 : index
    %610 = vector.load %arg19[%c16_463, %c0_464, %c0_465] : memref<32x32x16xf32, #tpu.memory_space<vmem>>, vector<1x32x16xf32>
    %611 = vector.shape_cast %610 : vector<1x32x16xf32> to vector<32x16xf32>
    %c16_466 = arith.constant 16 : index
    %c0_467 = arith.constant 0 : index
    %612 = vector.load %arg20[%c16_466, %c0_467] : memref<32x16xf32, #tpu.memory_space<vmem>>, vector<1x16xf32>
    %613 = vector.broadcast %612 : vector<1x16xf32> to vector<32x16xf32>
    %614 = arith.mulf %611, %613 : vector<32x16xf32>
    %615 = arith.addf %591, %614 : vector<32x16xf32>
    %c17_468 = arith.constant 17 : index
    %c0_469 = arith.constant 0 : index
    %c0_470 = arith.constant 0 : index
    %616 = vector.load %arg19[%c17_468, %c0_469, %c0_470] : memref<32x32x16xf32, #tpu.memory_space<vmem>>, vector<1x32x16xf32>
    %617 = vector.shape_cast %616 : vector<1x32x16xf32> to vector<32x16xf32>
    %c17_471 = arith.constant 17 : index
    %c0_472 = arith.constant 0 : index
    %618 = vector.load %arg20[%c17_471, %c0_472] : memref<32x16xf32, #tpu.memory_space<vmem>>, vector<1x16xf32>
    %619 = vector.broadcast %618 : vector<1x16xf32> to vector<32x16xf32>
    %620 = arith.mulf %617, %619 : vector<32x16xf32>
    %621 = arith.addf %597, %620 : vector<32x16xf32>
    %c18_473 = arith.constant 18 : index
    %c0_474 = arith.constant 0 : index
    %c0_475 = arith.constant 0 : index
    %622 = vector.load %arg19[%c18_473, %c0_474, %c0_475] : memref<32x32x16xf32, #tpu.memory_space<vmem>>, vector<1x32x16xf32>
    %623 = vector.shape_cast %622 : vector<1x32x16xf32> to vector<32x16xf32>
    %c18_476 = arith.constant 18 : index
    %c0_477 = arith.constant 0 : index
    %624 = vector.load %arg20[%c18_476, %c0_477] : memref<32x16xf32, #tpu.memory_space<vmem>>, vector<1x16xf32>
    %625 = vector.broadcast %624 : vector<1x16xf32> to vector<32x16xf32>
    %626 = arith.mulf %623, %625 : vector<32x16xf32>
    %627 = arith.addf %603, %626 : vector<32x16xf32>
    %c19_478 = arith.constant 19 : index
    %c0_479 = arith.constant 0 : index
    %c0_480 = arith.constant 0 : index
    %628 = vector.load %arg19[%c19_478, %c0_479, %c0_480] : memref<32x32x16xf32, #tpu.memory_space<vmem>>, vector<1x32x16xf32>
    %629 = vector.shape_cast %628 : vector<1x32x16xf32> to vector<32x16xf32>
    %c19_481 = arith.constant 19 : index
    %c0_482 = arith.constant 0 : index
    %630 = vector.load %arg20[%c19_481, %c0_482] : memref<32x16xf32, #tpu.memory_space<vmem>>, vector<1x16xf32>
    %631 = vector.broadcast %630 : vector<1x16xf32> to vector<32x16xf32>
    %632 = arith.mulf %629, %631 : vector<32x16xf32>
    %633 = arith.addf %609, %632 : vector<32x16xf32>
    %c20_483 = arith.constant 20 : index
    %c0_484 = arith.constant 0 : index
    %c0_485 = arith.constant 0 : index
    %634 = vector.load %arg19[%c20_483, %c0_484, %c0_485] : memref<32x32x16xf32, #tpu.memory_space<vmem>>, vector<1x32x16xf32>
    %635 = vector.shape_cast %634 : vector<1x32x16xf32> to vector<32x16xf32>
    %c20_486 = arith.constant 20 : index
    %c0_487 = arith.constant 0 : index
    %636 = vector.load %arg20[%c20_486, %c0_487] : memref<32x16xf32, #tpu.memory_space<vmem>>, vector<1x16xf32>
    %637 = vector.broadcast %636 : vector<1x16xf32> to vector<32x16xf32>
    %638 = arith.mulf %635, %637 : vector<32x16xf32>
    %639 = arith.addf %615, %638 : vector<32x16xf32>
    %c21_488 = arith.constant 21 : index
    %c0_489 = arith.constant 0 : index
    %c0_490 = arith.constant 0 : index
    %640 = vector.load %arg19[%c21_488, %c0_489, %c0_490] : memref<32x32x16xf32, #tpu.memory_space<vmem>>, vector<1x32x16xf32>
    %641 = vector.shape_cast %640 : vector<1x32x16xf32> to vector<32x16xf32>
    %c21_491 = arith.constant 21 : index
    %c0_492 = arith.constant 0 : index
    %642 = vector.load %arg20[%c21_491, %c0_492] : memref<32x16xf32, #tpu.memory_space<vmem>>, vector<1x16xf32>
    %643 = vector.broadcast %642 : vector<1x16xf32> to vector<32x16xf32>
    %644 = arith.mulf %641, %643 : vector<32x16xf32>
    %645 = arith.addf %621, %644 : vector<32x16xf32>
    %c22_493 = arith.constant 22 : index
    %c0_494 = arith.constant 0 : index
    %c0_495 = arith.constant 0 : index
    %646 = vector.load %arg19[%c22_493, %c0_494, %c0_495] : memref<32x32x16xf32, #tpu.memory_space<vmem>>, vector<1x32x16xf32>
    %647 = vector.shape_cast %646 : vector<1x32x16xf32> to vector<32x16xf32>
    %c22_496 = arith.constant 22 : index
    %c0_497 = arith.constant 0 : index
    %648 = vector.load %arg20[%c22_496, %c0_497] : memref<32x16xf32, #tpu.memory_space<vmem>>, vector<1x16xf32>
    %649 = vector.broadcast %648 : vector<1x16xf32> to vector<32x16xf32>
    %650 = arith.mulf %647, %649 : vector<32x16xf32>
    %651 = arith.addf %627, %650 : vector<32x16xf32>
    %c23_498 = arith.constant 23 : index
    %c0_499 = arith.constant 0 : index
    %c0_500 = arith.constant 0 : index
    %652 = vector.load %arg19[%c23_498, %c0_499, %c0_500] : memref<32x32x16xf32, #tpu.memory_space<vmem>>, vector<1x32x16xf32>
    %653 = vector.shape_cast %652 : vector<1x32x16xf32> to vector<32x16xf32>
    %c23_501 = arith.constant 23 : index
    %c0_502 = arith.constant 0 : index
    %654 = vector.load %arg20[%c23_501, %c0_502] : memref<32x16xf32, #tpu.memory_space<vmem>>, vector<1x16xf32>
    %655 = vector.broadcast %654 : vector<1x16xf32> to vector<32x16xf32>
    %656 = arith.mulf %653, %655 : vector<32x16xf32>
    %657 = arith.addf %633, %656 : vector<32x16xf32>
    %c24_503 = arith.constant 24 : index
    %c0_504 = arith.constant 0 : index
    %c0_505 = arith.constant 0 : index
    %658 = vector.load %arg19[%c24_503, %c0_504, %c0_505] : memref<32x32x16xf32, #tpu.memory_space<vmem>>, vector<1x32x16xf32>
    %659 = vector.shape_cast %658 : vector<1x32x16xf32> to vector<32x16xf32>
    %c24_506 = arith.constant 24 : index
    %c0_507 = arith.constant 0 : index
    %660 = vector.load %arg20[%c24_506, %c0_507] : memref<32x16xf32, #tpu.memory_space<vmem>>, vector<1x16xf32>
    %661 = vector.broadcast %660 : vector<1x16xf32> to vector<32x16xf32>
    %662 = arith.mulf %659, %661 : vector<32x16xf32>
    %663 = arith.addf %639, %662 : vector<32x16xf32>
    %c25_508 = arith.constant 25 : index
    %c0_509 = arith.constant 0 : index
    %c0_510 = arith.constant 0 : index
    %664 = vector.load %arg19[%c25_508, %c0_509, %c0_510] : memref<32x32x16xf32, #tpu.memory_space<vmem>>, vector<1x32x16xf32>
    %665 = vector.shape_cast %664 : vector<1x32x16xf32> to vector<32x16xf32>
    %c25_511 = arith.constant 25 : index
    %c0_512 = arith.constant 0 : index
    %666 = vector.load %arg20[%c25_511, %c0_512] : memref<32x16xf32, #tpu.memory_space<vmem>>, vector<1x16xf32>
    %667 = vector.broadcast %666 : vector<1x16xf32> to vector<32x16xf32>
    %668 = arith.mulf %665, %667 : vector<32x16xf32>
    %669 = arith.addf %645, %668 : vector<32x16xf32>
    %c26_513 = arith.constant 26 : index
    %c0_514 = arith.constant 0 : index
    %c0_515 = arith.constant 0 : index
    %670 = vector.load %arg19[%c26_513, %c0_514, %c0_515] : memref<32x32x16xf32, #tpu.memory_space<vmem>>, vector<1x32x16xf32>
    %671 = vector.shape_cast %670 : vector<1x32x16xf32> to vector<32x16xf32>
    %c26_516 = arith.constant 26 : index
    %c0_517 = arith.constant 0 : index
    %672 = vector.load %arg20[%c26_516, %c0_517] : memref<32x16xf32, #tpu.memory_space<vmem>>, vector<1x16xf32>
    %673 = vector.broadcast %672 : vector<1x16xf32> to vector<32x16xf32>
    %674 = arith.mulf %671, %673 : vector<32x16xf32>
    %675 = arith.addf %651, %674 : vector<32x16xf32>
    %c27_518 = arith.constant 27 : index
    %c0_519 = arith.constant 0 : index
    %c0_520 = arith.constant 0 : index
    %676 = vector.load %arg19[%c27_518, %c0_519, %c0_520] : memref<32x32x16xf32, #tpu.memory_space<vmem>>, vector<1x32x16xf32>
    %677 = vector.shape_cast %676 : vector<1x32x16xf32> to vector<32x16xf32>
    %c27_521 = arith.constant 27 : index
    %c0_522 = arith.constant 0 : index
    %678 = vector.load %arg20[%c27_521, %c0_522] : memref<32x16xf32, #tpu.memory_space<vmem>>, vector<1x16xf32>
    %679 = vector.broadcast %678 : vector<1x16xf32> to vector<32x16xf32>
    %680 = arith.mulf %677, %679 : vector<32x16xf32>
    %681 = arith.addf %657, %680 : vector<32x16xf32>
    %c28_523 = arith.constant 28 : index
    %c0_524 = arith.constant 0 : index
    %c0_525 = arith.constant 0 : index
    %682 = vector.load %arg19[%c28_523, %c0_524, %c0_525] : memref<32x32x16xf32, #tpu.memory_space<vmem>>, vector<1x32x16xf32>
    %683 = vector.shape_cast %682 : vector<1x32x16xf32> to vector<32x16xf32>
    %c28_526 = arith.constant 28 : index
    %c0_527 = arith.constant 0 : index
    %684 = vector.load %arg20[%c28_526, %c0_527] : memref<32x16xf32, #tpu.memory_space<vmem>>, vector<1x16xf32>
    %685 = vector.broadcast %684 : vector<1x16xf32> to vector<32x16xf32>
    %686 = arith.mulf %683, %685 : vector<32x16xf32>
    %687 = arith.addf %663, %686 : vector<32x16xf32>
    %c29_528 = arith.constant 29 : index
    %c0_529 = arith.constant 0 : index
    %c0_530 = arith.constant 0 : index
    %688 = vector.load %arg19[%c29_528, %c0_529, %c0_530] : memref<32x32x16xf32, #tpu.memory_space<vmem>>, vector<1x32x16xf32>
    %689 = vector.shape_cast %688 : vector<1x32x16xf32> to vector<32x16xf32>
    %c29_531 = arith.constant 29 : index
    %c0_532 = arith.constant 0 : index
    %690 = vector.load %arg20[%c29_531, %c0_532] : memref<32x16xf32, #tpu.memory_space<vmem>>, vector<1x16xf32>
    %691 = vector.broadcast %690 : vector<1x16xf32> to vector<32x16xf32>
    %692 = arith.mulf %689, %691 : vector<32x16xf32>
    %693 = arith.addf %669, %692 : vector<32x16xf32>
    %c30_533 = arith.constant 30 : index
    %c0_534 = arith.constant 0 : index
    %c0_535 = arith.constant 0 : index
    %694 = vector.load %arg19[%c30_533, %c0_534, %c0_535] : memref<32x32x16xf32, #tpu.memory_space<vmem>>, vector<1x32x16xf32>
    %695 = vector.shape_cast %694 : vector<1x32x16xf32> to vector<32x16xf32>
    %c30_536 = arith.constant 30 : index
    %c0_537 = arith.constant 0 : index
    %696 = vector.load %arg20[%c30_536, %c0_537] : memref<32x16xf32, #tpu.memory_space<vmem>>, vector<1x16xf32>
    %697 = vector.broadcast %696 : vector<1x16xf32> to vector<32x16xf32>
    %698 = arith.mulf %695, %697 : vector<32x16xf32>
    %699 = arith.addf %675, %698 : vector<32x16xf32>
    %c31_538 = arith.constant 31 : index
    %c0_539 = arith.constant 0 : index
    %c0_540 = arith.constant 0 : index
    %700 = vector.load %arg19[%c31_538, %c0_539, %c0_540] : memref<32x32x16xf32, #tpu.memory_space<vmem>>, vector<1x32x16xf32>
    %701 = vector.shape_cast %700 : vector<1x32x16xf32> to vector<32x16xf32>
    %c31_541 = arith.constant 31 : index
    %c0_542 = arith.constant 0 : index
    %702 = vector.load %arg20[%c31_541, %c0_542] : memref<32x16xf32, #tpu.memory_space<vmem>>, vector<1x16xf32>
    %703 = vector.broadcast %702 : vector<1x16xf32> to vector<32x16xf32>
    %704 = arith.mulf %701, %703 : vector<32x16xf32>
    %705 = arith.addf %681, %704 : vector<32x16xf32>
    %706 = arith.addf %687, %693 : vector<32x16xf32>
    %707 = arith.addf %699, %705 : vector<32x16xf32>
    %708 = arith.addf %706, %707 : vector<32x16xf32>
    %c0_543 = arith.constant 0 : index
    %c0_544 = arith.constant 0 : index
    %709 = vector.load %arg9[%c0_543, %c0_544] : memref<8x16xf32, #tpu.memory_space<vmem>>, vector<8x16xf32>
    %cst_545 = arith.constant dense<0.000000e+00> : vector<8x32xf32>
    %710 = tpu.matmul %709, %708, %cst_545 {dimension_numbers = #tpu.dot_dimension_numbers<[1], [1], [0], [0], [0, 0, 1, 0], [], []>} : vector<8x16xf32>, vector<32x16xf32>, vector<8x32xf32> -> vector<8x32xf32>
    %c0_546 = arith.constant 0 : index
    %c0_547 = arith.constant 0 : index
    %711 = vector.load %arg10[%c0_546, %c0_547] : memref<32x32xf32, #tpu.memory_space<vmem>>, vector<32x32xf32>
    %cst_548 = arith.constant dense<0.000000e+00> : vector<8x32xf32>
    %712 = tpu.matmul %505, %711, %cst_548 {dimension_numbers = #tpu.dot_dimension_numbers<[1], [0], [0], [1], [0, 0, 1, 1], [], []>} : vector<8x32xf32>, vector<32x32xf32>, vector<8x32xf32> -> vector<8x32xf32>
    %713 = arith.addf %710, %712 : vector<8x32xf32>
    %c0_549 = arith.constant 0 : index
    %c0_550 = arith.constant 0 : index
    %714 = vector.load %arg11[%c0_549, %c0_550] : memref<1x32xf32, #tpu.memory_space<vmem>>, vector<1x32xf32>
    %715 = vector.broadcast %714 : vector<1x32xf32> to vector<8x32xf32>
    %716 = arith.addf %713, %715 : vector<8x32xf32>
    %cst_551 = arith.constant 0.000000e+00 : f32
    %717 = vector.broadcast %cst_551 : f32 to vector<8x32xf32>
    %718 = arith.maximumf %716, %717 : vector<8x32xf32>
    %719 = tpu.concatenate %718, %505 in 1 : vector<8x32xf32>, vector<8x32xf32> -> vector<8x64xf32>
    %c0_552 = arith.constant 0 : index
    %c0_553 = arith.constant 0 : index
    %720 = vector.load %arg12[%c0_552, %c0_553] : memref<64x64xf32, #tpu.memory_space<vmem>>, vector<64x64xf32>
    %cst_554 = arith.constant dense<0.000000e+00> : vector<8x64xf32>
    %721 = tpu.matmul %719, %720, %cst_554 {dimension_numbers = #tpu.dot_dimension_numbers<[1], [0], [0], [1], [0, 0, 1, 1], [], []>} : vector<8x64xf32>, vector<64x64xf32>, vector<8x64xf32> -> vector<8x64xf32>
    %c0_555 = arith.constant 0 : index
    %c0_556 = arith.constant 0 : index
    %722 = vector.load %arg13[%c0_555, %c0_556] : memref<1x64xf32, #tpu.memory_space<vmem>>, vector<1x64xf32>
    %723 = vector.broadcast %722 : vector<1x64xf32> to vector<8x64xf32>
    %724 = arith.addf %721, %723 : vector<8x64xf32>
    %725 = arith.negf %724 : vector<8x64xf32>
    %726 = math.exp %725 : vector<8x64xf32>
    %cst_557 = arith.constant 1.000000e+00 : f32
    %727 = vector.broadcast %cst_557 : f32 to vector<8x64xf32>
    %728 = arith.addf %727, %726 : vector<8x64xf32>
    %729 = arith.divf %727, %728 : vector<8x64xf32>
    %730 = vector.extract_strided_slice %729 {offsets = [0, 0], sizes = [8, 32], strides = [1, 1]} : vector<8x64xf32> to vector<8x32xf32>
    %731 = vector.extract_strided_slice %729 {offsets = [0, 32], sizes = [8, 32], strides = [1, 1]} : vector<8x64xf32> to vector<8x32xf32>
    %c0_558 = arith.constant 0 : index
    %c0_559 = arith.constant 0 : index
    %732 = vector.load %arg14[%c0_558, %c0_559] : memref<32x32xf32, #tpu.memory_space<vmem>>, vector<32x32xf32>
    %cst_560 = arith.constant dense<0.000000e+00> : vector<8x32xf32>
    %733 = tpu.matmul %718, %732, %cst_560 {dimension_numbers = #tpu.dot_dimension_numbers<[1], [0], [0], [1], [0, 0, 1, 1], [], []>} : vector<8x32xf32>, vector<32x32xf32>, vector<8x32xf32> -> vector<8x32xf32>
    %c0_561 = arith.constant 0 : index
    %c0_562 = arith.constant 0 : index
    %734 = vector.load %arg16[%c0_561, %c0_562] : memref<1x32xf32, #tpu.memory_space<vmem>>, vector<1x32xf32>
    %735 = vector.broadcast %734 : vector<1x32xf32> to vector<8x32xf32>
    %736 = arith.addf %733, %735 : vector<8x32xf32>
    %c0_563 = arith.constant 0 : index
    %c0_564 = arith.constant 0 : index
    %737 = vector.load %arg15[%c0_563, %c0_564] : memref<32x32xf32, #tpu.memory_space<vmem>>, vector<32x32xf32>
    %cst_565 = arith.constant dense<0.000000e+00> : vector<8x32xf32>
    %738 = tpu.matmul %505, %737, %cst_565 {dimension_numbers = #tpu.dot_dimension_numbers<[1], [0], [0], [1], [0, 0, 1, 1], [], []>} : vector<8x32xf32>, vector<32x32xf32>, vector<8x32xf32> -> vector<8x32xf32>
    %c0_566 = arith.constant 0 : index
    %c0_567 = arith.constant 0 : index
    %739 = vector.load %arg17[%c0_566, %c0_567] : memref<1x32xf32, #tpu.memory_space<vmem>>, vector<1x32xf32>
    %740 = vector.broadcast %739 : vector<1x32xf32> to vector<8x32xf32>
    %741 = arith.addf %738, %740 : vector<8x32xf32>
    %742 = arith.mulf %730, %741 : vector<8x32xf32>
    %743 = arith.addf %736, %742 : vector<8x32xf32>
    %744 = math.tanh %743 : vector<8x32xf32>
    %cst_568 = arith.constant 1.000000e+00 : f32
    %745 = vector.broadcast %cst_568 : f32 to vector<8x32xf32>
    %746 = arith.subf %745, %731 : vector<8x32xf32>
    %747 = arith.mulf %746, %744 : vector<8x32xf32>
    %748 = arith.mulf %731, %505 : vector<8x32xf32>
    %749 = arith.addf %747, %748 : vector<8x32xf32>
    %c0_569 = arith.constant 0 : index
    %c0_570 = arith.constant 0 : index
    %750 = vector.load %arg18[%c0_569, %c0_570] : memref<8x32xf32, #tpu.memory_space<vmem>>, vector<8x32xf32>
    tpu.vector_store %arg18[%c0_569, %c0_570], %749 {strides = array<i32>} : memref<8x32xf32, #tpu.memory_space<vmem>>, vector<8x32xf32>,
    return
  }
}

</mosaic_0001>

<bundles_post_ra>
// kernel: causal_feature_net.1
= control target key start
LH: loop header
LB: loop body
LE: loop exit
PB: predicated region body
PF: predicated region fallthrough
CT: control target
= control target key end

     0   :  { %s3852_s0 = inlined_call_operand.vmem [shape: f32[8,16], index: 0, kind: input, shape index: {}]   ;;  %s3853_s1 = inlined_call_operand.vmem [shape: f32[16,32], index: 1, kind: input, shape index: {}]   ;;  %s3854_s2 = inlined_call_operand.vmem [shape: f32[1,32], index: 2, kind: input, shape index: {}]   ;;  %s3855_s3 = inlined_call_operand.vmem [shape: f32[16,8], index: 3, kind: input, shape index: {}]   ;;  %s3856_s4 = inlined_call_operand.vmem [shape: f32[8,32], index: 4, kind: input, shape index: {}]   ;;  %s3857_s5 = inlined_call_operand.vmem [shape: f32[1,32], index: 5, kind: input, shape index: {}]   ;;  %s3858_s6 = inlined_call_operand.vmem [shape: f32[32,32,32], index: 6, kind: input, shape index: {}]   ;;  %s3859_s7 = inlined_call_operand.vmem [shape: f32[32,32,1], index: 7, kind: input, shape index: {}]   ;;  %s3860_s8 = inlined_call_operand.vmem [shape: f32[8,16], index: 8, kind: input, shape index: {}]   ;;  %s3861_s9 = inlined_call_operand.vmem [shape: f32[8,16], index: 9, kind: input, shape index: {}]   ;;  %s3862_s10 = inlined_call_operand.vmem [shape: f32[32,32], index: 10, kind: input, shape index: {}]   ;;  %s3863_s11 = inlined_call_operand.vmem [shape: f32[1,32], index: 11, kind: input, shape index: {}]   ;;  %s3864_s12 = inlined_call_operand.vmem [shape: f32[64,64], index: 12, kind: input, shape index: {}]   ;;  %s3865_s13 = inlined_call_operand.vmem [shape: f32[1,64], index: 13, kind: input, shape index: {}]   ;;  %s3866_s14 = inlined_call_operand.vmem [shape: f32[32,32], index: 14, kind: input, shape index: {}]   ;;  %s3867_s15 = inlined_call_operand.vmem [shape: f32[32,32], index: 15, kind: input, shape index: {}]   ;;  %s3868_s16 = inlined_call_operand.vmem [shape: f32[1,32], index: 16, kind: input, shape index: {}]   ;;  %s3869_s17 = inlined_call_operand.vmem [shape: f32[1,32], index: 17, kind: input, shape index: {}]   ;;  %s3870_s18 = inlined_call_operand.hbm [shape: f32[8,32], index: 18, kind: output, shape index: {}]  }
   0x1   :  { %3886 = sst [smem:[#allocation16_spill]] %s3852_s0 }
   0x2   :  { %3887 = sst [smem:[#allocation17_spill]] %s3853_s1 }
   0x3   :  { %3888 = sst [smem:[#allocation18_spill]] %s3854_s2 }
   0x4   :  { %v94_v0 = vld [vmem:[%s3856_s4] sm:$0xff]  ;;  %v93_v1 = vld [vmem:[%s3855_s3 + $0x8] sm:$0xff]  ;;  %vm99_vm0 = vcmask 64512  }
   0x5   :  { %23 = vsyncpa [#allocation5], 0  ;;  %2543 = vmatpush.msra.mxu2 %v94_v0  ;;  %s3889_s1 = sld [smem:[#allocation17_spill]]  ;;  %121 = vmatpush.msra.mxu1 %v94_v0  ;;  %vm67_vm1 = vcmask 130048   ;;  %v92_v5 = vld [vmem:[%s3855_s3] sm:$0xff]  ;;  %s2856_s3 = smov 0  }
   0x6   :  { %2493 = vmatmul.msk.f32.vlgmr.msra.gmra.mxu2 %vm99_vm0, %v93_v1  ;;  %s3890_s2 = sld [smem:[#allocation16_spill]]  ;;  %2492 = vmatmul.msk.f32.vlgmr.msra.gmra.mxu1 %vm99_vm0, %v92_v5  ;;  %v2565_v6 = vld [vmem:[%s3857_s5] ss:$0 sm:$0xff] }
   0x7   :  { %s3891_s29 = sld [smem:[#allocation18_spill]] }
   0xb   :  { %v62_v2 = vld [vmem:[%s3889_s1 + $0x8] sm:$0xff]  ;;  %v61_v3 = vld [vmem:[%s3889_s1] sm:$0xff] }
   0xc   :  { %85 = vmatpush.msra.mxu0 %v62_v2  ;;  %v60_v4 = vld [vmem:[%s3890_s2] sm:$0xff] }
   0xd   :  { %v2564_v7 = vld [vmem:[%s3891_s29] ss:$0 sm:$0xff] }
   0xe   :  { %86 = vmatpush.msra.mxu0 %v61_v3 }
   0xf   :  { %2491 = vmatmul.msk.f32.vlgmr.msra.gmra.mxu0 %vm67_vm1, %v60_v4 }
  0x83   :  { %v123_v8 = vpop.f32.mrf.mxu1 }
  0x84   :  { %v124_v9 = vadd.f32 %v2565_v6, %v123_v8 }
  0x86   :  { %v129_v12 = vmax.f32 %v124_v9, 0.0 }
  0x89   :  { %v126_v14 = vpop.f32.mrf.mxu2 }
  0x8a   :  { %v127_v15 = vadd.f32 %v2565_v6, %v126_v14 }
  0x8c   :  { %v88_v10 = vpop.f32.mrf.mxu0  ;;  %v130_v16 = vmax.f32 %v127_v15, 0.0 }
  0x8d   :  { %v89_v11 = vadd.f32 %v2564_v7, %v88_v10 }
  0x8f   :  { %v2854_v13 = vmax.f32 %v89_v11, 0.0 }
  0x90 LB: > { %vm168_vm2 = vcmask 261120   ;;  %s2866_s5 = sshll.u32 %s2726_s3, 5  ;;  %v2728_v17 = vmov 0   ;;  %s136_s3 = sadd.s32 1, %s2726_s3   ;;  %s2726_s3 = sphi %s2856_s3, %s136_s3  }
  0x91   : > { %2495 = vmatpush.xpose.msk.msra.mxu0 %vm168_vm2, %v130_v16  ;;  %2544 = vmatpush.xpose.msk.msra.mxu1 %vm168_vm2, %v130_v16  ;;  %s138_s19 = scalar_lea.vmem %s3858_s6, %s2866_s5  ;;  %s143_s21 = scalar_lea.vmem %s3859_s7, %s2866_s5 }
  0x92   : > { %2545 = vmatpush.xpose.msk.msra.mxu2 %vm168_vm2, %v130_v16  ;;  %2546 = vmatpush.xpose.msk.msra.mxu3 %vm168_vm2, %v130_v16  ;;  %v139_v18 = vld [vmem:[%s138_s19] sm:$0xff]  ;;  %v140_v19 = vld [vmem:[%s138_s19 + $0x8] sm:$0xff]  ;;  %v146_v20 = vld [vmem:[%s143_s21 + $0x10] sm:$0xff]  ;;  %s216_s4 = scalar_lea.vmem [#allocation2], %s2866_s5  ;;  %p133_p0 = scmp.ge.s32.totalorder %s136_s3, 32  }
  0x93   : > { %2567 = vset.pattern.permute.xlu1 %v2728_v17  ;;  %2566 = vset.pattern.permute.xlu0 %v2728_v17  ;;  %v144_v21 = vld [vmem:[%s143_s21] sm:$0xff]  ;;  %v141_v22 = vld [vmem:[%s138_s19 + $0x10] sm:$0xff]  ;;  %v142_v23 = vld [vmem:[%s138_s19 + $0x18] sm:$0xff]  ;;  %s2729_s6 = smov (%p133_p0), 32   ;;  %vm876_vm3 = vcmask (%p133_p0), 523264   ;;  %s2730_s19 = smov (%p133_p0), 96  }
  0x94   : > { %160 = vperm.xlu1 %2567, %v146_v20   ;;  %150 = vperm.xlu0 %2566, %v144_v21   ;;  %v147_v24 = vld [vmem:[%s143_s21 + $0x18] sm:$0xff]  ;;  %v145_v25 = vld [vmem:[%s143_s21 + $0x8] sm:$0xff]  ;;  %v253_v38 = vld [vmem:[%s3860_s8] sm:$0xff] (%p133_p0) }
  0x95   : > { %2496 = vmatpush.xpose.msk.msra.mxu0 %vm168_vm2, %v129_v12  ;;  %2547 = vmatpush.xpose.msk.msra.mxu1 %vm168_vm2, %v129_v12 }
  0x96   : > { %2548 = vmatpush.xpose.msk.msra.mxu2 %vm168_vm2, %v129_v12  ;;  %2549 = vmatpush.xpose.msk.msra.mxu3 %vm168_vm2, %v129_v12 }
  0x98   : > { %2497 = vmatmul.msk.f32.vlgmr.msra.gmra.mxu0 %vm168_vm2, %v139_v18  ;;  %2498 = vmatmul.msk.f32.vlgmr.msra.gmra.mxu1 %vm168_vm2, %v140_v19 }
  0x99   : > { %2499 = vmatmul.msk.f32.vlgmr.msra.gmra.mxu2 %vm168_vm2, %v141_v22  ;;  %2500 = vmatmul.msk.f32.vlgmr.msra.gmra.mxu3 %vm168_vm2, %v142_v23 }
  0x9a   :  { %281 = vmatpush.msra.mxu0 (%p133_p0), %v253_v38  ;;  %2550 = vmatpush.msra.mxu2 (%p133_p0), %v253_v38 }
  0x9c   : > { %165 = vperm.xlu1 %2567, %v147_v24   ;;  %155 = vperm.xlu0 %2566, %v145_v25  }
  0xbe   :  { %221 = vxpose.xlu0.b32.start.end [1/1] (short) (narrow) (%p133_p0), %v2854_v13, 32 }
 0x106   : > { %v151_v26 = vpop.permute.xlu0 %150  ;;  %v161_v27 = vpop.permute.xlu1 %160 }
 0x10e   : > { %v156_v28 = vpop.permute.xlu0 %155  ;;  %v166_v33 = vpop.permute.xlu1 %165 }
 0x115   : > { %v204_v29 = vpop.f32.mrf.mxu0  ;;  %v207_v30 = vpop.f32.mrf.mxu1 }
 0x116   : > { %v205_v31 = vadd.f32 %v204_v29, %v151_v26  ;;  %v208_v32 = vadd.f32 %v207_v30, %v156_v28 }
 0x118   : > { %217 = vst.msk [vmem:[%s216_s4] sm:$0xff] %vm67_vm1, %v205_v31 }
 0x119   : > { %218 = vst.msk [vmem:[%s216_s4 + $0x8] sm:$0xff] %vm67_vm1, %v208_v32 }
 0x11c   : > { %v210_v34 = vpop.f32.mrf.mxu2  ;;  %v213_v35 = vpop.f32.mrf.mxu3  ;;  %135 = sbr.rel (!%p133_p0) target bundleno = 144 (0x90), region = 133 }
 0x11d   : > { %v211_v36 = vadd.f32 %v210_v34, %v161_v27  ;;  %v214_v37 = vadd.f32 %v213_v35, %v166_v33 }
 0x11f   : > { %219 = vst.msk [vmem:[%s216_s4 + $0x10] sm:$0xff] %vm67_vm1, %v211_v36 }
 0x120   : > { %220 = vst.msk [vmem:[%s216_s4 + $0x18] sm:$0xff] %vm67_vm1, %v214_v37 }
 0x127   :  { %v302_v44 = vld [vmem:[#allocation2 + $0x18] sm:$0xff]  ;;  %v301_v46 = vld [vmem:[#allocation2 + $0x10] sm:$0xff]  ;;  %v300_v51 = vld [vmem:[#allocation2 + $0x8] sm:$0xff] }
 0x128   :  { %v317_v45 = vld [vmem:[#allocation2 + $0x38] sm:$0xff]  ;;  %v316_v47 = vld [vmem:[#allocation2 + $0x30] sm:$0xff]  ;;  %v315_v52 = vld [vmem:[#allocation2 + $0x28] sm:$0xff] }
 0x129   :  { %v332_v48 = vld [vmem:[#allocation2 + $0x58] sm:$0xff]  ;;  %v331_v50 = vld [vmem:[#allocation2 + $0x50] sm:$0xff]  ;;  %v299_v53 = vld [vmem:[#allocation2] sm:$0xff] }
 0x12a   :  { %v347_v49 = vld [vmem:[#allocation2 + $0x78] sm:$0xff]  ;;  %v346_v57 = vld [vmem:[#allocation2 + $0x70] sm:$0xff]  ;;  %v330_v59 = vld [vmem:[#allocation2 + $0x48] sm:$0xff] }
 0x12b   :  { %v362_v56 = vld [vmem:[#allocation2 + $0x98] sm:$0xff]  ;;  %v361_v58 = vld [vmem:[#allocation2 + $0x90] sm:$0xff]  ;;  %v314_v1 = vld [vmem:[#allocation2 + $0x20] sm:$0xff] }
 0x12c   :  { %v377_v61 = vld [vmem:[#allocation2 + $0xb8] sm:$0xff]  ;;  %v376_v63 = vld [vmem:[#allocation2 + $0xb0] sm:$0xff]  ;;  %v345_v9 = vld [vmem:[#allocation2 + $0x68] sm:$0xff] }
 0x12d   :  { %v392_v62 = vld [vmem:[#allocation2 + $0xd8] sm:$0xff]  ;;  %v391_v0 = vld [vmem:[#allocation2 + $0xd0] sm:$0xff]  ;;  %v360_v21 = vld [vmem:[#allocation2 + $0x88] sm:$0xff] }
 0x12e   :  { %v407_v5 = vld [vmem:[#allocation2 + $0xf8] sm:$0xff]  ;;  %v406_v7 = vld [vmem:[#allocation2 + $0xf0] sm:$0xff] }
 0x12f   :  { %v422_v25 = vld [vmem:[#allocation2 + $0x118] sm:$0xff]  ;;  %v421_v35 = vld [vmem:[#allocation2 + $0x110] sm:$0xff] }
 0x130   :  { %v437_v31 = vld [vmem:[#allocation2 + $0x138] sm:$0xff]  ;;  %v436_v36 = vld [vmem:[#allocation2 + $0x130] sm:$0xff] }
 0x131   :  { %v452_v32 = vld [vmem:[#allocation2 + $0x158] sm:$0xff]  ;;  %v451_v37 = vld [vmem:[#allocation2 + $0x150] sm:$0xff] }
 0x144   :  { %860 = vrot.lane.b32.xlu0 %v2854_v13, %s2729_s6 }
 0x162   :  { %v237_v39 = vpop.trf.xlu0 }
 0x163   :  { %2501 = vmatmul.msk.f32.vlgmr.msra.gmra.mxu0 %vm99_vm0, %v237_v39 }
 0x16a   :  { %v238_v40 = vpop.trf.xlu0 }
 0x16b   :  { %2502 = vmatmul.msk.f32.gmra.mxu0 %vm99_vm0, %v238_v40  ;;  %v467_v40 = vld [vmem:[#allocation2 + $0x178] sm:$0xff] }
 0x172   :  { %v239_v41 = vpop.trf.xlu0 }
 0x173   :  { %2503 = vmatmul.msk.f32.vlgmr.msra.gmra.mxu2 %vm99_vm0, %v239_v41 }
 0x17a   :  { %v240_v42 = vpop.trf.xlu0 }
 0x17b   :  { %2504 = vmatmul.msk.f32.gmra.mxu2 %vm99_vm0, %v240_v42  ;;  %v466_v42 = vld [vmem:[#allocation2 + $0x170] sm:$0xff] }
 0x1e0   :  { %v283_v43 = vpop.f32.mrf.mxu0 }
 0x1e1   :  { %295 = vst.msk [vmem:[#allocation3] sm:$0xff] %vm67_vm1, %v283_v43 }
 0x1e8   :  { %v286_v54 = vpop.f32.mrf.mxu0  ;;  %v2568_v55 = vld [vmem:[#allocation3] ss:$0 sm:$0xff]  ;;  %v2569_v60 = vld [vmem:[#allocation3 + $0x1] ss:$0 sm:$0xff]  ;;  %v2904_v3 = vld [vmem:[#allocation3 + $0x2] ss:$0 sm:$0xff] }
 0x1e9   :  { %296 = vst.msk [vmem:[#allocation3 + $0x8] sm:$0xff] %vm67_vm1, %v286_v54  ;;  %v308_v2 = vmul.f32 %v2568_v55, %v302_v44  ;;  %v2906_v4 = vld [vmem:[#allocation3 + $0x3] ss:$0 sm:$0xff]  ;;  %v307_v6 = vmul.f32 %v2568_v55, %v301_v46  ;;  %v2908_v8 = vmul.f32 %v2568_v55, %v300_v51  ;;  %v323_v10 = vmul.f32 %v2569_v60, %v317_v45  ;;  %v2910_v11 = vld [vmem:[#allocation3 + $0x4] ss:$0 sm:$0xff]  ;;  %v375_v44 = vld [vmem:[#allocation2 + $0xa8] sm:$0xff] }
 0x1ea   :  { %v322_v12 = vmul.f32 %v2569_v60, %v316_v47  ;;  %v2912_v14 = vmul.f32 %v2569_v60, %v315_v52  ;;  %v2914_v15 = vmul.f32 %v2568_v55, %v299_v53  ;;  %v338_v16 = vmul.f32 %v2904_v3, %v332_v48  ;;  %v2918_v18 = vld [vmem:[#allocation3 + $0x5] ss:$0 sm:$0xff]  ;;  %v2920_v19 = vld [vmem:[#allocation3 + $0x6] ss:$0 sm:$0xff]  ;;  %v2926_v24 = vld [vmem:[#allocation3 + $0x7] ss:$0 sm:$0xff] }
 0x1eb   :  { %v353_v17 = vmul.f32 %v2906_v4, %v347_v49  ;;  %v337_v20 = vmul.f32 %v2904_v3, %v331_v50  ;;  %v2923_v22 = vmul.f32 %v2569_v60, %v314_v1  ;;  %v368_v23 = vmul.f32 %v2910_v11, %v362_v56  ;;  %v390_v45 = vld [vmem:[#allocation2 + $0xc8] sm:$0xff]  ;;  %v482_v50 = vld [vmem:[#allocation2 + $0x198] sm:$0xff] }
 0x1ec   :  { %v352_v26 = vmul.f32 %v2906_v4, %v346_v57  ;;  %v367_v27 = vmul.f32 %v2910_v11, %v361_v58  ;;  %v2931_v28 = vmul.f32 %v2904_v3, %v330_v59  ;;  %v383_v29 = vmul.f32 %v2918_v18, %v377_v61  ;;  %v405_v46 = vld [vmem:[#allocation2 + $0xe8] sm:$0xff]  ;;  %v497_v56 = vld [vmem:[#allocation2 + $0x1b8] sm:$0xff] }
 0x1ed   :  { %v398_v30 = vmul.f32 %v2920_v19, %v392_v62  ;;  %v382_v33 = vmul.f32 %v2918_v18, %v376_v63  ;;  %v397_v34 = vmul.f32 %v2920_v19, %v391_v0  ;;  %v372_v38 = vadd.f32 %v368_v23, %v308_v2  ;;  %v512_v62 = vld [vmem:[#allocation2 + $0x1d8] sm:$0xff] }
 0x1ee   :  { %v413_v39 = vmul.f32 %v2926_v24, %v407_v5  ;;  %v412_v41 = vmul.f32 %v2926_v24, %v406_v7  ;;  %v2940_v43 = vmul.f32 %v2906_v4, %v345_v9  ;;  %v387_v47 = vadd.f32 %v383_v29, %v323_v10  ;;  %v527_v63 = vld [vmem:[#allocation2 + $0x1f8] sm:$0xff] }
 0x1ef   :  { %v402_v48 = vadd.f32 %v398_v30, %v338_v16  ;;  %v371_v51 = vadd.f32 %v367_v27, %v307_v6  ;;  %v386_v52 = vadd.f32 %v382_v33, %v322_v12  ;;  %v401_v57 = vadd.f32 %v397_v34, %v337_v20  ;;  %v481_v16 = vld [vmem:[#allocation2 + $0x190] sm:$0xff] }
 0x1f0   :  { %v2942_v49 = vld [vmem:[#allocation3 + $0x8] ss:$0 sm:$0xff]  ;;  %v417_v53 = vadd.f32 %v413_v39, %v353_v17  ;;  %v2944_v54 = vld [vmem:[#allocation3 + $0x9] ss:$0 sm:$0xff]  ;;  %v2946_v55 = vld [vmem:[#allocation3 + $0xa] ss:$0 sm:$0xff]  ;;  %v416_v58 = vadd.f32 %v412_v41, %v352_v26  ;;  %v366_v59 = vmul.f32 %v2910_v11, %v360_v21  ;;  %v381_v1 = vmul.f32 %v2918_v18, %v375_v44 }
 0x1f1   :  { %3892 = vst [vmem:[#allocation7_spill] sm:$0xff] %v2946_v55  ;;  %v428_v60 = vmul.f32 %v2942_v49, %v422_v25  ;;  %v2950_v61 = vld [vmem:[#allocation3 + $0xb] ss:$0 sm:$0xff]  ;;  %v427_v0 = vmul.f32 %v2942_v49, %v421_v35  ;;  %v396_v2 = vmul.f32 %v2920_v19, %v390_v45  ;;  %v443_v5 = vmul.f32 %v2944_v54, %v437_v31  ;;  %v2957_v7 = vld [vmem:[#allocation3 + $0xc] ss:$0 sm:$0xff]  ;;  %v511_v33 = vld [vmem:[#allocation2 + $0x1d0] sm:$0xff] }
 0x1f2   :  { %3893 = vst [vmem:[#allocation8_spill] sm:$0xff] %v2950_v61  ;;  %v458_v6 = vmul.f32 %v2946_v55, %v452_v32  ;;  %v2959_v9 = vld [vmem:[#allocation3 + $0xd] ss:$0 sm:$0xff]  ;;  %v442_v10 = vmul.f32 %v2944_v54, %v436_v36  ;;  %v457_v12 = vmul.f32 %v2946_v55, %v451_v37  ;;  %v473_v20 = vmul.f32 %v2950_v61, %v467_v40  ;;  %v2964_v21 = vld [vmem:[#allocation3 + $0xe] ss:$0 sm:$0xff]  ;;  %v496_v32 = vld [vmem:[#allocation2 + $0x1b0] sm:$0xff] }
 0x1f3   :  { %3894 = vst [vmem:[#allocation9_spill] sm:$0xff] %v2957_v7  ;;  %v432_v17 = vadd.f32 %v428_v60, %v372_v38  ;;  %v472_v23 = vmul.f32 %v2950_v61, %v466_v42  ;;  %v411_v25 = vmul.f32 %v2926_v24, %v405_v46  ;;  %v447_v26 = vadd.f32 %v443_v5, %v387_v47  ;;  %v2969_v30 = vld [vmem:[#allocation3 + $0xf] ss:$0 sm:$0xff]  ;;  %v526_v39 = vld [vmem:[#allocation2 + $0x1f0] sm:$0xff] }
 0x1f4   :  { %3895 = vst [vmem:[#allocation10_spill] sm:$0xff] %v2959_v9  ;;  %v462_v27 = vadd.f32 %v458_v6, %v402_v48  ;;  %v488_v29 = vmul.f32 %v2957_v7, %v482_v50  ;;  %v431_v31 = vadd.f32 %v427_v0, %v371_v51  ;;  %v477_v35 = vadd.f32 %v473_v20, %v417_v53  ;;  %v420_v50 = vld [vmem:[#allocation2 + $0x108] sm:$0xff] }
 0x1f5   :  { %3896 = vst [vmem:[#allocation11_spill] sm:$0xff] %v2964_v21  ;;  %v503_v36 = vmul.f32 %v2959_v9, %v497_v56  ;;  %v446_v37 = vadd.f32 %v442_v10, %v386_v52  ;;  %v461_v38 = vadd.f32 %v457_v12, %v401_v57  ;;  %v518_v41 = vmul.f32 %v2964_v21, %v512_v62  ;;  %v435_v51 = vld [vmem:[#allocation2 + $0x128] sm:$0xff] }
 0x1f6   :  { %3897 = vst [vmem:[#allocation12_spill] sm:$0xff] %v2969_v30  ;;  %v289_v34 = vpop.f32.mrf.mxu2  ;;  %v2973_v40 = vadd.f32 %v488_v29, %v432_v17  ;;  %v533_v42 = vmul.f32 %v2969_v30, %v527_v63  ;;  %v476_v44 = vadd.f32 %v472_v23, %v416_v58  ;;  %v487_v46 = vmul.f32 %v2957_v7, %v481_v16  ;;  %v450_v60 = vld [vmem:[#allocation2 + $0x148] sm:$0xff]  ;;  %v329_v16 = vld [vmem:[#allocation2 + $0x40] sm:$0xff]  ;;  %v542_v29 = vld [vmem:[#allocation2 + $0x218] sm:$0xff] }
 0x1f7   :  { %297 = vst.msk [vmem:[#allocation3 + $0x10] sm:$0xff] %vm67_vm1, %v289_v34  ;;  %v2977_v45 = vadd.f32 %v503_v36, %v447_v26  ;;  %v502_v47 = vmul.f32 %v2959_v9, %v496_v32  ;;  %v517_v48 = vmul.f32 %v2964_v21, %v511_v33  ;;  %v2982_v52 = vadd.f32 %v518_v41, %v462_v27  ;;  %v465_v58 = vld [vmem:[#allocation2 + $0x168] sm:$0xff]  ;;  %v344_v26 = vld [vmem:[#allocation2 + $0x60] sm:$0xff]  ;;  %v541_v32 = vld [vmem:[#allocation2 + $0x210] sm:$0xff] }
 0x1f8   :  { %v2984_v53 = vadd.f32 %v533_v42, %v477_v35  ;;  %v532_v56 = vmul.f32 %v2969_v30, %v526_v39  ;;  %v370_v57 = vadd.f32 %v366_v59, %v2908_v8  ;;  %v480_v62 = vld [vmem:[#allocation2 + $0x188] sm:$0xff]  ;;  %v2988_v63 = vadd.f32 %v487_v46, %v431_v31  ;;  %v359_v27 = vld [vmem:[#allocation2 + $0x80] sm:$0xff]  ;;  %v557_v31 = vld [vmem:[#allocation2 + $0x238] sm:$0xff] }
 0x1f9   :  { %v2990_v0 = vadd.f32 %v502_v47, %v446_v37  ;;  %v2992_v5 = vadd.f32 %v517_v48, %v461_v38  ;;  %v385_v6 = vadd.f32 %v381_v1, %v2912_v14  ;;  %v495_v10 = vld [vmem:[#allocation2 + $0x1a8] sm:$0xff]  ;;  %v400_v20 = vadd.f32 %v396_v2, %v2931_v28  ;;  %v572_v35 = vld [vmem:[#allocation2 + $0x258] sm:$0xff]  ;;  %v556_v2 = vld [vmem:[#allocation2 + $0x230] sm:$0xff] }
 0x1fa   :  { %v510_v12 = vld [vmem:[#allocation2 + $0x1c8] sm:$0xff]  ;;  %v2995_v17 = vadd.f32 %v532_v56, %v476_v44  ;;  %v426_v8 = vmul.f32 %v2942_v49, %v420_v50  ;;  %v441_v59 = vmul.f32 %v2944_v54, %v435_v51  ;;  %v415_v33 = vadd.f32 %v411_v25, %v2940_v43  ;;  %v587_v28 = vld [vmem:[#allocation2 + $0x278] sm:$0xff] }
 0x1fb   :  { %v525_v23 = vld [vmem:[#allocation2 + $0x1e8] sm:$0xff]  ;;  %v456_v14 = vmul.f32 %v2946_v55, %v450_v60  ;;  %v471_v1 = vmul.f32 %v2950_v61, %v465_v58  ;;  %v486_v34 = vmul.f32 %v2957_v7, %v480_v62  ;;  %v501_v38 = vmul.f32 %v2959_v9, %v495_v10  ;;  %v602_v43 = vld [vmem:[#allocation2 + $0x298] sm:$0xff]  ;;  %v571_v60 = vld [vmem:[#allocation2 + $0x250] sm:$0xff] }
 0x1fc   :  { %v430_v36 = vadd.f32 %v426_v8, %v370_v57  ;;  %v445_v37 = vadd.f32 %v441_v59, %v385_v6  ;;  %v516_v39 = vmul.f32 %v2964_v21, %v510_v12  ;;  %v540_v41 = vld [vmem:[#allocation2 + $0x208] sm:$0xff]  ;;  %v531_v48 = vmul.f32 %v2969_v30, %v525_v23  ;;  %v617_v56 = vld [vmem:[#allocation2 + $0x2b8] sm:$0xff]  ;;  %v586_v59 = vld [vmem:[#allocation2 + $0x270] sm:$0xff] }
 0x1fd   :  { %v555_v42 = vld [vmem:[#allocation2 + $0x228] sm:$0xff]  ;;  %v460_v25 = vadd.f32 %v456_v14, %v400_v20  ;;  %v475_v47 = vadd.f32 %v471_v1, %v415_v33  ;;  %v3010_v50 = vmul.f32 %v2904_v3, %v329_v16  ;;  %v632_v57 = vld [vmem:[#allocation2 + $0x2d8] sm:$0xff]  ;;  %v3020_v6 = vmul.f32 %v2906_v4, %v344_v26  ;;  %v721_v55 = vld [vmem:[#allocation2 + $0x390] sm:$0xff] }
 0x1fe   :  { %v292_v44 = vpop.f32.mrf.mxu2  ;;  %v3006_v46 = vld [vmem:[#allocation3 + $0x10] ss:$0 sm:$0xff]  ;;  %v3013_v51 = vld [vmem:[#allocation3 + $0x11] ss:$0 sm:$0xff]  ;;  %v3015_v58 = vadd.f32 %v486_v34, %v430_v36  ;;  %v3017_v62 = vadd.f32 %v501_v38, %v445_v37  ;;  %v3023_v10 = vmul.f32 %v2910_v11, %v359_v27  ;;  %v3026_v12 = vld [vmem:[#allocation3 + $0x12] ss:$0 sm:$0xff] }
 0x1ff   :  { %3898 = vst [vmem:[#allocation13_spill] sm:$0xff] %v3006_v46  ;;  %v548_v3 = vmul.f32 %v3006_v46, %v542_v29  ;;  %v3028_v16 = vld [vmem:[#allocation3 + $0x13] ss:$0 sm:$0xff]  ;;  %v647_v20 = vld [vmem:[#allocation2 + $0x2f8] sm:$0xff]  ;;  %v547_v8 = vmul.f32 %v3006_v46, %v541_v32  ;;  %v3031_v23 = vadd.f32 %v516_v39, %v460_v25  ;;  %v3033_v33 = vadd.f32 %v531_v48, %v475_v47  ;;  %v3036_v26 = vld [vmem:[#allocation3 + $0x14] ss:$0 sm:$0xff] }
 0x200   :  { %298 = vst.msk [vmem:[#allocation3 + $0x18] sm:$0xff] %vm67_vm1, %v292_v44  ;;  %v563_v4 = vmul.f32 %v3013_v51, %v557_v31  ;;  %v562_v11 = vmul.f32 %v3013_v51, %v556_v2  ;;  %v601_v27 = vld [vmem:[#allocation2 + $0x290] sm:$0xff]  ;;  %v3040_v29 = vmul.f32 %v3006_v46, %v540_v41  ;;  %v3043_v14 = vmul.f32 %v3013_v51, %v555_v42  ;;  %v662_v41 = vld [vmem:[#allocation2 + $0x318] sm:$0xff] }
 0x201   :  { %3899 = vst [vmem:[#allocation14_spill] sm:$0xff] %v3013_v51  ;;  %v552_v32 = vadd.f32 %v548_v3, %v2973_v40  ;;  %v578_v1 = vmul.f32 %v3026_v12, %v572_v35  ;;  %v593_v34 = vmul.f32 %v3028_v16, %v587_v28  ;;  %v3048_v36 = vld [vmem:[#allocation3 + $0x15] ss:$0 sm:$0xff]  ;;  %v3050_v31 = vld [vmem:[#allocation3 + $0x16] ss:$0 sm:$0xff]  ;;  %v551_v37 = vadd.f32 %v547_v8, %v2988_v63  ;;  %v677_v47 = vld [vmem:[#allocation2 + $0x338] sm:$0xff] }
 0x202   :  { %3900 = vst [vmem:[#allocation15_spill] sm:$0xff] %v3020_v6  ;;  %v567_v2 = vadd.f32 %v563_v4, %v2977_v45  ;;  %v608_v38 = vmul.f32 %v3036_v26, %v602_v43  ;;  %v3055_v39 = vld [vmem:[#allocation3 + $0x17] ss:$0 sm:$0xff]  ;;  %v566_v42 = vadd.f32 %v562_v11, %v2990_v0  ;;  %v577_v40 = vmul.f32 %v3026_v12, %v571_v60  ;;  %v692_v45 = vld [vmem:[#allocation2 + $0x358] sm:$0xff] }
 0x203   :  { %v616_v35 = vld [vmem:[#allocation2 + $0x2b0] sm:$0xff]  ;;  %v582_v28 = vadd.f32 %v578_v1, %v2982_v52  ;;  %v597_v44 = vadd.f32 %v593_v34, %v2984_v53  ;;  %v623_v25 = vmul.f32 %v3048_v36, %v617_v56  ;;  %v638_v63 = vmul.f32 %v3050_v31, %v632_v57  ;;  %v707_v4 = vld [vmem:[#allocation2 + $0x378] sm:$0xff] }
 0x204   :  { %v631_v48 = vld [vmem:[#allocation2 + $0x2d0] sm:$0xff]  ;;  %v612_v3 = vadd.f32 %v608_v38, %v552_v32  ;;  %v653_v8 = vmul.f32 %v3055_v39, %v647_v20  ;;  %v581_v0 = vadd.f32 %v577_v40, %v2992_v5  ;;  %v592_v60 = vmul.f32 %v3028_v16, %v586_v59  ;;  %v722_v56 = vld [vmem:[#allocation2 + $0x398] sm:$0xff] }
 0x205   :  { %v646_v43 = vld [vmem:[#allocation2 + $0x2f0] sm:$0xff]  ;;  %v627_v1 = vadd.f32 %v623_v25, %v567_v2  ;;  %v642_v53 = vadd.f32 %v638_v63, %v582_v28  ;;  %v737_v57 = vld [vmem:[#allocation2 + $0x3b8] sm:$0xff]  ;;  %v607_v51 = vmul.f32 %v3036_v26, %v601_v27  ;;  %v622_v46 = vmul.f32 %v3048_v36, %v616_v35 }
 0x206   :  { %v661_v11 = vld [vmem:[#allocation2 + $0x310] sm:$0xff]  ;;  %v657_v32 = vadd.f32 %v653_v8, %v597_v44  ;;  %v752_v5 = vld [vmem:[#allocation2 + $0x3d8] sm:$0xff]  ;;  %v596_v59 = vadd.f32 %v592_v60, %v2995_v17  ;;  %v637_v40 = vmul.f32 %v3050_v31, %v631_v48  ;;  %v652_v2 = vmul.f32 %v3055_v39, %v646_v43 }
 0x207   :  { %v676_v52 = vld [vmem:[#allocation2 + $0x330] sm:$0xff]  ;;  %v3066_v34 = vld [vmem:[#allocation3 + $0x18] ss:$0 sm:$0xff]  ;;  %v3070_v38 = vld [vmem:[#allocation3 + $0x19] ss:$0 sm:$0xff]  ;;  %v611_v30 = vadd.f32 %v607_v51, %v551_v37  ;;  %v626_v35 = vadd.f32 %v622_v46, %v566_v42 }
 0x208   :  { %v3072_v20 = vld [vmem:[#allocation3 + $0x1a] ss:$0 sm:$0xff]  ;;  %v691_v28 = vld [vmem:[#allocation2 + $0x350] sm:$0xff]  ;;  %v668_v25 = vmul.f32 %v3066_v34, %v662_v41  ;;  %v3078_v63 = vld [vmem:[#allocation3 + $0x1b] ss:$0 sm:$0xff]  ;;  %v667_v44 = vmul.f32 %v3066_v34, %v661_v11  ;;  %v683_v21 = vmul.f32 %v3070_v38, %v677_v47  ;;  %v641_v43 = vadd.f32 %v637_v40, %v581_v0 }
 0x209   :  { %v767_v27 = vld [vmem:[#allocation2 + $0x3f8] sm:$0xff]  ;;  %v706_v8 = vld [vmem:[#allocation2 + $0x370] sm:$0xff]  ;;  %v698_v9 = vmul.f32 %v3072_v20, %v692_v45  ;;  %v656_v60 = vadd.f32 %v652_v2, %v596_v59  ;;  %v713_v41 = vmul.f32 %v3078_v63, %v707_v4  ;;  %v682_v46 = vmul.f32 %v3070_v38, %v676_v52 }
 0x20a   :  { %v3083_v17 = vld [vmem:[#allocation3 + $0x1c] ss:$0 sm:$0xff]  ;;  %v3085_v48 = vld [vmem:[#allocation3 + $0x1d] ss:$0 sm:$0xff]  ;;  %v672_v7 = vadd.f32 %v668_v25, %v612_v3  ;;  %v3088_v61 = vld [vmem:[#allocation3 + $0x1e] ss:$0 sm:$0xff]  ;;  %v671_v51 = vadd.f32 %v667_v44, %v611_v30  ;;  %v687_v37 = vadd.f32 %v683_v21, %v627_v1  ;;  %v697_v4 = vmul.f32 %v3072_v20, %v691_v28 }
 0x20b   :  { %v702_v42 = vadd.f32 %v698_v9, %v642_v53  ;;  %v728_v47 = vmul.f32 %v3083_v17, %v722_v56  ;;  %v743_v45 = vmul.f32 %v3085_v48, %v737_v57  ;;  %v3093_v11 = vld [vmem:[#allocation3 + $0x1f] ss:$0 sm:$0xff]  ;;  %v736_v6 = vld [vmem:[#allocation2 + $0x3b0] sm:$0xff]  ;;  %v717_v0 = vadd.f32 %v713_v41, %v657_v32  ;;  %v570_v32 = vld [vmem:[#allocation2 + $0x248] sm:$0xff] }
 0x20c   :  { %v758_v3 = vmul.f32 %v3088_v61, %v752_v5  ;;  %v686_v59 = vadd.f32 %v682_v46, %v626_v35  ;;  %v751_v40 = vld [vmem:[#allocation2 + $0x3d0] sm:$0xff]  ;;  %v773_v21 = vmul.f32 %v3093_v11, %v767_v27  ;;  %v712_v9 = vmul.f32 %v3078_v63, %v706_v8  ;;  %v585_v44 = vld [vmem:[#allocation2 + $0x268] sm:$0xff] }
 0x20d   :  { %v732_v30 = vadd.f32 %v728_v47, %v672_v7  ;;  %v747_v2 = vadd.f32 %v743_v45, %v687_v37  ;;  %v766_v52 = vld [vmem:[#allocation2 + $0x3f0] sm:$0xff]  ;;  %v701_v53 = vadd.f32 %v697_v4, %v641_v43  ;;  %v727_v56 = vmul.f32 %v3083_v17, %v721_v55  ;;  %v600_v7 = vld [vmem:[#allocation2 + $0x288] sm:$0xff] }
 0x20e   :  { %v762_v1 = vadd.f32 %v758_v3, %v702_v42  ;;  %v742_v57 = vmul.f32 %v3085_v48, %v736_v6  ;;  %v777_v25 = vadd.f32 %v773_v21, %v717_v0  ;;  %v716_v35 = vadd.f32 %v712_v9, %v656_v60  ;;  %v615_v43 = vld [vmem:[#allocation2 + $0x2a8] sm:$0xff] }
 0x20f   :  { %v781_v5 = vadd.f32 %v747_v2, %v732_v30  ;;  %v757_v28 = vmul.f32 %v3088_v61, %v751_v40  ;;  %v731_v41 = vadd.f32 %v727_v56, %v671_v51  ;;  %v772_v27 = vmul.f32 %v3093_v11, %v766_v52  ;;  %v630_v37 = vld [vmem:[#allocation2 + $0x2c8] sm:$0xff]  ;;  %v3111_v51 = vld [vmem:[%s3862_s10 + $0x18] sm:$0xff] }
 0x210   :  { %v746_v46 = vadd.f32 %v742_v57, %v686_v59  ;;  %v550_v8 = vadd.f32 %v3040_v29, %v3015_v58  ;;  %v785_v55 = vadd.f32 %v777_v25, %v762_v1  ;;  %v565_v6 = vadd.f32 %v3043_v14, %v3017_v62  ;;  %v645_v47 = vld [vmem:[#allocation2 + $0x2e8] sm:$0xff]  ;;  %811 = vmatpush.msra.mxu1 %v3111_v51  ;;  %v3119_v62 = vld [vmem:[%s3862_s10 + $0x10] sm:$0xff] }
 0x211   :  { %v761_v42 = vadd.f32 %v757_v28, %v701_v53  ;;  %v576_v60 = vmul.f32 %v3026_v12, %v570_v32  ;;  %v776_v45 = vadd.f32 %v772_v27, %v716_v35  ;;  %v591_v3 = vmul.f32 %v3028_v16, %v585_v44  ;;  %v660_v29 = vld [vmem:[#allocation2 + $0x308] sm:$0xff] }
 0x212   :  { %v780_v0 = vadd.f32 %v746_v46, %v731_v41  ;;  %v606_v58 = vmul.f32 %v3036_v26, %v600_v7  ;;  %v675_v59 = vld [vmem:[#allocation2 + $0x328] sm:$0xff]  ;;  %v789_v14 = vadd.f32 %v785_v55, %v781_v5  ;;  %v621_v40 = vmul.f32 %v3048_v36, %v615_v43  ;;  %812 = vmatpush.msra.mxu1 %v3119_v62  ;;  %v3141_v7 = vld [vmem:[%s3862_s10] sm:$0xff] }
 0x213   :  { %v580_v4 = vadd.f32 %v576_v60, %v3031_v23  ;;  %v636_v30 = vmul.f32 %v3050_v31, %v630_v37  ;;  %v690_v2 = vld [vmem:[#allocation2 + $0x348] sm:$0xff]  ;;  %v784_v52 = vadd.f32 %v776_v45, %v761_v42  ;;  %v595_v1 = vadd.f32 %v591_v3, %v3033_v33  ;;  %v871_v23 = vld [vmem:[%s3864_s12 + $0x38] sm:$0xff]  ;;  %v374_v43 = vld [vmem:[#allocation2 + $0xa0] sm:$0xff] }
 0x214   :  { %v705_v21 = vld [vmem:[#allocation2 + $0x368] sm:$0xff]  ;;  %v610_v53 = vadd.f32 %v606_v58, %v550_v8  ;;  %v651_v56 = vmul.f32 %v3055_v39, %v645_v47  ;;  %2506 = vmatpush.xpose.msk.msrb.mxu2 %vm67_vm1, %v789_v14  ;;  %v625_v25 = vadd.f32 %v621_v40, %v565_v6  ;;  %v666_v35 = vmul.f32 %v3066_v34, %v660_v29  ;;  %v389_v60 = vld [vmem:[#allocation2 + $0xc0] sm:$0xff]  ;;  %v870_v14 = vld [vmem:[%s3864_s12 + $0x30] sm:$0xff] }
 0x215   :  { %v3127_v9 = vld [vmem:[%s3862_s10 + $0x8] sm:$0xff]  ;;  %v640_v5 = vadd.f32 %v636_v30, %v580_v4  ;;  %v681_v28 = vmul.f32 %v3070_v38, %v675_v59  ;;  %v788_v41 = vadd.f32 %v784_v52, %v780_v0  ;;  %v696_v27 = vmul.f32 %v3072_v20, %v690_v2  ;;  %v404_v47 = vld [vmem:[#allocation2 + $0xe0] sm:$0xff]  ;;  %888 = vmatpush.msra.mxu3 %v871_v23 }
 0x216   :  { %v720_v57 = vld [vmem:[#allocation2 + $0x388] sm:$0xff]  ;;  %v655_v46 = vadd.f32 %v651_v56, %v595_v1  ;;  %v711_v8 = vmul.f32 %v3078_v63, %v705_v21  ;;  %813 = vmatpush.msra.mxu1 %v3127_v9  ;;  %v670_v37 = vadd.f32 %v666_v35, %v610_v53  ;;  %v419_v29 = vld [vmem:[#allocation2 + $0x100] sm:$0xff]  ;;  %v369_v30 = vadd.f32 %v3023_v10, %v2914_v15 }
 0x217   :  { %v735_v32 = vld [vmem:[#allocation2 + $0x3a8] sm:$0xff]  ;;  %v685_v55 = vadd.f32 %v681_v28, %v625_v25  ;;  %v726_v42 = vmul.f32 %v3083_v17, %v720_v57  ;;  %v700_v45 = vadd.f32 %v696_v27, %v640_v5  ;;  %v434_v59 = vld [vmem:[#allocation2 + $0x120] sm:$0xff]  ;;  %v380_v2 = vmul.f32 %v2918_v18, %v374_v43  ;;  %889 = vmatpush.msra.mxu3 %v870_v14  ;;  %v3903_v43 = vld [vmem:[#allocation8_spill] sm:$0xff] }
 0x218   :  { %v750_v33 = vld [vmem:[#allocation2 + $0x3c8] sm:$0xff]  ;;  %v741_v6 = vmul.f32 %v3085_v48, %v735_v32  ;;  %v715_v3 = vadd.f32 %v711_v8, %v655_v46  ;;  %814 = vmatpush.msra.mxu1 %v3141_v7  ;;  %2507 = vmatpush.xpose.msk.msrb.mxu2 %vm67_vm1, %v788_v41  ;;  %v449_v21 = vld [vmem:[#allocation2 + $0x140] sm:$0xff]  ;;  %v395_v53 = vmul.f32 %v2920_v19, %v389_v60 }
 0x219   :  { %v765_v44 = vld [vmem:[#allocation2 + $0x3e8] sm:$0xff]  ;;  %v756_v0 = vmul.f32 %v3088_v61, %v750_v33  ;;  %v730_v4 = vadd.f32 %v726_v42, %v670_v37  ;;  %v410_v56 = vmul.f32 %v2926_v24, %v404_v47  ;;  %v464_v57 = vld [vmem:[#allocation2 + $0x160] sm:$0xff]  ;;  %2505 = vmatmul.msk.f32.vlgmr.msra.gmra.mxu1 %vm168_vm2, %v2854_v13  ;;  %v384_v15 = vadd.f32 %v380_v2, %v2923_v22  ;;  %v3904_v37 = vld [vmem:[#allocation9_spill] sm:$0xff] }
 0x21a   :  { %v771_v58 = vmul.f32 %v3093_v11, %v765_v44  ;;  %v745_v40 = vadd.f32 %v741_v6, %v685_v55  ;;  %v479_v32 = vld [vmem:[#allocation2 + $0x180] sm:$0xff]  ;;  %v869_v23 = vld [vmem:[%s3864_s12 + $0x28] sm:$0xff]  ;;  %v425_v18 = vmul.f32 %v2942_v49, %v419_v29  ;;  %v440_v10 = vmul.f32 %v2944_v54, %v434_v59 }
 0x21b   :  { %v760_v52 = vadd.f32 %v756_v0, %v700_v45  ;;  %v494_v5 = vld [vmem:[#allocation2 + $0x1a0] sm:$0xff]  ;;  %v399_v35 = vadd.f32 %v395_v53, %v3010_v50  ;;  %v3901_v28 = vld [vmem:[#allocation15_spill] sm:$0xff]  ;;  %v470_v54 = vmul.f32 %v3903_v43, %v464_v57  ;;  %v485_v55 = vmul.f32 %v3904_v37, %v479_v32  ;;  %890 = vmatpush.msra.mxu3 %v869_v23 }
 0x21c   :  { %v775_v1 = vadd.f32 %v771_v58, %v715_v3  ;;  %v779_v25 = vadd.f32 %v745_v40, %v730_v4  ;;  %v509_v19 = vld [vmem:[#allocation2 + $0x1c0] sm:$0xff]  ;;  %v414_v33 = vadd.f32 %v410_v56, %v3901_v28  ;;  %v3902_v44 = vld [vmem:[#allocation7_spill] sm:$0xff]  ;;  %v429_v8 = vadd.f32 %v425_v18, %v369_v30  ;;  %v3907_v4 = vld [vmem:[#allocation12_spill] sm:$0xff] }
 0x21d   :  { %v455_v41 = vmul.f32 %v3902_v44, %v449_v21  ;;  %v524_v46 = vld [vmem:[#allocation2 + $0x1e0] sm:$0xff]  ;;  %v444_v49 = vadd.f32 %v440_v10, %v384_v15  ;;  %v3906_v3 = vld [vmem:[#allocation11_spill] sm:$0xff]  ;;  %v3908_v30 = vld [vmem:[#allocation13_spill] sm:$0xff] }
 0x21e   :  { %v783_v24 = vadd.f32 %v775_v1, %v760_v52  ;;  %v539_v27 = vld [vmem:[#allocation2 + $0x200] sm:$0xff]  ;;  %v515_v0 = vmul.f32 %v3906_v3, %v509_v19  ;;  %v474_v59 = vadd.f32 %v470_v54, %v414_v33  ;;  %v489_v14 = vadd.f32 %v485_v55, %v429_v8 }
 0x21f   :  { %v868_v22 = vld [vmem:[%s3864_s12 + $0x20] sm:$0xff]  ;;  %v459_v60 = vadd.f32 %v455_v41, %v399_v35  ;;  %v530_v40 = vmul.f32 %v3907_v4, %v524_v46  ;;  %v545_v2 = vmul.f32 %v3908_v30, %v539_v27  ;;  %v865_v4 = vld [vmem:[%s3864_s12 + $0x8] sm:$0xff] }
 0x220   :  { %v554_v42 = vld [vmem:[#allocation2 + $0x220] sm:$0xff]  ;;  %v787_v50 = vadd.f32 %v783_v24, %v779_v25  ;;  %891 = vmatpush.msra.mxu3 %v868_v22 }
 0x221   :  { %v569_v6 = vld [vmem:[#allocation2 + $0x240] sm:$0xff]  ;;  %v519_v53 = vadd.f32 %v515_v0, %v459_v60  ;;  %v534_v15 = vadd.f32 %v530_v40, %v474_v59  ;;  %v549_v18 = vadd.f32 %v545_v2, %v489_v14  ;;  %v920_v14 = vld [vmem:[%s3866_s14 + $0x8] sm:$0xff]  ;;  %v953_v2 = vld [vmem:[%s3867_s15 + $0x18] sm:$0xff] }
 0x222   :  { %v3905_v47 = vld [vmem:[#allocation10_spill] sm:$0xff]  ;;  %2508 = vmatpush.xpose.msk.msrb.mxu2 %vm67_vm1, %v787_v50  ;;  %v575_v32 = vmul.f32 %v3026_v12, %v569_v6 }
 0x223   :  { %v500_v45 = vmul.f32 %v3905_v47, %v494_v5  ;;  %v584_v58 = vld [vmem:[#allocation2 + $0x260] sm:$0xff] }
 0x224   :  { %v599_v29 = vld [vmem:[#allocation2 + $0x280] sm:$0xff]  ;;  %v590_v10 = vmul.f32 %v3028_v16, %v584_v58  ;;  %v579_v28 = vadd.f32 %v575_v32, %v519_v53 }
 0x225   :  { %v614_v21 = vld [vmem:[#allocation2 + $0x2a0] sm:$0xff]  ;;  %v504_v1 = vadd.f32 %v500_v45, %v444_v49  ;;  %v605_v5 = vmul.f32 %v3036_v26, %v599_v29 }
 0x226   :  { %v629_v52 = vld [vmem:[#allocation2 + $0x2c0] sm:$0xff]  ;;  %v620_v33 = vmul.f32 %v3048_v36, %v614_v21  ;;  %v594_v27 = vadd.f32 %v590_v10, %v534_v15  ;;  %v952_v21 = vld [vmem:[%s3867_s15 + $0x10] sm:$0xff] }
 0x227   :  { %v3909_v56 = vld [vmem:[#allocation14_spill] sm:$0xff]  ;;  %v635_v44 = vmul.f32 %v3050_v31, %v629_v52  ;;  %v609_v12 = vadd.f32 %v605_v5, %v549_v18  ;;  %v951_v52 = vld [vmem:[%s3867_s15 + $0x8] sm:$0xff] }
 0x228   :  { %v560_v57 = vmul.f32 %v3909_v56, %v554_v42  ;;  %v644_v23 = vld [vmem:[#allocation2 + $0x2e0] sm:$0xff] }
 0x229   :  { %v659_v25 = vld [vmem:[#allocation2 + $0x300] sm:$0xff]  ;;  %v650_v22 = vmul.f32 %v3055_v39, %v644_v23  ;;  %v639_v26 = vadd.f32 %v635_v44, %v579_v28  ;;  %v861_v23 = vpop.permute.xlu0 %860 }
 0x22a   :  { %v674_v19 = vld [vmem:[#allocation2 + $0x320] sm:$0xff]  ;;  %v564_v35 = vadd.f32 %v560_v57, %v504_v1  ;;  %v665_v8 = vmul.f32 %v3066_v34, %v659_v25 }
 0x22b   :  { %v689_v24 = vld [vmem:[#allocation2 + $0x340] sm:$0xff]  ;;  %v680_v54 = vmul.f32 %v3070_v38, %v674_v19  ;;  %v654_v36 = vadd.f32 %v650_v22, %v594_v27 }
 0x22c   :  { %v704_v41 = vld [vmem:[#allocation2 + $0x360] sm:$0xff]  ;;  %v624_v43 = vadd.f32 %v620_v33, %v564_v35  ;;  %v695_v37 = vmul.f32 %v3072_v20, %v689_v24  ;;  %v669_v42 = vadd.f32 %v665_v8, %v609_v12 }
 0x22d   :  { %v719_v46 = vld [vmem:[#allocation2 + $0x380] sm:$0xff]  ;;  %v710_v31 = vmul.f32 %v3078_v63, %v704_v41 }
 0x22e   :  { %v734_v49 = vld [vmem:[#allocation2 + $0x3a0] sm:$0xff]  ;;  %v725_v6 = vmul.f32 %v3083_v17, %v719_v46  ;;  %v684_v50 = vadd.f32 %v680_v54, %v624_v43  ;;  %v699_v60 = vadd.f32 %v695_v37, %v639_v26  ;;  %v867_v17 = vld [vmem:[%s3864_s12 + $0x18] sm:$0xff] }
 0x22f   :  { %v749_v16 = vld [vmem:[#allocation2 + $0x3c0] sm:$0xff]  ;;  %v740_v39 = vmul.f32 %v3085_v48, %v734_v49  ;;  %v714_v47 = vadd.f32 %v710_v31, %v654_v36  ;;  %v921_v48 = vld [vmem:[%s3866_s14 + $0x10] sm:$0xff]  ;;  %892 = vmatpush.msra.mxu3 %v867_v17  ;;  %v1116_v17 = vld [vmem:[#allocation2 + $0x78] sm:$0xff] }
 0x230   :  { %v764_v55 = vld [vmem:[#allocation2 + $0x3e0] sm:$0xff]  ;;  %v755_v34 = vmul.f32 %v3088_v61, %v749_v16  ;;  %v729_v45 = vadd.f32 %v725_v6, %v669_v42  ;;  %v922_v61 = vld [vmem:[%s3866_s14 + $0x18] sm:$0xff] }
 0x231   :  { %v770_v3 = vmul.f32 %v3093_v11, %v764_v55  ;;  %v744_v38 = vadd.f32 %v740_v39, %v684_v50  ;;  %v790_v63 = vld [vmem:[%s3861_s9] sm:$0xff]  ;;  %942 = vmatpush.msrb.mxu1 %v922_v61  ;;  %v866_v11 = vld [vmem:[%s3864_s12 + $0x10] sm:$0xff] }
 0x232   :  { %v759_v0 = vadd.f32 %v755_v34, %v699_v60  ;;  %893 = vmatpush.msra.mxu3 %v866_v11  ;;  %v919_v40 = vld [vmem:[%s3866_s14] sm:$0xff]  ;;  %v1144_v11 = vld [vmem:[#allocation2 + $0xb8] sm:$0xff] }
 0x233   :  { %v774_v20 = vadd.f32 %v770_v3, %v714_v47  ;;  %v778_v58 = vadd.f32 %v744_v38, %v729_v45  ;;  %943 = vmatpush.msrb.mxu1 %v921_v48  ;;  %v864_v30 = vld [vmem:[%s3864_s12] sm:$0xff] }
 0x234   :  { %894 = vmatpush.msra.mxu3 %v865_v4  ;;  %v950_v1 = vld [vmem:[%s3867_s15] sm:$0xff]  ;;  %v1172_v4 = vld [vmem:[#allocation2 + $0xf8] sm:$0xff] }
 0x235   :  { %v782_v29 = vadd.f32 %v774_v20, %v759_v0  ;;  %944 = vmatpush.msrb.mxu1 %v920_v14  ;;  %v2603_v33 = vld [vmem:[%s3869_s17] ss:$0 sm:$0xff]  ;;  %v1074_v20 = vld [vmem:[#allocation2 + $0x18] sm:$0xff] }
 0x236   :  { %895 = vmatpush.msra.mxu3 %v864_v30  ;;  %v2601_v27 = vld [vmem:[%s3868_s16] ss:$0 sm:$0xff]  ;;  %v1158_v14 = vld [vmem:[#allocation2 + $0xd8] sm:$0xff] }
 0x237   :  { %v786_v59 = vadd.f32 %v782_v29, %v778_v58  ;;  %945 = vmatpush.msrb.mxu1 %v919_v40  ;;  %v1025_v60 = vld [vmem:[%s3860_s8] sm:$0xff]  ;;  %v1088_v58 = vld [vmem:[#allocation2 + $0x38] sm:$0xff] }
 0x238   :  { %1550 = vmatpush.msrb.mxu3 %v3111_v51  ;;  %v2600_v51 = vld [vmem:[%s3863_s11] ss:$0 sm:$0xff] }
 0x239   :  { %2509 = vmatpush.xpose.msk.msrb.mxu2 %vm67_vm1, %v786_v59  ;;  %970 = vmatpush.msra.mxu1 %v953_v2  ;;  %v1102_v59 = vld [vmem:[#allocation2 + $0x58] sm:$0xff] }
 0x23a   :  { %1551 = vmatpush.msrb.mxu3 %v3119_v62 }
 0x23b   :  { %971 = vmatpush.msra.mxu1 %v952_v21 }
 0x23c   :  { %2510 = vmatmul.msk.f32.vlgmr.msrb.gmra.mxu2 %vm67_vm1, %v790_v63  ;;  %1552 = vmatpush.msrb.mxu3 %v3127_v9  ;;  %v2602_v9 = vld [vmem:[%s3865_s13] ss:$0 sm:$0xff]  ;;  %v1130_v63 = vld [vmem:[#allocation2 + $0x98] sm:$0xff] }
 0x23d   :  { %972 = vmatpush.msra.mxu1 %v951_v52  ;;  %1053 = vmatpush.msra.mxu2 %v1025_v60  ;;  %v1186_v52 = vld [vmem:[#allocation2 + $0x118] sm:$0xff] }
 0x23e   :  { %1553 = vmatpush.msrb.mxu3 %v3141_v7 }
 0x23f   :  { %973 = vmatpush.msra.mxu1 %v950_v1  ;;  %v1073_v1 = vld [vmem:[#allocation2 + $0x10] sm:$0xff] }
 0x296   :  { %v816_v53 = vpop.f32.mrf.mxu1 }
 0x2bf   :  { %v851_v56 = vpop.f32.mrf.mxu2 }
 0x2c0   :  { %v852_v57 = vadd.f32 %v851_v56, %v816_v53 }
 0x2c2   :  { %v858_v32 = vadd.f32 %v2600_v51, %v852_v57 }
 0x2c4   :  { %v859_v62 = vmax.f32 %v858_v32, 0.0  ;;  %v1200_v32 = vld [vmem:[#allocation2 + $0x138] sm:$0xff] }
 0x2c6   :  { %v863_v25 = vsel %vm168_vm2, %v859_v62, %v861_v23  ;;  %2513 = vmatmul.msk.f32.vlgmr.msrb.gmra.mxu1 %vm168_vm2, %v859_v62  ;;  %v1101_v62 = vld [vmem:[#allocation2 + $0x50] sm:$0xff] }
 0x2c7   :  { %2511 = vmatmul.msk.f32.vlgmr.msra.gmra.mxu3 %vm876_vm3, %v863_v25  ;;  %v1115_v25 = vld [vmem:[#allocation2 + $0x70] sm:$0xff] }
 0x2ce   :  { %2514 = vmatmul.msk.f32.vlgmr.msra.gmra.mxu1 %vm168_vm2, %v2854_v13 }
 0x343   :  { %v947_v19 = vpop.f32.mrf.mxu1 }
 0x344   :  { %v948_v43 = vadd.f32 %v2601_v27, %v947_v19  ;;  %v1129_v19 = vld [vmem:[#allocation2 + $0x90] sm:$0xff]  ;;  %v1256_v27 = vld [vmem:[#allocation2 + $0x1b8] sm:$0xff] }
 0x34a   :  { %v897_v7 = vpop.f32.mrf.mxu3 }
 0x34b   :  { %v898_v15 = vadd.f32 %v2602_v9, %v897_v7  ;;  %v975_v44 = vpop.f32.mrf.mxu1 }
 0x34c   :  { %v976_v22 = vadd.f32 %v2603_v33, %v975_v44 }
 0x34d   :  { %v2512_v18 = vmul.f32 -1.442695, %v898_v15 }
 0x34f   :  { %2676 = vpow2.f32 %v2512_v18 }
 0x355   :  { %v2677_v10 = vpop.eup %2676 }
 0x356   :  { %v903_v5 = vadd.f32 1.0, %v2677_v10  ;;  %v1214_v10 = vld [vmem:[#allocation2 + $0x158] sm:$0xff] }
 0x358   :  { %2678 = vrcp.f32 %v903_v5  ;;  %v915_v13 = vand.u32 2147483648, %v903_v5  ;;  %v913_v46 = vand.u32 2147483647, %v903_v5  ;;  %vm909_vm5 = vweird.f32 %v903_v5 }
 0x35a   :  { %v916_v8 = vor.u32 1.1754944e-38, %v915_v13  ;;  %vm914_vm7 = vcmp.eq.f32.partialorder %v913_v46, 8.507059e+37  ;;  %v1242_v13 = vld [vmem:[#allocation2 + $0x198] sm:$0xff] }
 0x35e   :  { %v2679_v24 = vpop.eup %2678 }
 0x35f   :  { %v905_v35 = vmul.f32 %v2679_v24, %v903_v5  ;;  %vm910_vm4 = vweird.f32 %v2679_v24  ;;  %v1228_v5 = vld [vmem:[#allocation2 + $0x178] sm:$0xff] }
 0x360   :  { %vm911_vm6 = vmor %vm909_vm5, %vm910_vm4 }
 0x361   :  { %v906_v28 = vsub.f32 1.0, %v905_v35  ;;  %v1157_v35 = vld [vmem:[#allocation2 + $0xd0] sm:$0xff] }
 0x363   :  { %v907_v41 = vmul.f32 %v2679_v24, %v906_v28 }
 0x365   :  { %v908_v12 = vadd.f32 %v2679_v24, %v907_v41 }
 0x367   :  { %v912_v49 = vsel %vm911_vm6, %v2679_v24, %v908_v12  ;;  %v1143_v24 = vld [vmem:[#allocation2 + $0xb0] sm:$0xff] }
 0x368   :  { %v917_v16 = vsel %vm914_vm7, %v916_v8, %v912_v49 }
 0x369   :  { %v978_v26 = vmul.f32 %v976_v22, %v917_v16  ;;  %v981_v55 = vsub.f32 1.0, %v917_v16  ;;  %v987_v42 = vmul.f32 %v917_v16, %v861_v23  ;;  %v1087_v23 = vld [vmem:[#allocation2 + $0x30] sm:$0xff] }
 0x36a   :  { %v1171_v16 = vld [vmem:[#allocation2 + $0xf0] sm:$0xff] }
 0x36b   :  { %v979_v54 = vadd.f32 %v978_v26, %v948_v43 }
 0x36d   :  { %2680 = vtanh.f32 %v979_v54 }
 0x373   :  { %v2681_v37 = vpop.eup %2680 }
 0x374   :  { %983 = vrot.lane.b32.xlu1 %v2681_v37, %s2729_s6 }
 0x3e6   :  { %v984_v36 = vpop.permute.xlu1 %983 }
 0x3e7   :  { %v986_v31 = vmul.f32 %v984_v36, %v981_v55  ;;  %v1270_v55 = vld [vmem:[#allocation2 + $0x1d8] sm:$0xff] }
 0x3e9   :  { %v3259_v6 = vadd.f32 %v987_v42, %v986_v31 }
 0x3eb   :  { %3910 = vst [vmem:[#allocation15_spill] sm:$0xff] %v3259_v6  ;;  %990 = vrot.lane.b32.xlu1 %v3259_v6, %s2730_s19  ;;  %v1409_v6 = vld [vmem:[#allocation2 + $0x310] sm:$0xff] }
 0x45d   :  { %v3263_v50 = vpop.permute.xlu1 %990 }
 0x45e   :  { %3911 = vst [vmem:[#allocation7_spill] sm:$0xff] %v3263_v50  ;;  %2519 = vmatmul.msk.f32.vlgmr.msrb.gmra.mxu3 %vm168_vm2, %v3263_v50  ;;  %993 = vxpose.xlu2.b32.start.end [1/1] (short) (narrow) %v3263_v50, 32 }
 0x4f7   :  { %v1009_v39 = vpop.trf.xlu2 }
 0x4f8   :  { %2515 = vmatmul.msk.f32.vlgmr.msra.gmra.mxu2 %vm99_vm0, %v1009_v39 }
 0x4ff   :  { %v1010_v34 = vpop.trf.xlu2 }
 0x500   :  { %2516 = vmatmul.msk.f32.gmra.mxu2 %vm99_vm0, %v1010_v34 }
 0x507   :  { %v1011_v47 = vpop.trf.xlu2 }
 0x508   :  { %2517 = vmatmul.msk.f32.gmra.mxu2 %vm99_vm0, %v1011_v47 }
 0x50f   :  { %v1012_v45 = vpop.trf.xlu2 }
 0x510   :  { %2518 = vmatmul.msk.f32.gmra.mxu2 %vm99_vm0, %v1012_v45  ;;  %v1284_v45 = vld [vmem:[#allocation2 + $0x1f8] sm:$0xff] }
 0x57b   :  { %v1055_v3 = vpop.f32.mrf.mxu2 }
 0x57c   :  { %1067 = vst.msk [vmem:[#allocation3] sm:$0xff] %vm67_vm1, %v1055_v3 }
 0x583   :  { %v1058_v38 = vpop.f32.mrf.mxu2  ;;  %v3276_v0 = vld [vmem:[#allocation3] ss:$0 sm:$0xff]  ;;  %v3279_v29 = vld [vmem:[#allocation3 + $0x1] ss:$0 sm:$0xff]  ;;  %v3281_v61 = vld [vmem:[#allocation3 + $0x2] ss:$0 sm:$0xff] }
 0x584   :  { %1068 = vst.msk [vmem:[#allocation3 + $0x8] sm:$0xff] %vm67_vm1, %v1058_v38  ;;  %v3283_v48 = vld [vmem:[#allocation3 + $0x3] ss:$0 sm:$0xff]  ;;  %v3285_v40 = vld [vmem:[#allocation3 + $0x4] ss:$0 sm:$0xff]  ;;  %v1080_v53 = vmul.f32 %v3276_v0, %v1074_v20  ;;  %v1094_v51 = vmul.f32 %v3279_v29, %v1088_v58  ;;  %v1108_v56 = vmul.f32 %v3281_v61, %v1102_v59  ;;  %v1079_v44 = vmul.f32 %v3276_v0, %v1073_v1 }
 0x585   :  { %v3287_v30 = vld [vmem:[#allocation3 + $0x5] ss:$0 sm:$0xff]  ;;  %v3289_v2 = vld [vmem:[#allocation3 + $0x6] ss:$0 sm:$0xff]  ;;  %v3291_v21 = vld [vmem:[#allocation3 + $0x7] ss:$0 sm:$0xff]  ;;  %v1136_v57 = vmul.f32 %v3285_v40, %v1130_v63  ;;  %v1122_v9 = vmul.f32 %v3283_v48, %v1116_v17  ;;  %v1135_v41 = vmul.f32 %v3285_v40, %v1129_v19  ;;  %v1093_v12 = vmul.f32 %v3279_v29, %v1087_v23 }
 0x586   :  { %v1150_v7 = vmul.f32 %v3287_v30, %v1144_v11  ;;  %v1164_v15 = vmul.f32 %v3289_v2, %v1158_v14  ;;  %v1178_v18 = vmul.f32 %v3291_v21, %v1172_v4  ;;  %v1107_v22 = vmul.f32 %v3281_v61, %v1101_v62  ;;  %v1298_v4 = vld [vmem:[#allocation2 + $0x218] sm:$0xff]  ;;  %v1199_v62 = vld [vmem:[#allocation2 + $0x130] sm:$0xff] }
 0x587   :  { %v1149_v8 = vmul.f32 %v3287_v30, %v1143_v24  ;;  %v1163_v49 = vmul.f32 %v3289_v2, %v1157_v35  ;;  %v1140_v43 = vadd.f32 %v1136_v57, %v1080_v53  ;;  %v1121_v36 = vmul.f32 %v3283_v48, %v1115_v25  ;;  %v1185_v53 = vld [vmem:[#allocation2 + $0x110] sm:$0xff] }
 0x588   :  { %v1177_v42 = vmul.f32 %v3291_v21, %v1171_v16  ;;  %v1154_v31 = vadd.f32 %v1150_v7, %v1094_v51  ;;  %v1168_v60 = vadd.f32 %v1164_v15, %v1108_v56  ;;  %v1182_v39 = vadd.f32 %v1178_v18, %v1122_v9  ;;  %v1213_v25 = vld [vmem:[#allocation2 + $0x150] sm:$0xff]  ;;  %v1326_v18 = vld [vmem:[#allocation2 + $0x258] sm:$0xff] }
 0x589   :  { %v1139_v63 = vadd.f32 %v1135_v41, %v1079_v44  ;;  %v1167_v1 = vadd.f32 %v1163_v49, %v1107_v22  ;;  %v1227_v9 = vld [vmem:[#allocation2 + $0x170] sm:$0xff] }
 0x58a   :  { %v1181_v23 = vadd.f32 %v1177_v42, %v1121_v36  ;;  %v1241_v24 = vld [vmem:[#allocation2 + $0x190] sm:$0xff] }
 0x58b   :  { %v1061_v28 = vpop.f32.mrf.mxu2  ;;  %v3301_v33 = vld [vmem:[#allocation3 + $0x8] ss:$0 sm:$0xff]  ;;  %v3306_v46 = vld [vmem:[#allocation3 + $0x9] ss:$0 sm:$0xff]  ;;  %v3313_v54 = vld [vmem:[#allocation3 + $0xa] ss:$0 sm:$0xff] }
 0x58c   :  { %1069 = vst.msk [vmem:[#allocation3 + $0x10] sm:$0xff] %vm67_vm1, %v1061_v28  ;;  %v1192_v26 = vmul.f32 %v3301_v33, %v1186_v52  ;;  %v3315_v37 = vld [vmem:[#allocation3 + $0xb] ss:$0 sm:$0xff]  ;;  %v1206_v34 = vmul.f32 %v3306_v46, %v1200_v32  ;;  %v3320_v47 = vld [vmem:[#allocation3 + $0xc] ss:$0 sm:$0xff]  ;;  %v1220_v38 = vmul.f32 %v3313_v54, %v1214_v10  ;;  %v1153_v52 = vadd.f32 %v1149_v8, %v1093_v12  ;;  %v1312_v32 = vld [vmem:[#allocation2 + $0x238] sm:$0xff] }
 0x58d   :  { %v1234_v20 = vmul.f32 %v3315_v37, %v1228_v5  ;;  %v3324_v58 = vld [vmem:[#allocation3 + $0xd] ss:$0 sm:$0xff]  ;;  %v3326_v59 = vld [vmem:[#allocation3 + $0xe] ss:$0 sm:$0xff]  ;;  %v1248_v11 = vmul.f32 %v3320_v47, %v1242_v13  ;;  %v3329_v14 = vld [vmem:[#allocation3 + $0xf] ss:$0 sm:$0xff]  ;;  %v1191_v5 = vmul.f32 %v3301_v33, %v1185_v53  ;;  %v1205_v19 = vmul.f32 %v3306_v46, %v1199_v62 }
 0x58e   :  { %v1196_v3 = vadd.f32 %v1192_v26, %v1140_v43  ;;  %v1210_v17 = vadd.f32 %v1206_v34, %v1154_v31  ;;  %v1224_v51 = vadd.f32 %v1220_v38, %v1168_v60  ;;  %v1262_v57 = vmul.f32 %v3324_v58, %v1256_v27  ;;  %v1340_v10 = vld [vmem:[#allocation2 + $0x278] sm:$0xff]  ;;  %v1255_v35 = vld [vmem:[#allocation2 + $0x1b0] sm:$0xff] }
 0x58f   :  { %v1238_v56 = vadd.f32 %v1234_v20, %v1182_v39  ;;  %v1276_v15 = vmul.f32 %v3326_v59, %v1270_v55  ;;  %v1269_v28 = vld [vmem:[#allocation2 + $0x1d0] sm:$0xff]  ;;  %v1290_v41 = vmul.f32 %v3329_v14, %v1284_v45  ;;  %v1354_v12 = vld [vmem:[#allocation2 + $0x298] sm:$0xff]  ;;  %v1219_v22 = vmul.f32 %v3313_v54, %v1213_v25 }
 0x590   :  { %v1252_v7 = vadd.f32 %v1248_v11, %v1196_v3  ;;  %v1266_v44 = vadd.f32 %v1262_v57, %v1210_v17  ;;  %v1233_v8 = vmul.f32 %v3315_v37, %v1227_v9  ;;  %v1368_v43 = vld [vmem:[#allocation2 + $0x2b8] sm:$0xff]  ;;  %v1195_v26 = vadd.f32 %v1191_v5, %v1139_v63  ;;  %v1283_v42 = vld [vmem:[#allocation2 + $0x1f0] sm:$0xff] }
 0x591   :  { %v1280_v49 = vadd.f32 %v1276_v15, %v1224_v51  ;;  %v1209_v55 = vadd.f32 %v1205_v19, %v1153_v52  ;;  %v1247_v36 = vmul.f32 %v3320_v47, %v1241_v24  ;;  %v1294_v31 = vadd.f32 %v1290_v41, %v1238_v56  ;;  %v1382_v45 = vld [vmem:[#allocation2 + $0x2d8] sm:$0xff]  ;;  %v1297_v19 = vld [vmem:[#allocation2 + $0x210] sm:$0xff] }
 0x592   :  { %v1223_v3 = vadd.f32 %v1219_v22, %v1167_v1  ;;  %v1237_v38 = vadd.f32 %v1233_v8, %v1181_v23  ;;  %v1396_v11 = vld [vmem:[#allocation2 + $0x2f8] sm:$0xff]  ;;  %v1261_v52 = vmul.f32 %v3324_v58, %v1255_v35  ;;  %v1275_v53 = vmul.f32 %v3326_v59, %v1269_v28  ;;  %v1325_v41 = vld [vmem:[#allocation2 + $0x250] sm:$0xff] }
 0x593   :  { %v1064_v13 = vpop.f32.mrf.mxu2  ;;  %v3336_v27 = vld [vmem:[#allocation3 + $0x10] ss:$0 sm:$0xff]  ;;  %v3341_v16 = vld [vmem:[#allocation3 + $0x11] ss:$0 sm:$0xff]  ;;  %v3345_v39 = vld [vmem:[#allocation3 + $0x12] ss:$0 sm:$0xff]  ;;  %v1251_v63 = vadd.f32 %v1247_v36, %v1195_v26  ;;  %v1289_v1 = vmul.f32 %v3329_v14, %v1283_v42 }
 0x594   :  { %1070 = vst.msk [vmem:[#allocation3 + $0x18] sm:$0xff] %vm67_vm1, %v1064_v13  ;;  %v1304_v60 = vmul.f32 %v3336_v27, %v1298_v4  ;;  %v3347_v34 = vld [vmem:[#allocation3 + $0x13] ss:$0 sm:$0xff]  ;;  %v1318_v20 = vmul.f32 %v3341_v16, %v1312_v32  ;;  %v3350_v17 = vld [vmem:[#allocation3 + $0x14] ss:$0 sm:$0xff]  ;;  %v1332_v4 = vmul.f32 %v3345_v39, %v1326_v18  ;;  %v1410_v9 = vld [vmem:[#allocation2 + $0x318] sm:$0xff]  ;;  %v1265_v15 = vadd.f32 %v1261_v52, %v1209_v55 }
 0x595   :  { %v1346_v56 = vmul.f32 %v3347_v34, %v1340_v10  ;;  %v3356_v57 = vld [vmem:[#allocation3 + $0x15] ss:$0 sm:$0xff]  ;;  %v3358_v62 = vld [vmem:[#allocation3 + $0x16] ss:$0 sm:$0xff]  ;;  %v1360_v23 = vmul.f32 %v3350_v17, %v1354_v12  ;;  %v3362_v25 = vld [vmem:[#allocation3 + $0x17] ss:$0 sm:$0xff]  ;;  %v1279_v5 = vadd.f32 %v1275_v53, %v1223_v3  ;;  %v1293_v28 = vadd.f32 %v1289_v1, %v1237_v38 }
 0x596   :  { %v1308_v51 = vadd.f32 %v1304_v60, %v1252_v7  ;;  %v1322_v32 = vadd.f32 %v1318_v20, %v1266_v44  ;;  %v1336_v7 = vadd.f32 %v1332_v4, %v1280_v49  ;;  %v1374_v18 = vmul.f32 %v3356_v57, %v1368_v43  ;;  %v1424_v10 = vld [vmem:[#allocation2 + $0x338] sm:$0xff]  ;;  %v1311_v13 = vld [vmem:[#allocation2 + $0x230] sm:$0xff] }
 0x597   :  { %v1350_v24 = vadd.f32 %v1346_v56, %v1294_v31  ;;  %v1438_v35 = vld [vmem:[#allocation2 + $0x358] sm:$0xff]  ;;  %v1339_v22 = vld [vmem:[#allocation2 + $0x270] sm:$0xff]  ;;  %v1388_v44 = vmul.f32 %v3358_v62, %v1382_v45  ;;  %v1303_v26 = vmul.f32 %v3336_v27, %v1297_v19  ;;  %v1317_v55 = vmul.f32 %v3341_v16, %v1311_v13 }
 0x598   :  { %v1364_v8 = vadd.f32 %v1360_v23, %v1308_v51  ;;  %v1452_v12 = vld [vmem:[#allocation2 + $0x378] sm:$0xff]  ;;  %v1353_v36 = vld [vmem:[#allocation2 + $0x290] sm:$0xff]  ;;  %v1378_v31 = vadd.f32 %v1374_v18, %v1322_v32  ;;  %v1402_v43 = vmul.f32 %v3362_v25, %v1396_v11  ;;  %v1331_v20 = vmul.f32 %v3345_v39, %v1325_v41 }
 0x599   :  { %v1367_v42 = vld [vmem:[#allocation2 + $0x2b0] sm:$0xff]  ;;  %v1466_v3 = vld [vmem:[#allocation2 + $0x398] sm:$0xff]  ;;  %v1345_v52 = vmul.f32 %v3347_v34, %v1339_v22  ;;  %v1392_v45 = vadd.f32 %v1388_v44, %v1336_v7  ;;  %v1307_v56 = vadd.f32 %v1303_v26, %v1251_v63  ;;  %v1321_v1 = vadd.f32 %v1317_v55, %v1265_v15 }
 0x59a   :  { %v1381_v49 = vld [vmem:[#allocation2 + $0x2d0] sm:$0xff]  ;;  %v1480_v38 = vld [vmem:[#allocation2 + $0x3b8] sm:$0xff]  ;;  %v1359_v32 = vmul.f32 %v3350_v17, %v1353_v36  ;;  %v1406_v23 = vadd.f32 %v1402_v43, %v1350_v24  ;;  %v1335_v13 = vadd.f32 %v1331_v20, %v1279_v5  ;;  %v1373_v41 = vmul.f32 %v3356_v57, %v1367_v42 }
 0x59b   :  { %v3369_v60 = vld [vmem:[#allocation3 + $0x18] ss:$0 sm:$0xff]  ;;  %v3373_v53 = vld [vmem:[#allocation3 + $0x19] ss:$0 sm:$0xff]  ;;  %v3375_v51 = vld [vmem:[#allocation3 + $0x1a] ss:$0 sm:$0xff]  ;;  %v1349_v63 = vadd.f32 %v1345_v52, %v1293_v28  ;;  %v1387_v5 = vmul.f32 %v3358_v62, %v1381_v49 }
 0x59c   :  { %v1494_v4 = vld [vmem:[#allocation2 + $0x3d8] sm:$0xff]  ;;  %v1416_v11 = vmul.f32 %v3369_v60, %v1410_v9  ;;  %v1430_v7 = vmul.f32 %v3373_v53, %v1424_v10  ;;  %v1444_v22 = vmul.f32 %v3375_v51, %v1438_v35  ;;  %v1363_v15 = vadd.f32 %v1359_v32, %v1307_v56  ;;  %v1395_v20 = vld [vmem:[#allocation2 + $0x2f0] sm:$0xff] }
 0x59d   :  { %v3379_v19 = vld [vmem:[#allocation3 + $0x1b] ss:$0 sm:$0xff]  ;;  %v3384_v44 = vld [vmem:[#allocation3 + $0x1c] ss:$0 sm:$0xff]  ;;  %v3386_v50 = vld [vmem:[#allocation3 + $0x1d] ss:$0 sm:$0xff]  ;;  %v1377_v55 = vadd.f32 %v1373_v41, %v1321_v1  ;;  %v1391_v52 = vadd.f32 %v1387_v5, %v1335_v13 }
 0x59e   :  { %v1508_v18 = vld [vmem:[#allocation2 + $0x3f8] sm:$0xff]  ;;  %v1420_v26 = vadd.f32 %v1416_v11, %v1364_v8  ;;  %v1458_v24 = vmul.f32 %v3379_v19, %v1452_v12  ;;  %v1434_v36 = vadd.f32 %v1430_v7, %v1378_v31  ;;  %v1448_v42 = vadd.f32 %v1444_v22, %v1392_v45  ;;  %v1423_v56 = vld [vmem:[#allocation2 + $0x330] sm:$0xff] }
 0x59f   :  { %v3389_v9 = vld [vmem:[#allocation3 + $0x1e] ss:$0 sm:$0xff]  ;;  %v1472_v10 = vmul.f32 %v3384_v44, %v1466_v3  ;;  %v1486_v35 = vmul.f32 %v3386_v50, %v1480_v38  ;;  %v3394_v43 = vld [vmem:[#allocation3 + $0x1f] ss:$0 sm:$0xff]  ;;  %v1401_v12 = vmul.f32 %v3362_v25, %v1395_v20  ;;  %v1437_v1 = vld [vmem:[#allocation2 + $0x350] sm:$0xff]  ;;  %v1415_v3 = vmul.f32 %v3369_v60, %v1409_v6 }
 0x5a0   :  { %v1462_v28 = vadd.f32 %v1458_v24, %v1406_v23  ;;  %v1500_v8 = vmul.f32 %v3389_v9, %v1494_v4  ;;  %v1451_v32 = vld [vmem:[#allocation2 + $0x370] sm:$0xff]  ;;  %v1514_v45 = vmul.f32 %v3394_v43, %v1508_v18  ;;  %v1429_v23 = vmul.f32 %v3373_v53, %v1423_v56 }
 0x5a1   :  { %v1476_v49 = vadd.f32 %v1472_v10, %v1420_v26  ;;  %v1490_v31 = vadd.f32 %v1486_v35, %v1434_v36  ;;  %v1465_v38 = vld [vmem:[#allocation2 + $0x390] sm:$0xff]  ;;  %v1405_v7 = vadd.f32 %v1401_v12, %v1349_v63  ;;  %v1443_v4 = vmul.f32 %v3375_v51, %v1437_v1  ;;  %v1072_v36 = vld [vmem:[#allocation2 + $0x8] sm:$0xff] }
 0x5a2   :  { %v1479_v11 = vld [vmem:[#allocation2 + $0x3b0] sm:$0xff]  ;;  %v1504_v41 = vadd.f32 %v1500_v8, %v1448_v42  ;;  %v1518_v24 = vadd.f32 %v1514_v45, %v1462_v28  ;;  %v1419_v20 = vadd.f32 %v1415_v3, %v1363_v15  ;;  %v1457_v26 = vmul.f32 %v3379_v19, %v1451_v32  ;;  %v1086_v10 = vld [vmem:[#allocation2 + $0x28] sm:$0xff] }
 0x5a3   :  { %v1493_v13 = vld [vmem:[#allocation2 + $0x3d0] sm:$0xff]  ;;  %v1522_v5 = vadd.f32 %v1490_v31, %v1476_v49  ;;  %v1433_v18 = vadd.f32 %v1429_v23, %v1377_v55  ;;  %v1447_v35 = vadd.f32 %v1443_v4, %v1391_v52  ;;  %v1471_v6 = vmul.f32 %v3384_v44, %v1465_v38  ;;  %v1100_v63 = vld [vmem:[#allocation2 + $0x48] sm:$0xff] }
 0x5a4   :  { %v1507_v22 = vld [vmem:[#allocation2 + $0x3f0] sm:$0xff]  ;;  %v1485_v42 = vmul.f32 %v3386_v50, %v1479_v11  ;;  %v1526_v8 = vadd.f32 %v1518_v24, %v1504_v41  ;;  %v1461_v12 = vadd.f32 %v1457_v26, %v1405_v7  ;;  %v1499_v56 = vmul.f32 %v3389_v9, %v1493_v13  ;;  %v1114_v28 = vld [vmem:[#allocation2 + $0x68] sm:$0xff] }
 0x5a5   :  { %v1513_v1 = vmul.f32 %v3394_v43, %v1507_v22  ;;  %v1128_v49 = vld [vmem:[#allocation2 + $0x88] sm:$0xff]  ;;  %v1475_v31 = vadd.f32 %v1471_v6, %v1419_v20  ;;  %v1078_v45 = vmul.f32 %v3276_v0, %v1072_v36  ;;  %v1092_v55 = vmul.f32 %v3279_v29, %v1086_v10 }
 0x5a6   :  { %v1142_v15 = vld [vmem:[#allocation2 + $0xa8] sm:$0xff]  ;;  %v1489_v32 = vadd.f32 %v1485_v42, %v1433_v18  ;;  %v1530_v11 = vadd.f32 %v1526_v8, %v1522_v5  ;;  %v1503_v23 = vadd.f32 %v1499_v56, %v1447_v35  ;;  %v1106_v7 = vmul.f32 %v3281_v61, %v1100_v63 }
 0x5a7   :  { %v1156_v52 = vld [vmem:[#allocation2 + $0xc8] sm:$0xff]  ;;  %v1517_v41 = vadd.f32 %v1513_v1, %v1461_v12  ;;  %v1120_v24 = vmul.f32 %v3283_v48, %v1114_v28  ;;  %v1134_v20 = vmul.f32 %v3285_v40, %v1128_v49  ;;  %v1148_v26 = vmul.f32 %v3287_v30, %v1142_v15 }
 0x5a8   :  { %v1170_v3 = vld [vmem:[#allocation2 + $0xe8] sm:$0xff]  ;;  %v1521_v22 = vadd.f32 %v1489_v32, %v1475_v31  ;;  %2520 = vmatpush.xpose.msk.msrb.mxu0 %vm67_vm1, %v1530_v11  ;;  %v1162_v18 = vmul.f32 %v3289_v2, %v1156_v52 }
 0x5a9   :  { %v1184_v38 = vld [vmem:[#allocation2 + $0x108] sm:$0xff]  ;;  %v1525_v10 = vadd.f32 %v1517_v41, %v1503_v23  ;;  %v1176_v5 = vmul.f32 %v3291_v21, %v1170_v3  ;;  %v1138_v63 = vadd.f32 %v1134_v20, %v1078_v45  ;;  %v1152_v8 = vadd.f32 %v1148_v26, %v1092_v55 }
 0x5aa   :  { %v1198_v4 = vld [vmem:[#allocation2 + $0x128] sm:$0xff]  ;;  %v1190_v35 = vmul.f32 %v3301_v33, %v1184_v38  ;;  %v1166_v15 = vadd.f32 %v1162_v18, %v1106_v7 }
 0x5ab   :  { %v1212_v13 = vld [vmem:[#allocation2 + $0x148] sm:$0xff]  ;;  %v1204_v12 = vmul.f32 %v3306_v46, %v1198_v4  ;;  %v1529_v49 = vadd.f32 %v1525_v10, %v1521_v22  ;;  %v1180_v31 = vadd.f32 %v1176_v5, %v1120_v24 }
 0x5ac   :  { %v1226_v36 = vld [vmem:[#allocation2 + $0x168] sm:$0xff]  ;;  %v1218_v56 = vmul.f32 %v3313_v54, %v1212_v13  ;;  %v1194_v3 = vadd.f32 %v1190_v35, %v1138_v63 }
 0x5ad   :  { %v1240_v6 = vld [vmem:[#allocation2 + $0x188] sm:$0xff]  ;;  %v1232_v32 = vmul.f32 %v3315_v37, %v1226_v36  ;;  %v1208_v23 = vadd.f32 %v1204_v12, %v1152_v8  ;;  %2521 = vmatpush.xpose.msk.msrb.mxu0 %vm67_vm1, %v1529_v49 }
 0x5ae   :  { %v1254_v42 = vld [vmem:[#allocation2 + $0x1a8] sm:$0xff]  ;;  %v1246_v38 = vmul.f32 %v3320_v47, %v1240_v6  ;;  %v1222_v4 = vadd.f32 %v1218_v56, %v1166_v15 }
 0x5af   :  { %v1268_v1 = vld [vmem:[#allocation2 + $0x1c8] sm:$0xff]  ;;  %v1260_v45 = vmul.f32 %v3324_v58, %v1254_v42  ;;  %v1236_v13 = vadd.f32 %v1232_v32, %v1180_v31 }
 0x5b0   :  { %v1282_v28 = vld [vmem:[#allocation2 + $0x1e8] sm:$0xff]  ;;  %v1274_v22 = vmul.f32 %v3326_v59, %v1268_v1  ;;  %v1250_v26 = vadd.f32 %v1246_v38, %v1194_v3 }
 0x5b1   :  { %v1296_v52 = vld [vmem:[#allocation2 + $0x208] sm:$0xff]  ;;  %v1288_v7 = vmul.f32 %v3329_v14, %v1282_v28  ;;  %v1264_v36 = vadd.f32 %v1260_v45, %v1208_v23 }
 0x5b2   :  { %v1310_v11 = vld [vmem:[#allocation2 + $0x228] sm:$0xff]  ;;  %v1302_v10 = vmul.f32 %v3336_v27, %v1296_v52  ;;  %v1278_v6 = vadd.f32 %v1274_v22, %v1222_v4 }
 0x5b3   :  { %v1324_v55 = vld [vmem:[#allocation2 + $0x248] sm:$0xff]  ;;  %v1316_v18 = vmul.f32 %v3341_v16, %v1310_v11  ;;  %v1292_v42 = vadd.f32 %v1288_v7, %v1236_v13 }
 0x5b4   :  { %v1338_v41 = vld [vmem:[#allocation2 + $0x268] sm:$0xff]  ;;  %v1330_v63 = vmul.f32 %v3345_v39, %v1324_v55  ;;  %v1306_v1 = vadd.f32 %v1302_v10, %v1250_v26  ;;  %v1071_v10 = vld [vmem:[#allocation2] sm:$0xff] }
 0x5b5   :  { %v1352_v24 = vld [vmem:[#allocation2 + $0x288] sm:$0xff]  ;;  %v1344_v8 = vmul.f32 %v3347_v34, %v1338_v41  ;;  %v1320_v28 = vadd.f32 %v1316_v18, %v1264_v36  ;;  %v1085_v18 = vld [vmem:[#allocation2 + $0x20] sm:$0xff] }
 0x5b6   :  { %v1366_v20 = vld [vmem:[#allocation2 + $0x2a8] sm:$0xff]  ;;  %v1358_v49 = vmul.f32 %v3350_v17, %v1352_v24  ;;  %v1334_v52 = vadd.f32 %v1330_v63, %v1278_v6  ;;  %v1099_v63 = vld [vmem:[#allocation2 + $0x40] sm:$0xff] }
 0x5b7   :  { %v1380_v5 = vld [vmem:[#allocation2 + $0x2c8] sm:$0xff]  ;;  %v1372_v15 = vmul.f32 %v3356_v57, %v1366_v20  ;;  %v1348_v11 = vadd.f32 %v1344_v8, %v1292_v42  ;;  %v1113_v8 = vld [vmem:[#allocation2 + $0x60] sm:$0xff] }
 0x5b8   :  { %v1394_v35 = vld [vmem:[#allocation2 + $0x2e8] sm:$0xff]  ;;  %v1386_v3 = vmul.f32 %v3358_v62, %v1380_v5  ;;  %v1362_v55 = vadd.f32 %v1358_v49, %v1306_v1  ;;  %v1127_v49 = vld [vmem:[#allocation2 + $0x80] sm:$0xff] }
 0x5b9   :  { %v1408_v12 = vld [vmem:[#allocation2 + $0x308] sm:$0xff]  ;;  %v1400_v23 = vmul.f32 %v3362_v25, %v1394_v35  ;;  %v1376_v41 = vadd.f32 %v1372_v15, %v1320_v28  ;;  %v1141_v15 = vld [vmem:[#allocation2 + $0xa0] sm:$0xff] }
 0x5ba   :  { %v1422_v56 = vld [vmem:[#allocation2 + $0x328] sm:$0xff]  ;;  %v1414_v4 = vmul.f32 %v3369_v60, %v1408_v12  ;;  %v1390_v24 = vadd.f32 %v1386_v3, %v1334_v52  ;;  %v1091_v3 = vmul.f32 %v3279_v29, %v1085_v18  ;;  %v1607_v29 = vld [vmem:[%s3864_s12 + $0x38] sm:$0xff] }
 0x5bb   :  { %v1436_v31 = vld [vmem:[#allocation2 + $0x348] sm:$0xff]  ;;  %v1428_v13 = vmul.f32 %v3373_v53, %v1422_v56  ;;  %v1404_v20 = vadd.f32 %v1400_v23, %v1348_v11  ;;  %v1077_v11 = vmul.f32 %v3276_v0, %v1071_v10  ;;  %v1169_v23 = vld [vmem:[#allocation2 + $0xe0] sm:$0xff]  ;;  %1623 = vmatpush.msrb.mxu1 %v1607_v29 }
 0x5bc   :  { %v1450_v32 = vld [vmem:[#allocation2 + $0x368] sm:$0xff]  ;;  %v1442_v26 = vmul.f32 %v3375_v51, %v1436_v31  ;;  %v1418_v5 = vadd.f32 %v1414_v4, %v1362_v55  ;;  %v1155_v31 = vld [vmem:[#allocation2 + $0xc0] sm:$0xff]  ;;  %v1105_v4 = vmul.f32 %v3281_v61, %v1099_v63  ;;  %v1606_v61 = vld [vmem:[%s3864_s12 + $0x30] sm:$0xff] }
 0x5bd   :  { %v1464_v38 = vld [vmem:[#allocation2 + $0x388] sm:$0xff]  ;;  %v1456_v36 = vmul.f32 %v3379_v19, %v1450_v32  ;;  %v1432_v35 = vadd.f32 %v1428_v13, %v1376_v41  ;;  %v1119_v13 = vmul.f32 %v3283_v48, %v1113_v8  ;;  %v1161_v0 = vmul.f32 %v3289_v2, %v1155_v31  ;;  %v1281_v63 = vld [vmem:[#allocation2 + $0x1e0] sm:$0xff]  ;;  %1624 = vmatpush.msrb.mxu1 %v1606_v61 }
 0x5be   :  { %v1478_v45 = vld [vmem:[#allocation2 + $0x3a8] sm:$0xff]  ;;  %v1470_v6 = vmul.f32 %v3384_v44, %v1464_v38  ;;  %v1446_v12 = vadd.f32 %v1442_v26, %v1390_v24  ;;  %v1183_v38 = vld [vmem:[#allocation2 + $0x100] sm:$0xff]  ;;  %v1147_v26 = vmul.f32 %v3287_v30, %v1141_v15  ;;  %v1175_v48 = vmul.f32 %v3291_v21, %v1169_v23 }
 0x5bf   :  { %v1492_v22 = vld [vmem:[#allocation2 + $0x3c8] sm:$0xff]  ;;  %v1484_v42 = vmul.f32 %v3386_v50, %v1478_v45  ;;  %v1460_v56 = vadd.f32 %v1456_v36, %v1404_v20  ;;  %v1197_v45 = vld [vmem:[#allocation2 + $0x120] sm:$0xff]  ;;  %v1133_v20 = vmul.f32 %v3285_v40, %v1127_v49  ;;  %v1189_v18 = vmul.f32 %v3301_v33, %v1183_v38 }
 0x5c0   :  { %v1506_v7 = vld [vmem:[#allocation2 + $0x3e8] sm:$0xff]  ;;  %v1498_v1 = vmul.f32 %v3389_v9, %v1492_v22  ;;  %v1474_v32 = vadd.f32 %v1470_v6, %v1418_v5  ;;  %v1211_v22 = vld [vmem:[#allocation2 + $0x140] sm:$0xff]  ;;  %v1203_v40 = vmul.f32 %v3306_v46, %v1197_v45  ;;  %v1151_v2 = vadd.f32 %v1147_v26, %v1091_v3 }
 0x5c1   :  { %v1512_v28 = vmul.f32 %v3394_v43, %v1506_v7  ;;  %v1488_v52 = vadd.f32 %v1484_v42, %v1432_v35  ;;  %v1225_v7 = vld [vmem:[#allocation2 + $0x160] sm:$0xff]  ;;  %v1137_v30 = vadd.f32 %v1133_v20, %v1077_v11  ;;  %v1165_v35 = vadd.f32 %v1161_v0, %v1105_v4  ;;  %v1605_v46 = vld [vmem:[%s3864_s12 + $0x28] sm:$0xff] }
 0x5c2   :  { %v1502_v55 = vadd.f32 %v1498_v1, %v1446_v12  ;;  %v1239_v36 = vld [vmem:[#allocation2 + $0x180] sm:$0xff]  ;;  %v1217_v6 = vmul.f32 %v3313_v54, %v1211_v22  ;;  %v1231_v1 = vmul.f32 %v3315_v37, %v1225_v7  ;;  %v1207_v15 = vadd.f32 %v1203_v40, %v1151_v2  ;;  %1625 = vmatpush.msrb.mxu1 %v1605_v46 }
 0x5c3   :  { %v1516_v41 = vadd.f32 %v1512_v28, %v1460_v56  ;;  %v1520_v24 = vadd.f32 %v1488_v52, %v1474_v32  ;;  %v1253_v5 = vld [vmem:[#allocation2 + $0x1a0] sm:$0xff]  ;;  %v1179_v56 = vadd.f32 %v1175_v48, %v1119_v13  ;;  %v1245_v21 = vmul.f32 %v3320_v47, %v1239_v36 }
 0x5c4   :  { %v1267_v42 = vld [vmem:[#allocation2 + $0x1c0] sm:$0xff]  ;;  %v1193_v49 = vadd.f32 %v1189_v18, %v1137_v30  ;;  %v1221_v31 = vadd.f32 %v1217_v6, %v1165_v35  ;;  %v1259_v54 = vmul.f32 %v3324_v58, %v1253_v5  ;;  %v1287_v47 = vmul.f32 %v3329_v14, %v1281_v63 }
 0x5c5   :  { %v1524_v10 = vadd.f32 %v1516_v41, %v1502_v55  ;;  %v1295_v8 = vld [vmem:[#allocation2 + $0x200] sm:$0xff]  ;;  %v1235_v11 = vadd.f32 %v1231_v1, %v1179_v56  ;;  %v1273_v37 = vmul.f32 %v3326_v59, %v1267_v42 }
 0x5c6   :  { %v1309_v28 = vld [vmem:[#allocation2 + $0x220] sm:$0xff]  ;;  %v1301_v3 = vmul.f32 %v3336_v27, %v1295_v8  ;;  %v1249_v55 = vadd.f32 %v1245_v21, %v1193_v49  ;;  %v1263_v41 = vadd.f32 %v1259_v54, %v1207_v15  ;;  %v1655_v15 = vld [vmem:[%s3866_s14 + $0x8] sm:$0xff] }
 0x5c7   :  { %v1528_v12 = vadd.f32 %v1524_v10, %v1520_v24  ;;  %v1323_v33 = vld [vmem:[#allocation2 + $0x240] sm:$0xff]  ;;  %v1315_v58 = vmul.f32 %v3341_v16, %v1309_v28  ;;  %v1277_v59 = vadd.f32 %v1273_v37, %v1221_v31  ;;  %v1291_v7 = vadd.f32 %v1287_v47, %v1235_v11  ;;  %v1601_v31 = vld [vmem:[%s3864_s12 + $0x8] sm:$0xff]  ;;  %v1687_v11 = vld [vmem:[%s3867_s15 + $0x10] sm:$0xff] }
 0x5c8   :  { %v1337_v32 = vld [vmem:[#allocation2 + $0x260] sm:$0xff]  ;;  %v1329_v4 = vmul.f32 %v3345_v39, %v1323_v33  ;;  %v1305_v26 = vadd.f32 %v1301_v3, %v1249_v55  ;;  %v1686_v37 = vld [vmem:[%s3867_s15 + $0x8] sm:$0xff] }
 0x5c9   :  { %v1351_v52 = vld [vmem:[#allocation2 + $0x280] sm:$0xff]  ;;  %2522 = vmatpush.xpose.msk.msrb.mxu0 %vm67_vm1, %v1528_v12  ;;  %v1343_v14 = vmul.f32 %v3347_v34, %v1337_v32  ;;  %v1319_v0 = vadd.f32 %v1315_v58, %v1263_v41  ;;  %v3912_v58 = vld [vmem:[#allocation15_spill] sm:$0xff] }
 0x5ca   :  { %v1365_v23 = vld [vmem:[#allocation2 + $0x2a0] sm:$0xff]  ;;  %v1357_v27 = vmul.f32 %v3350_v17, %v1351_v52  ;;  %v1333_v39 = vadd.f32 %v1329_v4, %v1277_v59  ;;  %v1688_v52 = vld [vmem:[%s3867_s15 + $0x18] sm:$0xff] }
 0x5cb   :  { %v1379_v38 = vld [vmem:[#allocation2 + $0x2c0] sm:$0xff]  ;;  %v1371_v36 = vmul.f32 %v3356_v57, %v1365_v23  ;;  %v1347_v61 = vadd.f32 %v1343_v14, %v1291_v7  ;;  %v1555_v23 = vpop.f32.mrf.mxu3 }
 0x5cc   :  { %v1604_v45 = vld [vmem:[%s3864_s12 + $0x20] sm:$0xff]  ;;  %v1385_v29 = vmul.f32 %v3358_v62, %v1379_v38  ;;  %v1361_v40 = vadd.f32 %v1357_v27, %v1305_v26 }
 0x5cd   :  { %v1393_v13 = vld [vmem:[#allocation2 + $0x2e0] sm:$0xff]  ;;  %1626 = vmatpush.msrb.mxu1 %v1604_v45  ;;  %v1375_v17 = vadd.f32 %v1371_v36, %v1319_v0 }
 0x5ce   :  { %v1407_v22 = vld [vmem:[#allocation2 + $0x300] sm:$0xff]  ;;  %v1399_v10 = vmul.f32 %v3362_v25, %v1393_v13  ;;  %v1389_v35 = vadd.f32 %v1385_v29, %v1333_v39  ;;  %v3913_v13 = vld [vmem:[#allocation7_spill] sm:$0xff] }
 0x5cf   :  { %v1421_v24 = vld [vmem:[#allocation2 + $0x320] sm:$0xff]  ;;  %v1413_v48 = vmul.f32 %v3369_v60, %v1407_v22 }
 0x5d0   :  { %v1435_v20 = vld [vmem:[#allocation2 + $0x340] sm:$0xff]  ;;  %v1427_v5 = vmul.f32 %v3373_v53, %v1421_v24  ;;  %v1403_v62 = vadd.f32 %v1399_v10, %v1347_v61 }
 0x5d1   :  { %v1449_v16 = vld [vmem:[#allocation2 + $0x360] sm:$0xff]  ;;  %v1441_v30 = vmul.f32 %v3375_v51, %v1435_v20  ;;  %v1417_v42 = vadd.f32 %v1413_v48, %v1361_v40 }
 0x5d2   :  { %v1463_v18 = vld [vmem:[#allocation2 + $0x380] sm:$0xff]  ;;  %v1455_v6 = vmul.f32 %v3379_v19, %v1449_v16  ;;  %v1431_v63 = vadd.f32 %v1427_v5, %v1375_v17 }
 0x5d3   :  { %v1477_v34 = vld [vmem:[#allocation2 + $0x3a0] sm:$0xff]  ;;  %v1469_v25 = vmul.f32 %v3384_v44, %v1463_v18  ;;  %v1445_v8 = vadd.f32 %v1441_v30, %v1389_v35  ;;  %v1603_v44 = vld [vmem:[%s3864_s12 + $0x18] sm:$0xff] }
 0x5d4   :  { %v1491_v2 = vld [vmem:[#allocation2 + $0x3c0] sm:$0xff]  ;;  %v1483_v60 = vmul.f32 %v3386_v50, %v1477_v34  ;;  %v1459_v12 = vadd.f32 %v1455_v6, %v1403_v62  ;;  %v1657_v50 = vld [vmem:[%s3866_s14 + $0x18] sm:$0xff]  ;;  %1627 = vmatpush.msrb.mxu1 %v1603_v44 }
 0x5d5   :  { %v1505_v57 = vld [vmem:[#allocation2 + $0x3e0] sm:$0xff]  ;;  %v1497_v56 = vmul.f32 %v3389_v9, %v1491_v2  ;;  %v1473_v1 = vadd.f32 %v1469_v25, %v1417_v42  ;;  %v1656_v9 = vld [vmem:[%s3866_s14 + $0x10] sm:$0xff]  ;;  %1677 = vmatpush.msra.mxu3 %v1657_v50  ;;  %v1809_v50 = vld [vmem:[#allocation2 + $0x18] sm:$0xff] }
 0x5d6   :  { %v1511_v53 = vmul.f32 %v3394_v43, %v1505_v57  ;;  %v1487_v51 = vadd.f32 %v1483_v60, %v1431_v63  ;;  %v1531_v19 = vld [vmem:[%s3861_s9] sm:$0xff]  ;;  %v1602_v43 = vld [vmem:[%s3864_s12 + $0x10] sm:$0xff] }
 0x5d7   :  { %v1501_v21 = vadd.f32 %v1497_v56, %v1445_v8  ;;  %1678 = vmatpush.msra.mxu3 %v1656_v9  ;;  %1628 = vmatpush.msrb.mxu1 %v1602_v43  ;;  %v1654_v54 = vld [vmem:[%s3866_s14] sm:$0xff]  ;;  %v2269_v56 = vld [vmem:[%s3862_s10 + $0x10] sm:$0xff]  ;;  %v1865_v43 = vld [vmem:[#allocation2 + $0x98] sm:$0xff] }
 0x5d8   :  { %v1515_v28 = vadd.f32 %v1511_v53, %v1459_v12  ;;  %v1519_v33 = vadd.f32 %v1487_v51, %v1473_v1  ;;  %v1600_v32 = vld [vmem:[%s3864_s12] sm:$0xff]  ;;  %v2270_v12 = vld [vmem:[%s3862_s10 + $0x18] sm:$0xff]  ;;  %v2268_v53 = vld [vmem:[%s3862_s10 + $0x8] sm:$0xff] }
 0x5d9   :  { %1679 = vmatpush.msra.mxu3 %v1655_v15  ;;  %1629 = vmatpush.msrb.mxu1 %v1601_v31  ;;  %v1685_v47 = vld [vmem:[%s3867_s15] sm:$0xff]  ;;  %v1823_v15 = vld [vmem:[#allocation2 + $0x38] sm:$0xff] }
 0x5da   :  { %v1523_v46 = vadd.f32 %v1515_v28, %v1501_v21  ;;  %v2636_v3 = vld [vmem:[%s3863_s11] ss:$0 sm:$0xff]  ;;  %v1837_v31 = vld [vmem:[#allocation2 + $0x58] sm:$0xff] }
 0x5db   :  { %1680 = vmatpush.msra.mxu3 %v1654_v54  ;;  %1630 = vmatpush.msrb.mxu1 %v1600_v32  ;;  %v2637_v22 = vld [vmem:[%s3865_s13] ss:$0 sm:$0xff]  ;;  %v1879_v32 = vld [vmem:[#allocation2 + $0xb8] sm:$0xff] }
 0x5dc   :  { %v1527_v49 = vadd.f32 %v1523_v46, %v1519_v33  ;;  %v2639_v61 = vld [vmem:[%s3869_s17] ss:$0 sm:$0xff] }
 0x5dd   :  { %1705 = vmatpush.msrb.mxu3 %v1688_v52  ;;  %v2638_v48 = vld [vmem:[%s3868_s16] ss:$0 sm:$0xff]  ;;  %v1893_v52 = vld [vmem:[#allocation2 + $0xd8] sm:$0xff] }
 0x5de   :  { %2523 = vmatpush.xpose.msk.msrb.mxu0 %vm67_vm1, %v1527_v49  ;;  %v1760_v60 = vld [vmem:[%s3860_s8] sm:$0xff] }
 0x5df   :  { %1706 = vmatpush.msrb.mxu3 %v1687_v11  ;;  %v2267_v1 = vld [vmem:[%s3862_s10] sm:$0xff] }
 0x5e1   :  { %2524 = vmatmul.msk.f32.vlgmr.msrb.gmra.mxu0 %vm67_vm1, %v1531_v19  ;;  %1707 = vmatpush.msrb.mxu3 %v1686_v37 }
 0x5e2   :  { %1788 = vmatpush.msra.mxu0 %v1760_v60  ;;  %v1822_v60 = vld [vmem:[#allocation2 + $0x30] sm:$0xff] }
 0x5e3   :  { %1708 = vmatpush.msrb.mxu3 %v1685_v47 }
 0x5e4   :  { %2285 = vmatpush.msrb.mxu0 %v2270_v12 }
 0x5e6   :  { %2286 = vmatpush.msrb.mxu0 %v2269_v56 }
 0x5e8   :  { %2287 = vmatpush.msrb.mxu0 %v2268_v53 }
 0x5ea   :  { %2288 = vmatpush.msrb.mxu0 %v2267_v1  ;;  %v2047_v1 = vld [vmem:[#allocation2 + $0x238] sm:$0xff] }
 0x65e   :  { %v1590_v38 = vpop.f32.mrf.mxu0 }
 0x65f   :  { %v1591_v45 = vadd.f32 %v1590_v38, %v1555_v23  ;;  %v1851_v23 = vld [vmem:[#allocation2 + $0x78] sm:$0xff] }
 0x660   :  { %v1907_v38 = vld [vmem:[#allocation2 + $0xf8] sm:$0xff] }
 0x661   :  { %v1597_v55 = vadd.f32 %v2636_v3, %v1591_v45  ;;  %v1921_v45 = vld [vmem:[#allocation2 + $0x118] sm:$0xff] }
 0x663   :  { %v1598_v41 = vmax.f32 %v1597_v55, 0.0 }
 0x665   :  { %v1599_v4 = vsel %vm168_vm2, %v1598_v41, %v3912_v58  ;;  %2527 = vmatmul.msk.f32.vlgmr.msra.gmra.mxu3 %vm168_vm2, %v1598_v41 }
 0x666   :  { %2525 = vmatmul.msk.f32.vlgmr.msrb.gmra.mxu1 %vm876_vm3, %v1599_v4  ;;  %v1949_v4 = vld [vmem:[#allocation2 + $0x158] sm:$0xff] }
 0x66d   :  { %2528 = vmatmul.msk.f32.vlgmr.msrb.gmra.mxu3 %vm168_vm2, %v3913_v13  ;;  %v1963_v13 = vld [vmem:[#allocation2 + $0x178] sm:$0xff] }
 0x6e3   :  { %v1632_v59 = vpop.f32.mrf.mxu1 }
 0x6e4   :  { %v1633_v7 = vadd.f32 %v2637_v22, %v1632_v59 }
 0x6e6   :  { %v2526_v14 = vmul.f32 -1.442695, %v1633_v7 }
 0x6e8   :  { %2682 = vpow2.f32 %v2526_v14  ;;  %v1682_v20 = vpop.f32.mrf.mxu3 }
 0x6e9   :  { %v1683_v30 = vadd.f32 %v2638_v48, %v1682_v20  ;;  %v2005_v48 = vld [vmem:[#allocation2 + $0x1d8] sm:$0xff] }
 0x6ee   :  { %v2683_v27 = vpop.eup %2682 }
 0x6ef   :  { %v1638_v24 = vadd.f32 1.0, %v2683_v27 }
 0x6f0   :  { %v1710_v10 = vpop.f32.mrf.mxu3 }
 0x6f1   :  { %2684 = vrcp.f32 %v1638_v24  ;;  %v1650_v29 = vand.u32 2147483648, %v1638_v24  ;;  %v1648_v39 = vand.u32 2147483647, %v1638_v24  ;;  %vm1644_vm9 = vweird.f32 %v1638_v24 }
 0x6f2   :  { %v1711_v17 = vadd.f32 %v2639_v61, %v1710_v10  ;;  %v1977_v61 = vld [vmem:[#allocation2 + $0x198] sm:$0xff] }
 0x6f3   :  { %v1651_v34 = vor.u32 1.1754944e-38, %v1650_v29  ;;  %vm1649_vm11 = vcmp.eq.f32.partialorder %v1648_v39, 8.507059e+37  ;;  %v1991_v10 = vld [vmem:[#allocation2 + $0x1b8] sm:$0xff] }
 0x6f7   :  { %v2685_v26 = vpop.eup %2684 }
 0x6f8   :  { %v1640_v0 = vmul.f32 %v2685_v26, %v1638_v24  ;;  %vm1645_vm8 = vweird.f32 %v2685_v26 }
 0x6f9   :  { %vm1646_vm10 = vmor %vm1644_vm9, %vm1645_vm8 }
 0x6fa   :  { %v1641_v36 = vsub.f32 1.0, %v1640_v0 }
 0x6fc   :  { %v1642_v16 = vmul.f32 %v2685_v26, %v1641_v36  ;;  %v1808_v36 = vld [vmem:[#allocation2 + $0x10] sm:$0xff] }
 0x6fe   :  { %v1643_v18 = vadd.f32 %v2685_v26, %v1642_v16 }
 0x700   :  { %v1647_v40 = vsel %vm1646_vm10, %v2685_v26, %v1643_v18 }
 0x701   :  { %v1652_v5 = vsel %vm1649_vm11, %v1651_v34, %v1647_v40 }
 0x702   :  { %v1713_v2 = vmul.f32 %v1711_v17, %v1652_v5  ;;  %v1716_v62 = vsub.f32 1.0, %v1652_v5  ;;  %v1722_v42 = vmul.f32 %v1652_v5, %v3912_v58  ;;  %v1935_v58 = vld [vmem:[#allocation2 + $0x138] sm:$0xff] }
 0x703   :  { %v2019_v17 = vld [vmem:[#allocation2 + $0x1f8] sm:$0xff] }
 0x704   :  { %v1714_v57 = vadd.f32 %v1713_v2, %v1683_v30 }
 0x706   :  { %2686 = vtanh.f32 %v1714_v57 }
 0x70c   :  { %v2687_v35 = vpop.eup %2686 }
 0x70d   :  { %1718 = vrot.lane.b32.xlu2 %v2687_v35, %s2729_s6 }
 0x767   :  { %v1719_v6 = vpop.permute.xlu2 %1718 }
 0x768   :  { %v1721_v63 = vmul.f32 %v1719_v6, %v1716_v62 }
 0x76a   :  { %v3547_v25 = vadd.f32 %v1722_v42, %v1721_v63  ;;  %v2033_v63 = vld [vmem:[#allocation2 + $0x218] sm:$0xff] }
 0x76c   :  { %3914 = vst [vmem:[#allocation8_spill] sm:$0xff] %v3547_v25  ;;  %1725 = vrot.lane.b32.xlu1 %v3547_v25, %s2730_s19  ;;  %v2046_v25 = vld [vmem:[#allocation2 + $0x230] sm:$0xff] }
 0x7de   :  { %v3554_v8 = vpop.permute.xlu1 %1725 }
 0x7df   :  { %3915 = vst [vmem:[#allocation9_spill] sm:$0xff] %v3554_v8  ;;  %1728 = vxpose.xlu1.b32.start.end [1/1] (short) (narrow) %v3554_v8, 32 }
 0x883   :  { %v1744_v51 = vpop.trf.xlu1 }
 0x884   :  { %2529 = vmatmul.msk.f32.vlgmr.msra.gmra.mxu0 %vm99_vm0, %v1744_v51 }
 0x88b   :  { %v1745_v21 = vpop.trf.xlu1 }
 0x88c   :  { %2530 = vmatmul.msk.f32.gmra.mxu0 %vm99_vm0, %v1745_v21  ;;  %v1836_v21 = vld [vmem:[#allocation2 + $0x50] sm:$0xff] }
 0x893   :  { %v1746_v28 = vpop.trf.xlu1 }
 0x894   :  { %2531 = vmatmul.msk.f32.gmra.mxu0 %vm99_vm0, %v1746_v28  ;;  %v1850_v28 = vld [vmem:[#allocation2 + $0x70] sm:$0xff] }
 0x89b   :  { %v1747_v33 = vpop.trf.xlu1 }
 0x89c   :  { %2532 = vmatmul.msk.f32.gmra.mxu0 %vm99_vm0, %v1747_v33  ;;  %v1864_v33 = vld [vmem:[#allocation2 + $0x90] sm:$0xff] }
 0x8a4   :  { %2533 = vmatmul.msk.f32.vlgmr.msrb.gmra.mxu0 %vm168_vm2, %v3554_v8 }
 0x901   :  { %v1790_v46 = vpop.f32.mrf.mxu0 }
 0x902   :  { %1802 = vst.msk [vmem:[#allocation3] sm:$0xff] %vm67_vm1, %v1790_v46 }
 0x909   :  { %v1793_v49 = vpop.f32.mrf.mxu0  ;;  %v3577_v19 = vld [vmem:[#allocation3] ss:$0 sm:$0xff]  ;;  %v3579_v44 = vld [vmem:[#allocation3 + $0x1] ss:$0 sm:$0xff]  ;;  %v3581_v9 = vld [vmem:[#allocation3 + $0x2] ss:$0 sm:$0xff] }
 0x90a   :  { %1803 = vst.msk [vmem:[#allocation3 + $0x8] sm:$0xff] %vm67_vm1, %v1793_v49  ;;  %v3583_v54 = vld [vmem:[#allocation3 + $0x4] ss:$0 sm:$0xff]  ;;  %v3585_v11 = vld [vmem:[#allocation3 + $0x5] ss:$0 sm:$0xff]  ;;  %v1815_v55 = vmul.f32 %v3577_v19, %v1809_v50  ;;  %v1829_v59 = vmul.f32 %v3579_v44, %v1823_v15  ;;  %v1843_v7 = vmul.f32 %v3581_v9, %v1837_v31  ;;  %v1814_v51 = vmul.f32 %v3577_v19, %v1808_v36  ;;  %v2061_v15 = vld [vmem:[#allocation2 + $0x258] sm:$0xff] }
 0x90b   :  { %v3587_v37 = vld [vmem:[#allocation3 + $0x6] ss:$0 sm:$0xff]  ;;  %v3589_v47 = vld [vmem:[#allocation3 + $0x3] ss:$0 sm:$0xff]  ;;  %v3591_v3 = vld [vmem:[#allocation3 + $0x7] ss:$0 sm:$0xff]  ;;  %v1871_v41 = vmul.f32 %v3583_v54, %v1865_v43  ;;  %v1885_v14 = vmul.f32 %v3585_v11, %v1879_v32 }
 0x90c   :  { %v1899_v27 = vmul.f32 %v3587_v37, %v1893_v52  ;;  %v1857_v20 = vmul.f32 %v3589_v47, %v1851_v23  ;;  %v1913_v26 = vmul.f32 %v3591_v3, %v1907_v38  ;;  %v2075_v31 = vld [vmem:[#allocation2 + $0x278] sm:$0xff]  ;;  %v1878_v32 = vld [vmem:[#allocation2 + $0xb0] sm:$0xff] }
 0x90d   :  { %v1875_v18 = vadd.f32 %v1871_v41, %v1815_v55  ;;  %v1889_v5 = vadd.f32 %v1885_v14, %v1829_v59  ;;  %v1892_v52 = vld [vmem:[#allocation2 + $0xd0] sm:$0xff]  ;;  %v2089_v41 = vld [vmem:[#allocation2 + $0x298] sm:$0xff]  ;;  %v1856_v14 = vmul.f32 %v3589_v47, %v1850_v28 }
 0x90e   :  { %v1903_v30 = vadd.f32 %v1899_v27, %v1843_v7  ;;  %v1917_v6 = vadd.f32 %v1913_v26, %v1857_v20  ;;  %v1906_v23 = vld [vmem:[#allocation2 + $0xf0] sm:$0xff]  ;;  %v2103_v59 = vld [vmem:[#allocation2 + $0x2b8] sm:$0xff]  ;;  %v1884_v27 = vmul.f32 %v3585_v11, %v1878_v32  ;;  %v1898_v20 = vmul.f32 %v3587_v37, %v1892_v52 }
 0x90f   :  { %v2117_v7 = vld [vmem:[#allocation2 + $0x2d8] sm:$0xff]  ;;  %v1912_v26 = vmul.f32 %v3591_v3, %v1906_v23  ;;  %v1920_v36 = vld [vmem:[#allocation2 + $0x110] sm:$0xff] }
 0x910   :  { %v2159_v52 = vld [vmem:[#allocation2 + $0x338] sm:$0xff] }
 0x911   :  { %v1796_v22 = vpop.f32.mrf.mxu0  ;;  %v3599_v24 = vld [vmem:[#allocation3 + $0x8] ss:$0 sm:$0xff]  ;;  %v3604_v0 = vld [vmem:[#allocation3 + $0x9] ss:$0 sm:$0xff]  ;;  %v3607_v16 = vld [vmem:[#allocation3 + $0xa] ss:$0 sm:$0xff] }
 0x912   :  { %1804 = vst.msk [vmem:[#allocation3 + $0x10] sm:$0xff] %vm67_vm1, %v1796_v22  ;;  %v1927_v29 = vmul.f32 %v3599_v24, %v1921_v45  ;;  %v3609_v39 = vld [vmem:[#allocation3 + $0xb] ss:$0 sm:$0xff]  ;;  %v1941_v34 = vmul.f32 %v3604_v0, %v1935_v58  ;;  %v3612_v40 = vld [vmem:[#allocation3 + $0xc] ss:$0 sm:$0xff]  ;;  %v1955_v2 = vmul.f32 %v3607_v16, %v1949_v4  ;;  %v1828_v58 = vmul.f32 %v3579_v44, %v1822_v60  ;;  %v2173_v23 = vld [vmem:[#allocation2 + $0x358] sm:$0xff] }
 0x913   :  { %v1969_v57 = vmul.f32 %v3609_v39, %v1963_v13  ;;  %v3616_v35 = vld [vmem:[#allocation3 + $0xd] ss:$0 sm:$0xff]  ;;  %v3618_v62 = vld [vmem:[#allocation3 + $0xe] ss:$0 sm:$0xff]  ;;  %v3620_v42 = vld [vmem:[#allocation3 + $0xf] ss:$0 sm:$0xff]  ;;  %v1983_v49 = vmul.f32 %v3612_v40, %v1977_v61  ;;  %v1842_v4 = vmul.f32 %v3581_v9, %v1836_v21  ;;  %v1870_v13 = vmul.f32 %v3583_v54, %v1864_v33 }
 0x914   :  { %v1931_v12 = vadd.f32 %v1927_v29, %v1875_v18  ;;  %v1945_v56 = vadd.f32 %v1941_v34, %v1889_v5  ;;  %v1959_v53 = vadd.f32 %v1955_v2, %v1903_v30  ;;  %v1997_v50 = vmul.f32 %v3616_v35, %v1991_v10  ;;  %v2131_v2 = vld [vmem:[#allocation2 + $0x2f8] sm:$0xff] }
 0x915   :  { %v1973_v46 = vadd.f32 %v1969_v57, %v1917_v6  ;;  %v2011_v43 = vmul.f32 %v3618_v62, %v2005_v48  ;;  %v2025_v45 = vmul.f32 %v3620_v42, %v2019_v17  ;;  %v1874_v57 = vadd.f32 %v1870_v13, %v1814_v51 }
 0x916   :  { %v1987_v29 = vadd.f32 %v1983_v49, %v1931_v12  ;;  %v2001_v61 = vadd.f32 %v1997_v50, %v1945_v56  ;;  %v1926_v6 = vmul.f32 %v3599_v24, %v1920_v36  ;;  %v1888_v21 = vadd.f32 %v1884_v27, %v1828_v58  ;;  %v1934_v50 = vld [vmem:[#allocation2 + $0x130] sm:$0xff]  ;;  %v2187_v27 = vld [vmem:[#allocation2 + $0x378] sm:$0xff] }
 0x917   :  { %v2015_v10 = vadd.f32 %v2011_v43, %v1959_v53  ;;  %v2029_v17 = vadd.f32 %v2025_v45, %v1973_v46  ;;  %v2145_v46 = vld [vmem:[#allocation2 + $0x318] sm:$0xff]  ;;  %v1902_v49 = vadd.f32 %v1898_v20, %v1842_v4  ;;  %v1916_v51 = vadd.f32 %v1912_v26, %v1856_v14  ;;  %v1962_v45 = vld [vmem:[#allocation2 + $0x170] sm:$0xff] }
 0x918   :  { %v1976_v58 = vld [vmem:[#allocation2 + $0x190] sm:$0xff]  ;;  %v1940_v36 = vmul.f32 %v3604_v0, %v1934_v50 }
 0x919   :  { %v1799_v38 = vpop.f32.mrf.mxu0  ;;  %v3627_v55 = vld [vmem:[#allocation3 + $0x10] ss:$0 sm:$0xff]  ;;  %v3633_v22 = vld [vmem:[#allocation3 + $0x11] ss:$0 sm:$0xff]  ;;  %v3640_v18 = vld [vmem:[#allocation3 + $0x12] ss:$0 sm:$0xff] }
 0x91a   :  { %1805 = vst.msk [vmem:[#allocation3 + $0x18] sm:$0xff] %vm67_vm1, %v1799_v38  ;;  %v2039_v48 = vmul.f32 %v3627_v55, %v2033_v63  ;;  %v3642_v34 = vld [vmem:[#allocation3 + $0x13] ss:$0 sm:$0xff]  ;;  %v2053_v5 = vmul.f32 %v3633_v22, %v2047_v1  ;;  %v3645_v30 = vld [vmem:[#allocation3 + $0x14] ss:$0 sm:$0xff]  ;;  %v2067_v12 = vmul.f32 %v3640_v18, %v2061_v15 }
 0x91b   :  { %v2081_v56 = vmul.f32 %v3642_v34, %v2075_v31  ;;  %v3650_v53 = vld [vmem:[#allocation3 + $0x15] ss:$0 sm:$0xff]  ;;  %v3652_v63 = vld [vmem:[#allocation3 + $0x16] ss:$0 sm:$0xff]  ;;  %v2095_v33 = vmul.f32 %v3645_v30, %v2089_v41  ;;  %v3655_v1 = vld [vmem:[#allocation3 + $0x17] ss:$0 sm:$0xff]  ;;  %v1930_v41 = vadd.f32 %v1926_v6, %v1874_v57 }
 0x91c   :  { %v2043_v60 = vadd.f32 %v2039_v48, %v1987_v29  ;;  %v2057_v28 = vadd.f32 %v2053_v5, %v2001_v61  ;;  %v2071_v43 = vadd.f32 %v2067_v12, %v2015_v10  ;;  %v2109_v15 = vmul.f32 %v3650_v53, %v2103_v59  ;;  %v1948_v38 = vld [vmem:[#allocation2 + $0x150] sm:$0xff]  ;;  %v2201_v10 = vld [vmem:[#allocation2 + $0x398] sm:$0xff] }
 0x91d   :  { %v2085_v32 = vadd.f32 %v2081_v56, %v2029_v17  ;;  %v2123_v31 = vmul.f32 %v3652_v63, %v2117_v7  ;;  %v1954_v4 = vmul.f32 %v3607_v16, %v1948_v38  ;;  %v1990_v14 = vld [vmem:[#allocation2 + $0x1b0] sm:$0xff]  ;;  %v2137_v59 = vmul.f32 %v3655_v1, %v2131_v2  ;;  %v2215_v48 = vld [vmem:[#allocation2 + $0x3b8] sm:$0xff] }
 0x91e   :  { %v2099_v13 = vadd.f32 %v2095_v33, %v2043_v60  ;;  %v2004_v20 = vld [vmem:[#allocation2 + $0x1d0] sm:$0xff]  ;;  %v2113_v29 = vadd.f32 %v2109_v15, %v2057_v28  ;;  %v1968_v17 = vmul.f32 %v3609_v39, %v1962_v45  ;;  %v2229_v6 = vld [vmem:[#allocation2 + $0x3d8] sm:$0xff]  ;;  %v1944_v60 = vadd.f32 %v1940_v36, %v1888_v21 }
 0x91f   :  { %v2018_v26 = vld [vmem:[#allocation2 + $0x1f0] sm:$0xff]  ;;  %v2127_v61 = vadd.f32 %v2123_v31, %v2071_v43  ;;  %v1958_v12 = vadd.f32 %v1954_v4, %v1902_v49  ;;  %v1982_v56 = vmul.f32 %v3612_v40, %v1976_v58  ;;  %v1996_v28 = vmul.f32 %v3616_v35, %v1990_v14  ;;  %v2243_v43 = vld [vmem:[#allocation2 + $0x3f8] sm:$0xff] }
 0x920   :  { %v2141_v33 = vadd.f32 %v2137_v59, %v2085_v32  ;;  %v1972_v15 = vadd.f32 %v1968_v17, %v1916_v51  ;;  %v2010_v31 = vmul.f32 %v3618_v62, %v2004_v20  ;;  %v2024_v51 = vmul.f32 %v3620_v42, %v2018_v26  ;;  %v2032_v17 = vld [vmem:[#allocation2 + $0x210] sm:$0xff] }
 0x921   :  { %v3662_v7 = vld [vmem:[#allocation3 + $0x18] ss:$0 sm:$0xff]  ;;  %v3665_v5 = vld [vmem:[#allocation3 + $0x19] ss:$0 sm:$0xff]  ;;  %v3667_v57 = vld [vmem:[#allocation3 + $0x1a] ss:$0 sm:$0xff]  ;;  %v1986_v49 = vadd.f32 %v1982_v56, %v1930_v41  ;;  %v2000_v58 = vadd.f32 %v1996_v28, %v1944_v60 }
 0x922   :  { %v2151_v2 = vmul.f32 %v3662_v7, %v2145_v46  ;;  %v3672_v50 = vld [vmem:[#allocation3 + $0x1b] ss:$0 sm:$0xff]  ;;  %v2165_v38 = vmul.f32 %v3665_v5, %v2159_v52  ;;  %v2179_v45 = vmul.f32 %v3667_v57, %v2173_v23  ;;  %v3677_v8 = vld [vmem:[#allocation3 + $0x1c] ss:$0 sm:$0xff]  ;;  %v3679_v21 = vld [vmem:[#allocation3 + $0x1d] ss:$0 sm:$0xff]  ;;  %v2014_v4 = vadd.f32 %v2010_v31, %v1958_v12 }
 0x923   :  { %v2193_v32 = vmul.f32 %v3672_v50, %v2187_v27  ;;  %v3682_v46 = vld [vmem:[#allocation3 + $0x1e] ss:$0 sm:$0xff]  ;;  %v2207_v52 = vmul.f32 %v3677_v8, %v2201_v10  ;;  %v2221_v23 = vmul.f32 %v3679_v21, %v2215_v48  ;;  %v3687_v59 = vld [vmem:[#allocation3 + $0x1f] ss:$0 sm:$0xff]  ;;  %v2028_v60 = vadd.f32 %v2024_v51, %v1972_v15  ;;  %v2060_v56 = vld [vmem:[#allocation2 + $0x250] sm:$0xff] }
 0x924   :  { %v2155_v36 = vadd.f32 %v2151_v2, %v2099_v13  ;;  %v2169_v14 = vadd.f32 %v2165_v38, %v2113_v29  ;;  %v2183_v20 = vadd.f32 %v2179_v45, %v2127_v61  ;;  %v2235_v13 = vmul.f32 %v3682_v46, %v2229_v6  ;;  %v2074_v12 = vld [vmem:[#allocation2 + $0x270] sm:$0xff] }
 0x925   :  { %v2197_v41 = vadd.f32 %v2193_v32, %v2141_v33  ;;  %v2038_v27 = vmul.f32 %v3627_v55, %v2032_v17  ;;  %v2088_v28 = vld [vmem:[#allocation2 + $0x290] sm:$0xff]  ;;  %v2249_v61 = vmul.f32 %v3687_v59, %v2243_v43  ;;  %v2052_v10 = vmul.f32 %v3633_v22, %v2046_v25 }
 0x926   :  { %v2211_v26 = vadd.f32 %v2207_v52, %v2155_v36  ;;  %v2225_v29 = vadd.f32 %v2221_v23, %v2169_v14  ;;  %v2102_v48 = vld [vmem:[#allocation2 + $0x2b0] sm:$0xff]  ;;  %v2239_v31 = vadd.f32 %v2235_v13, %v2183_v20  ;;  %v2066_v33 = vmul.f32 %v3640_v18, %v2060_v56 }
 0x927   :  { %v2116_v2 = vld [vmem:[#allocation2 + $0x2d0] sm:$0xff]  ;;  %v2042_v38 = vadd.f32 %v2038_v27, %v1986_v49  ;;  %v2080_v6 = vmul.f32 %v3642_v34, %v2074_v12  ;;  %v2253_v32 = vadd.f32 %v2249_v61, %v2197_v41  ;;  %v2056_v17 = vadd.f32 %v2052_v10, %v2000_v58  ;;  %v1807_v10 = vld [vmem:[#allocation2 + $0x8] sm:$0xff] }
 0x928   :  { %v2130_v15 = vld [vmem:[#allocation2 + $0x2f0] sm:$0xff]  ;;  %v2257_v51 = vadd.f32 %v2225_v29, %v2211_v26  ;;  %v2094_v36 = vmul.f32 %v3645_v30, %v2088_v28  ;;  %v2070_v43 = vadd.f32 %v2066_v33, %v2014_v4  ;;  %v2108_v25 = vmul.f32 %v3650_v53, %v2102_v48 }
 0x929   :  { %v2144_v45 = vld [vmem:[#allocation2 + $0x310] sm:$0xff]  ;;  %v2084_v23 = vadd.f32 %v2080_v6, %v2028_v60  ;;  %v2122_v20 = vmul.f32 %v3652_v63, %v2116_v2  ;;  %v2261_v13 = vadd.f32 %v2253_v32, %v2239_v31  ;;  %v2136_v56 = vmul.f32 %v3655_v1, %v2130_v15  ;;  %v1835_v6 = vld [vmem:[#allocation2 + $0x48] sm:$0xff] }
 0x92a   :  { %v2158_v14 = vld [vmem:[#allocation2 + $0x330] sm:$0xff]  ;;  %v2098_v27 = vadd.f32 %v2094_v36, %v2042_v38  ;;  %v2150_v12 = vmul.f32 %v3662_v7, %v2144_v45  ;;  %v2112_v58 = vadd.f32 %v2108_v25, %v2056_v17  ;;  %v1821_v38 = vld [vmem:[#allocation2 + $0x28] sm:$0xff] }
 0x92b   :  { %v2172_v52 = vld [vmem:[#allocation2 + $0x350] sm:$0xff]  ;;  %v2126_v29 = vadd.f32 %v2122_v20, %v2070_v43  ;;  %v2164_v28 = vmul.f32 %v3665_v5, %v2158_v14  ;;  %v2265_v48 = vadd.f32 %v2261_v13, %v2257_v51  ;;  %v2140_v2 = vadd.f32 %v2136_v56, %v2084_v23  ;;  %v1849_v36 = vld [vmem:[#allocation2 + $0x68] sm:$0xff] }
 0x92c   :  { %v2186_v49 = vld [vmem:[#allocation2 + $0x370] sm:$0xff]  ;;  %v2178_v4 = vmul.f32 %v3667_v57, %v2172_v52  ;;  %v2154_v33 = vadd.f32 %v2150_v12, %v2098_v27  ;;  %v1863_v14 = vld [vmem:[#allocation2 + $0x88] sm:$0xff]  ;;  %v1813_v23 = vmul.f32 %v3577_v19, %v1807_v10  ;;  %v1827_v56 = vmul.f32 %v3579_v44, %v1821_v38 }
 0x92d   :  { %v2200_v41 = vld [vmem:[#allocation2 + $0x390] sm:$0xff]  ;;  %v2192_v31 = vmul.f32 %v3672_v50, %v2186_v49  ;;  %v2168_v15 = vadd.f32 %v2164_v28, %v2112_v58  ;;  %2534 = vmatpush.xpose.msk.msrb.mxu2 %vm67_vm1, %v2265_v48  ;;  %v1877_v25 = vld [vmem:[#allocation2 + $0xa8] sm:$0xff]  ;;  %v1841_v12 = vmul.f32 %v3581_v9, %v1835_v6  ;;  %v1855_v28 = vmul.f32 %v3589_v47, %v1849_v36 }
 0x92e   :  { %v2214_v26 = vld [vmem:[#allocation2 + $0x3b0] sm:$0xff]  ;;  %v2182_v45 = vadd.f32 %v2178_v4, %v2126_v29  ;;  %v2206_v32 = vmul.f32 %v3677_v8, %v2200_v41  ;;  %v1891_v20 = vld [vmem:[#allocation2 + $0xc8] sm:$0xff]  ;;  %v1869_v4 = vmul.f32 %v3583_v54, %v1863_v14  ;;  %v1883_v10 = vmul.f32 %v3585_v11, %v1877_v25 }
 0x92f   :  { %v2228_v60 = vld [vmem:[#allocation2 + $0x3d0] sm:$0xff]  ;;  %v2220_v17 = vmul.f32 %v3679_v21, %v2214_v26  ;;  %v2196_v52 = vadd.f32 %v2192_v31, %v2140_v2  ;;  %v1905_v49 = vld [vmem:[#allocation2 + $0xe8] sm:$0xff]  ;;  %v1897_v48 = vmul.f32 %v3587_v37, %v1891_v20 }
 0x930   :  { %v2242_v61 = vld [vmem:[#allocation2 + $0x3f0] sm:$0xff]  ;;  %v2234_v43 = vmul.f32 %v3682_v46, %v2228_v60  ;;  %v2210_v13 = vadd.f32 %v2206_v32, %v2154_v33  ;;  %v1919_v41 = vld [vmem:[#allocation2 + $0x108] sm:$0xff]  ;;  %v1911_v2 = vmul.f32 %v3591_v3, %v1905_v49  ;;  %v1873_v6 = vadd.f32 %v1869_v4, %v1813_v23 }
 0x931   :  { %v2248_v51 = vmul.f32 %v3687_v59, %v2242_v61  ;;  %v2224_v27 = vadd.f32 %v2220_v17, %v2168_v15  ;;  %v1933_v26 = vld [vmem:[#allocation2 + $0x128] sm:$0xff]  ;;  %v1925_v15 = vmul.f32 %v3599_v24, %v1919_v41  ;;  %v1887_v36 = vadd.f32 %v1883_v10, %v1827_v56 }
 0x932   :  { %v2238_v58 = vadd.f32 %v2234_v43, %v2182_v45  ;;  %v1947_v60 = vld [vmem:[#allocation2 + $0x148] sm:$0xff]  ;;  %v1939_v45 = vmul.f32 %v3604_v0, %v1933_v26  ;;  %v1901_v14 = vadd.f32 %v1897_v48, %v1841_v12 }
 0x933   :  { %v2252_v29 = vadd.f32 %v2248_v51, %v2196_v52  ;;  %v2256_v61 = vadd.f32 %v2224_v27, %v2210_v13  ;;  %v1961_v33 = vld [vmem:[#allocation2 + $0x168] sm:$0xff]  ;;  %v1915_v52 = vadd.f32 %v1911_v2, %v1855_v28  ;;  %v1953_v43 = vmul.f32 %v3607_v16, %v1947_v60 }
 0x934   :  { %v1975_v31 = vld [vmem:[#allocation2 + $0x188] sm:$0xff]  ;;  %v1929_v13 = vadd.f32 %v1925_v15, %v1873_v6  ;;  %v1967_v49 = vmul.f32 %v3609_v39, %v1961_v33  ;;  %v1943_v41 = vadd.f32 %v1939_v45, %v1887_v36 }
 0x935   :  { %v2260_v38 = vadd.f32 %v2252_v29, %v2238_v58  ;;  %v1989_v32 = vld [vmem:[#allocation2 + $0x1a8] sm:$0xff]  ;;  %v1981_v27 = vmul.f32 %v3612_v40, %v1975_v31  ;;  %v1957_v29 = vadd.f32 %v1953_v43, %v1901_v14 }
 0x936   :  { %v2003_v17 = vld [vmem:[#allocation2 + $0x1c8] sm:$0xff]  ;;  %v1995_v26 = vmul.f32 %v3616_v35, %v1989_v32  ;;  %v1971_v4 = vadd.f32 %v1967_v49, %v1915_v52 }
 0x937   :  { %v2017_v51 = vld [vmem:[#allocation2 + $0x1e8] sm:$0xff]  ;;  %v2264_v20 = vadd.f32 %v2260_v38, %v2256_v61  ;;  %v2009_v56 = vmul.f32 %v3618_v62, %v2003_v17  ;;  %v1985_v60 = vadd.f32 %v1981_v27, %v1929_v13 }
 0x938   :  { %v2031_v25 = vld [vmem:[#allocation2 + $0x208] sm:$0xff]  ;;  %v2023_v61 = vmul.f32 %v3620_v42, %v2017_v51  ;;  %v1999_v33 = vadd.f32 %v1995_v26, %v1943_v41 }
 0x939   :  { %v2045_v23 = vld [vmem:[#allocation2 + $0x228] sm:$0xff]  ;;  %2535 = vmatpush.xpose.msk.msrb.mxu2 %vm67_vm1, %v2264_v20  ;;  %v2037_v10 = vmul.f32 %v3627_v55, %v2031_v25  ;;  %v2013_v31 = vadd.f32 %v2009_v56, %v1957_v29 }
 0x93a   :  { %v2059_v58 = vld [vmem:[#allocation2 + $0x248] sm:$0xff]  ;;  %v2051_v38 = vmul.f32 %v3633_v22, %v2045_v23  ;;  %v2027_v32 = vadd.f32 %v2023_v61, %v1971_v4 }
 0x93b   :  { %v2073_v12 = vld [vmem:[#allocation2 + $0x268] sm:$0xff]  ;;  %v2065_v6 = vmul.f32 %v3640_v18, %v2059_v58  ;;  %v2041_v17 = vadd.f32 %v2037_v10, %v1985_v60  ;;  %v1806_v10 = vld [vmem:[#allocation2] sm:$0xff] }
 0x93c   :  { %v2087_v28 = vld [vmem:[#allocation2 + $0x288] sm:$0xff]  ;;  %v2079_v36 = vmul.f32 %v3642_v34, %v2073_v12  ;;  %v2055_v51 = vadd.f32 %v2051_v38, %v1999_v33  ;;  %v1820_v38 = vld [vmem:[#allocation2 + $0x20] sm:$0xff] }
 0x93d   :  { %v2101_v48 = vld [vmem:[#allocation2 + $0x2a8] sm:$0xff]  ;;  %v2093_v14 = vmul.f32 %v3645_v30, %v2087_v28  ;;  %v2069_v25 = vadd.f32 %v2065_v6, %v2013_v31  ;;  %v1834_v6 = vld [vmem:[#allocation2 + $0x40] sm:$0xff] }
 0x93e   :  { %v2115_v2 = vld [vmem:[#allocation2 + $0x2c8] sm:$0xff]  ;;  %v2107_v20 = vmul.f32 %v3650_v53, %v2101_v48  ;;  %v2083_v23 = vadd.f32 %v2079_v36, %v2027_v32  ;;  %v1848_v36 = vld [vmem:[#allocation2 + $0x60] sm:$0xff] }
 0x93f   :  { %v2129_v15 = vld [vmem:[#allocation2 + $0x2e8] sm:$0xff]  ;;  %v2121_v13 = vmul.f32 %v3652_v63, %v2115_v2  ;;  %v2097_v58 = vadd.f32 %v2093_v14, %v2041_v17  ;;  %v1862_v14 = vld [vmem:[#allocation2 + $0x80] sm:$0xff] }
 0x940   :  { %v2143_v45 = vld [vmem:[#allocation2 + $0x308] sm:$0xff]  ;;  %v2135_v41 = vmul.f32 %v3655_v1, %v2129_v15  ;;  %v2111_v12 = vadd.f32 %v2107_v20, %v2055_v51  ;;  %v1812_v20 = vmul.f32 %v3577_v19, %v1806_v10  ;;  %v1854_v19 = vmul.f32 %v3589_v47, %v1848_v36  ;;  %v2044_v36 = vld [vmem:[#allocation2 + $0x220] sm:$0xff] }
 0x941   :  { %v2157_v52 = vld [vmem:[#allocation2 + $0x328] sm:$0xff]  ;;  %v2149_v29 = vmul.f32 %v3662_v7, %v2143_v45  ;;  %v2125_v28 = vadd.f32 %v2121_v13, %v2069_v25  ;;  %v1890_v13 = vld [vmem:[#allocation2 + $0xc0] sm:$0xff] }
 0x942   :  { %v2171_v43 = vld [vmem:[#allocation2 + $0x348] sm:$0xff]  ;;  %v2163_v4 = vmul.f32 %v3665_v5, %v2157_v52  ;;  %v2139_v48 = vadd.f32 %v2135_v41, %v2083_v23  ;;  %v1876_v52 = vld [vmem:[#allocation2 + $0xa0] sm:$0xff]  ;;  %v1826_v41 = vmul.f32 %v3579_v44, %v1820_v38  ;;  %v1896_v10 = vmul.f32 %v3587_v37, %v1890_v13 }
 0x943   :  { %v2185_v49 = vld [vmem:[#allocation2 + $0x368] sm:$0xff]  ;;  %v2177_v60 = vmul.f32 %v3667_v57, %v2171_v43  ;;  %v2153_v2 = vadd.f32 %v2149_v29, %v2097_v58  ;;  %v1840_v29 = vmul.f32 %v3581_v9, %v1834_v6  ;;  %v1960_v44 = vld [vmem:[#allocation2 + $0x160] sm:$0xff] }
 0x944   :  { %v2199_v27 = vld [vmem:[#allocation2 + $0x388] sm:$0xff]  ;;  %v2191_v33 = vmul.f32 %v3672_v50, %v2185_v49  ;;  %v2167_v15 = vadd.f32 %v2163_v4, %v2111_v12  ;;  %v1904_v49 = vld [vmem:[#allocation2 + $0xe0] sm:$0xff]  ;;  %v2341_v12 = vld [vmem:[%s3864_s12 + $0x30] sm:$0xff]  ;;  %v1868_v4 = vmul.f32 %v3583_v54, %v1862_v14 }
 0x945   :  { %v2213_v26 = vld [vmem:[#allocation2 + $0x3a8] sm:$0xff]  ;;  %v2205_v31 = vmul.f32 %v3677_v8, %v2199_v27  ;;  %v2181_v45 = vadd.f32 %v2177_v60, %v2125_v28  ;;  %v1918_v27 = vld [vmem:[#allocation2 + $0x100] sm:$0xff]  ;;  %v1882_v60 = vmul.f32 %v3585_v11, %v1876_v52 }
 0x946   :  { %v2227_v56 = vld [vmem:[#allocation2 + $0x3c8] sm:$0xff]  ;;  %v2219_v32 = vmul.f32 %v3679_v21, %v2213_v26  ;;  %v2195_v43 = vadd.f32 %v2191_v33, %v2139_v48  ;;  %v1932_v26 = vld [vmem:[#allocation2 + $0x120] sm:$0xff]  ;;  %v1910_v48 = vmul.f32 %v3591_v3, %v1904_v49  ;;  %v1872_v38 = vadd.f32 %v1868_v4, %v1812_v20 }
 0x947   :  { %v2241_v61 = vld [vmem:[#allocation2 + $0x3e8] sm:$0xff]  ;;  %v2233_v17 = vmul.f32 %v3682_v46, %v2227_v56  ;;  %v2209_v51 = vadd.f32 %v2205_v31, %v2153_v2  ;;  %v2342_v56 = vld [vmem:[%s3864_s12 + $0x38] sm:$0xff]  ;;  %v1924_v2 = vmul.f32 %v3599_v24, %v1918_v27  ;;  %v1974_v33 = vld [vmem:[#allocation2 + $0x180] sm:$0xff]  ;;  %v1886_v54 = vadd.f32 %v1882_v60, %v1826_v41 }
 0x948   :  { %v2247_v25 = vmul.f32 %v3687_v59, %v2241_v61  ;;  %v2223_v23 = vadd.f32 %v2219_v32, %v2167_v15  ;;  %v1946_v61 = vld [vmem:[#allocation2 + $0x140] sm:$0xff]  ;;  %2358 = vmatpush.msra.mxu3 %v2342_v56  ;;  %v2340_v31 = vld [vmem:[%s3864_s12 + $0x28] sm:$0xff]  ;;  %v1938_v11 = vmul.f32 %v3604_v0, %v1932_v26  ;;  %v1914_v32 = vadd.f32 %v1910_v48, %v1854_v19 }
 0x949   :  { %v2237_v58 = vadd.f32 %v2233_v17, %v2181_v45  ;;  %v1988_v6 = vld [vmem:[#allocation2 + $0x1a0] sm:$0xff]  ;;  %v1900_v45 = vadd.f32 %v1896_v10, %v1840_v29  ;;  %v1952_v37 = vmul.f32 %v3607_v16, %v1946_v61  ;;  %v1966_v3 = vmul.f32 %v3609_v39, %v1960_v44 }
 0x94a   :  { %v2251_v28 = vadd.f32 %v2247_v25, %v2195_v43  ;;  %v2255_v9 = vadd.f32 %v2223_v23, %v2209_v51  ;;  %v2002_v15 = vld [vmem:[#allocation2 + $0x1c0] sm:$0xff]  ;;  %2359 = vmatpush.msra.mxu3 %v2341_v12  ;;  %v1928_v52 = vadd.f32 %v1924_v2, %v1872_v38  ;;  %v1942_v43 = vadd.f32 %v1938_v11, %v1886_v54 }
 0x94b   :  { %v2016_v24 = vld [vmem:[#allocation2 + $0x1e0] sm:$0xff]  ;;  %v1980_v51 = vmul.f32 %v3612_v40, %v1974_v33  ;;  %v1956_v13 = vadd.f32 %v1952_v37, %v1900_v45  ;;  %v1970_v49 = vadd.f32 %v1966_v3, %v1914_v32  ;;  %v1994_v16 = vmul.f32 %v3616_v35, %v1988_v6 }
 0x94c   :  { %v2259_v47 = vadd.f32 %v2251_v28, %v2237_v58  ;;  %v2030_v17 = vld [vmem:[#allocation2 + $0x200] sm:$0xff]  ;;  %2360 = vmatpush.msra.mxu3 %v2340_v31  ;;  %v2008_v39 = vmul.f32 %v3618_v62, %v2002_v15  ;;  %v2022_v40 = vmul.f32 %v3620_v42, %v2016_v24  ;;  %v2050_v29 = vmul.f32 %v3633_v22, %v2044_v36 }
 0x94d   :  { %v2058_v25 = vld [vmem:[#allocation2 + $0x240] sm:$0xff]  ;;  %v1984_v58 = vadd.f32 %v1980_v51, %v1928_v52  ;;  %v2036_v41 = vmul.f32 %v3627_v55, %v2030_v17  ;;  %v1998_v12 = vadd.f32 %v1994_v16, %v1942_v43  ;;  %v2337_v51 = vld [vmem:[%s3864_s12 + $0x10] sm:$0xff] }
 0x94e   :  { %v2263_v14 = vadd.f32 %v2259_v47, %v2255_v9  ;;  %v2072_v20 = vld [vmem:[#allocation2 + $0x260] sm:$0xff]  ;;  %v2012_v28 = vadd.f32 %v2008_v39, %v1956_v13  ;;  %v2064_v19 = vmul.f32 %v3640_v18, %v2058_v25  ;;  %v2026_v60 = vadd.f32 %v2022_v40, %v1970_v49  ;;  %v2390_v25 = vld [vmem:[%s3866_s14 + $0x8] sm:$0xff]  ;;  %v2423_v49 = vld [vmem:[%s3867_s15 + $0x18] sm:$0xff] }
 0x94f   :  { %v2339_v0 = vld [vmem:[%s3864_s12 + $0x20] sm:$0xff]  ;;  %v2078_v35 = vmul.f32 %v3642_v34, %v2072_v20  ;;  %v2040_v61 = vadd.f32 %v2036_v41, %v1984_v58  ;;  %v2054_v22 = vadd.f32 %v2050_v29, %v1998_v12  ;;  %v2336_v20 = vld [vmem:[%s3864_s12 + $0x8] sm:$0xff]  ;;  %v2422_v16 = vld [vmem:[%s3867_s15 + $0x10] sm:$0xff]  ;;  %v2290_v58 = vpop.f32.mrf.mxu0 }
 0x950   :  { %v2086_v27 = vld [vmem:[#allocation2 + $0x280] sm:$0xff]  ;;  %2536 = vmatpush.xpose.msk.msrb.mxu2 %vm67_vm1, %v2263_v14  ;;  %2361 = vmatpush.msra.mxu3 %v2339_v0  ;;  %v2068_v10 = vadd.f32 %v2064_v19, %v2012_v28  ;;  %v2421_v39 = vld [vmem:[%s3867_s15 + $0x8] sm:$0xff]  ;;  %v3917_v28 = vld [vmem:[#allocation9_spill] sm:$0xff] }
 0x951   :  { %v2100_v23 = vld [vmem:[#allocation2 + $0x2a0] sm:$0xff]  ;;  %v2092_v44 = vmul.f32 %v3645_v30, %v2086_v27  ;;  %v2082_v33 = vadd.f32 %v2078_v35, %v2026_v60 }
 0x952   :  { %v2114_v26 = vld [vmem:[#allocation2 + $0x2c0] sm:$0xff]  ;;  %v2106_v42 = vmul.f32 %v3650_v53, %v2100_v23 }
 0x953   :  { %v2128_v56 = vld [vmem:[#allocation2 + $0x2e0] sm:$0xff]  ;;  %v2120_v48 = vmul.f32 %v3652_v63, %v2114_v26  ;;  %v2096_v34 = vadd.f32 %v2092_v44, %v2040_v61 }
 0x954   :  { %v2142_v62 = vld [vmem:[#allocation2 + $0x300] sm:$0xff]  ;;  %v2134_v2 = vmul.f32 %v3655_v1, %v2128_v56  ;;  %v2110_v30 = vadd.f32 %v2106_v42, %v2054_v22  ;;  %v3916_v56 = vld [vmem:[#allocation8_spill] sm:$0xff] }
 0x955   :  { %v2156_v4 = vld [vmem:[#allocation2 + $0x320] sm:$0xff]  ;;  %v2148_v31 = vmul.f32 %v3662_v7, %v2142_v62  ;;  %v2124_v11 = vadd.f32 %v2120_v48, %v2068_v10 }
 0x956   :  { %v2170_v55 = vld [vmem:[#allocation2 + $0x340] sm:$0xff]  ;;  %v2162_v47 = vmul.f32 %v3665_v5, %v2156_v4  ;;  %v2138_v45 = vadd.f32 %v2134_v2, %v2082_v33 }
 0x957   :  { %v2184_v9 = vld [vmem:[#allocation2 + $0x360] sm:$0xff]  ;;  %v2176_v53 = vmul.f32 %v3667_v57, %v2170_v55  ;;  %v2152_v63 = vadd.f32 %v2148_v31, %v2096_v34 }
 0x958   :  { %v2198_v18 = vld [vmem:[#allocation2 + $0x380] sm:$0xff]  ;;  %v2190_v6 = vmul.f32 %v3672_v50, %v2184_v9  ;;  %v2166_v32 = vadd.f32 %v2162_v47, %v2110_v30 }
 0x959   :  { %v2212_v38 = vld [vmem:[#allocation2 + $0x3a0] sm:$0xff]  ;;  %v2204_v1 = vmul.f32 %v3677_v8, %v2198_v18  ;;  %v2180_v37 = vadd.f32 %v2176_v53, %v2124_v11 }
 0x95a   :  { %v2226_v54 = vld [vmem:[#allocation2 + $0x3c0] sm:$0xff]  ;;  %v2218_v3 = vmul.f32 %v3679_v21, %v2212_v38  ;;  %v2194_v5 = vadd.f32 %v2190_v6, %v2138_v45  ;;  %v2392_v21 = vld [vmem:[%s3866_s14 + $0x18] sm:$0xff] }
 0x95b   :  { %v2240_v15 = vld [vmem:[#allocation2 + $0x3e0] sm:$0xff]  ;;  %v2232_v7 = vmul.f32 %v3682_v46, %v2226_v54  ;;  %v2208_v24 = vadd.f32 %v2204_v1, %v2152_v63  ;;  %v2338_v46 = vld [vmem:[%s3864_s12 + $0x18] sm:$0xff]  ;;  %2412 = vmatpush.msra.mxu1 %v2392_v21 }
 0x95c   :  { %v2246_v17 = vmul.f32 %v3687_v59, %v2240_v15  ;;  %v2222_v36 = vadd.f32 %v2218_v3, %v2166_v32  ;;  %v2266_v8 = vld [vmem:[%s3861_s9] sm:$0xff]  ;;  %v2391_v59 = vld [vmem:[%s3866_s14 + $0x10] sm:$0xff]  ;;  %2362 = vmatpush.msra.mxu3 %v2338_v46  ;;  %s2471_s9 = sshll.u32 %s3870_s18, 4  ;;  %s2472_s9 = int_to_ptr.hbm [resolvable:$true] %s2471_s9 }
 0x95d   :  { %v2236_v14 = vadd.f32 %v2232_v7, %v2180_v37  ;;  %2413 = vmatpush.msra.mxu1 %v2391_v59  ;;  %v2389_v0 = vld [vmem:[%s3866_s14] sm:$0xff] }
 0x95e   :  { %v2250_v57 = vadd.f32 %v2246_v17, %v2194_v5  ;;  %v2254_v52 = vadd.f32 %v2222_v36, %v2208_v24  ;;  %2363 = vmatpush.msra.mxu3 %v2337_v51  ;;  %v2335_v13 = vld [vmem:[%s3864_s12] sm:$0xff] }
 0x95f   :  { %2414 = vmatpush.msra.mxu1 %v2390_v25  ;;  %v2420_v27 = vld [vmem:[%s3867_s15] sm:$0xff] }
 0x960   :  { %v2258_v50 = vadd.f32 %v2250_v57, %v2236_v14  ;;  %2364 = vmatpush.msra.mxu3 %v2336_v20  ;;  %v2672_v23 = vld [vmem:[%s3863_s11] ss:$0 sm:$0xff] }
 0x961   :  { %2415 = vmatpush.msra.mxu1 %v2389_v0  ;;  %v2674_v19 = vld [vmem:[%s3865_s13] ss:$0 sm:$0xff] }
 0x962   :  { %v2262_v43 = vadd.f32 %v2258_v50, %v2254_v52  ;;  %2365 = vmatpush.msra.mxu3 %v2335_v13  ;;  %v2675_v2 = vld [vmem:[%s3869_s17] ss:$0 sm:$0xff] }
 0x963   :  { %2440 = vmatpush.msrb.mxu1 %v2423_v49  ;;  %v2673_v33 = vld [vmem:[%s3868_s16] ss:$0 sm:$0xff]  ;;  %s2731_s16 = smov [#allocation4]  }
 0x964   :  { %2537 = vmatpush.xpose.msk.msrb.mxu2 %vm67_vm1, %v2262_v43  ;;  %s2469_s17 = sshll.u32 %s2731_s16, 4  ;;  %s2470_s17 = int_to_ptr.vmem [resolvable:$true] %s2469_s17 }
 0x965   :  { %2441 = vmatpush.msrb.mxu1 %v2422_v16 }
 0x967   :  { %2538 = vmatmul.msk.f32.vlgmr.msrb.gmra.mxu2 %vm67_vm1, %v2266_v8  ;;  %2442 = vmatpush.msrb.mxu1 %v2421_v39 }
 0x969   :  { %2443 = vmatpush.msrb.mxu1 %v2420_v27 }
 0x9ea   :  { %v2325_v40 = vpop.f32.mrf.mxu2 }
 0x9eb   :  { %v2326_v41 = vadd.f32 %v2325_v40, %v2290_v58 }
 0x9ed   :  { %v2332_v29 = vadd.f32 %v2672_v23, %v2326_v41 }
 0x9ef   :  { %v2333_v26 = vmax.f32 %v2332_v29, 0.0 }
 0x9f1   :  { %v2334_v12 = vsel %vm168_vm2, %v2333_v26, %v3916_v56  ;;  %2541 = vmatmul.msk.f32.vlgmr.msra.gmra.mxu1 %vm168_vm2, %v2333_v26 }
 0x9f2   :  { %2539 = vmatmul.msk.f32.vlgmr.msra.gmra.mxu3 %vm876_vm3, %v2334_v12 }
 0x9f9   :  { %2542 = vmatmul.msk.f32.vlgmr.msrb.gmra.mxu1 %vm168_vm2, %v3917_v28 }
 0xa6e   :  { %v2417_v44 = vpop.f32.mrf.mxu1 }
 0xa6f   :  { %v2418_v30 = vadd.f32 %v2673_v33, %v2417_v44 }
 0xa75   :  { %v2367_v35 = vpop.f32.mrf.mxu3 }
 0xa76   :  { %v2368_v62 = vadd.f32 %v2674_v19, %v2367_v35  ;;  %v2445_v18 = vpop.f32.mrf.mxu1 }
 0xa77   :  { %v2446_v38 = vadd.f32 %v2675_v2, %v2445_v18 }
 0xa78   :  { %v2540_v4 = vmul.f32 -1.442695, %v2368_v62 }
 0xa7a   :  { %2688 = vpow2.f32 %v2540_v4 }
 0xa80   :  { %v2689_v60 = vpop.eup %2688 }
 0xa81   :  { %v2373_v61 = vadd.f32 1.0, %v2689_v60 }
 0xa83   :  { %2690 = vrcp.f32 %v2373_v61  ;;  %v2385_v22 = vand.u32 2147483648, %v2373_v61  ;;  %v2383_v48 = vand.u32 2147483647, %v2373_v61  ;;  %vm2379_vm13 = vweird.f32 %v2373_v61 }
 0xa85   :  { %v2386_v31 = vor.u32 1.1754944e-38, %v2385_v22  ;;  %vm2384_vm15 = vcmp.eq.f32.partialorder %v2383_v48, 8.507059e+37 }
 0xa89   :  { %v2691_v42 = vpop.eup %2690 }
 0xa8a   :  { %v2375_v55 = vmul.f32 %v2691_v42, %v2373_v61  ;;  %vm2380_vm12 = vweird.f32 %v2691_v42 }
 0xa8b   :  { %vm2381_vm14 = vmor %vm2379_vm13, %vm2380_vm12 }
 0xa8c   :  { %v2376_v9 = vsub.f32 1.0, %v2375_v55 }
 0xa8e   :  { %v2377_v10 = vmul.f32 %v2691_v42, %v2376_v9 }
 0xa90   :  { %v2378_v34 = vadd.f32 %v2691_v42, %v2377_v10 }
 0xa92   :  { %v2382_v47 = vsel %vm2381_vm14, %v2691_v42, %v2378_v34 }
 0xa93   :  { %v2387_v54 = vsel %vm2384_vm15, %v2386_v31, %v2382_v47 }
 0xa94   :  { %v2448_v11 = vmul.f32 %v2446_v38, %v2387_v54  ;;  %v2451_v15 = vsub.f32 1.0, %v2387_v54  ;;  %v2457_v63 = vmul.f32 %v2387_v54, %v3916_v56 }
 0xa96   :  { %v2449_v53 = vadd.f32 %v2448_v11, %v2418_v30 }
 0xa98   :  { %2692 = vtanh.f32 %v2449_v53 }
 0xa9e   :  { %v2693_v6 = vpop.eup %2692 }
 0xa9f   :  { %2453 = vrot.lane.b32.xlu1 %v2693_v6, %s2729_s6 }
 0xb11   :  { %v2454_v45 = vpop.permute.xlu1 %2453 }
 0xb12   :  { %v2456_v1 = vmul.f32 %v2454_v45, %v2451_v15 }
 0xb14   :  { %v2458_v32 = vadd.f32 %v2457_v63, %v2456_v1 }
 0xb16   :  { %2460 = vrot.lane.b32.xlu2 %v2458_v32, %s2730_s19 }
 0xb70   :  { %v2461_v37 = vpop.permute.xlu2 %2460 }
 0xb71   :  { %2463 = vst.msk [vmem:[#allocation4] sm:$0xff] %vm168_vm2, %v2461_v37 }
 0xb72   :  { %2474 = dma.vmem_to_hbm [thread:$0]  %s2470_s17, 128, %s2472_s9, [#allocation5]  }
 0xb73   :  { %2722 = dma.done.wait [#allocation5], 128  }
 0xb74   :  { %2723 = vsyncadd [#allocation5], 4294967168 }
 0xb75   :  { %2479 = vsyncpa [#allocation5], 1 }

</bundles_post_ra>
